<compile_context>
chip_gen: v5e
topology: v5e:2x2
jax: 0.10.0
libtpu: 0.0.40
codegen_flags: <defaults>
</compile_context>

<pallas_src>
import jax
import jax.numpy as jnp
from jax import lax
from jax.experimental import pallas as pl
from jax.experimental.pallas import tpu as pltpu

IN_FEATURES = 80 * 80   # 6400
HIDDEN = 200            # true hidden width, no zero padding streamed from HBM
N_ACTIONS = 6
OUT_LANES = 128         # packed output: lanes 0..5 probs, lane 6 value, rest 0


def _ac_kernel(x_ref, w1_ref, b1_ref, wh_ref, bh_ref, out_ref):
    """Single-step fused forward: (B,6400)bf16 @ (6400,200)bf16 -> f32,
    bias + ReLU, packed heads matmul, masked softmax, lane-dense store."""
    # Cast x in-kernel: VPU cast is hidden under the W1 DMA.
    x = x_ref[...].astype(jnp.bfloat16)

    # Dominant matmul: bf16 inputs, f32 accumulation on the MXU.
    acc = jnp.dot(x, w1_ref[...], preferred_element_type=jnp.float32)   # (B, 200)

    # hidden = relu(x @ W1 + b1)
    h = jnp.maximum(acc + b1_ref[...], 0.0)                             # (B, 200) f32

    # Both heads in one packed matmul: lanes 0..5 action logits, lane 6 value.
    packed = jnp.dot(h, wh_ref[...],
                     preferred_element_type=jnp.float32) + bh_ref[...]  # (B, 128)

    lane = lax.broadcasted_iota(jnp.int32, packed.shape, 1)
    act_mask = lane < N_ACTIONS

    # Softmax over the 6 action lanes only (lanes 0..5 are always unmasked,
    # so the row max is finite and exp() never sees inf-inf).
    masked = jnp.where(act_mask, packed, -jnp.inf)
    m = jnp.max(masked, axis=-1, keepdims=True)
    e = jnp.exp(masked - m)                              # exactly 0 outside lanes 0..5
    probs = e / jnp.sum(e, axis=-1, keepdims=True)       # exact divide: sums to 1

    # pack: probs in lanes 0..5, raw value (from `packed`) in lane 6, 0 elsewhere
    out_ref[...] = jnp.where(lane == N_ACTIONS, packed, probs).astype(out_ref.dtype)


def prepare_params(w1, b1, w2, b2, w3t, b3):
    """Pack math-layout f32 params into kernel layout:
       w1  (6400,200) -> bf16 (6400,200)           (streamed, dominant bytes)
       b1  (1,200)    -> f32  (1,200)
       w2 (200,6), w3t (1,200), b2 (1,6), b3 (1,1)
                      -> wh f32 (200,128), bh f32 (1,128)  (lane 6 = value head)."""
    w1_p = w1.astype(jnp.bfloat16)
    b1_p = b1.astype(jnp.float32)

    wh = jnp.zeros((HIDDEN, OUT_LANES), jnp.float32)
    wh = wh.at[:, :N_ACTIONS].set(w2)
    wh = wh.at[:, N_ACTIONS].set(w3t[0])
    bh = jnp.zeros((1, OUT_LANES), jnp.float32)
    bh = bh.at[:, :N_ACTIONS].set(b2[0])
    bh = bh.at[:, N_ACTIONS].set(b3[0, 0])
    return w1_p, b1_p, wh, bh


def actor_critic_forward(x, w1_p, b1_p, wh, bh):
    """x: (B, 6400) f32; params from prepare_params."""
    B, K = x.shape
    assert K == IN_FEATURES

    cost = pl.CostEstimate(
        flops=2 * B * IN_FEATURES * HIDDEN + 2 * B * HIDDEN * OUT_LANES,
        transcendentals=B * OUT_LANES,
        bytes_accessed=(B * IN_FEATURES * 4            # x (f32 in)
                        + IN_FEATURES * HIDDEN * 2     # W1 (bf16)
                        + HIDDEN * 4 + HIDDEN * OUT_LANES * 4
                        + OUT_LANES * 4 + B * OUT_LANES * 4),
    )

    out = pl.pallas_call(
        _ac_kernel,
        out_shape=jax.ShapeDtypeStruct((B, OUT_LANES), jnp.float32),
        grid_spec=pltpu.PrefetchScalarGridSpec(
            num_scalar_prefetch=0,
            grid=(1,),
            in_specs=[
                pl.BlockSpec((B, IN_FEATURES), lambda k: (0, 0)),       # x (f32)
                pl.BlockSpec((IN_FEATURES, HIDDEN), lambda k: (0, 0)),  # W1 (bf16)
                pl.BlockSpec((1, HIDDEN), lambda k: (0, 0)),            # b1
                pl.BlockSpec((HIDDEN, OUT_LANES), lambda k: (0, 0)),    # packed heads W
                pl.BlockSpec((1, OUT_LANES), lambda k: (0, 0)),         # packed heads b
            ],
            out_specs=pl.BlockSpec((B, OUT_LANES), lambda k: (0, 0)),
        ),
        compiler_params=pltpu.CompilerParams(
            dimension_semantics=("arbitrary",)),
        cost_estimate=cost,
    )(x, w1_p, b1_p, wh, bh)

    probs = out[:, :N_ACTIONS]
    values = out[:, N_ACTIONS:N_ACTIONS + 1]
    return probs, values


def _init_params(key):
    """Deterministic init mimicking nn.Linear defaults (uniform +-1/sqrt(fan_in))."""
    k1, k2, k3, k4, k5, k6 = jax.random.split(key, 6)
    lim1 = 1.0 / jnp.sqrt(IN_FEATURES)
    lim2 = 1.0 / jnp.sqrt(HIDDEN)
    w1 = jax.random.uniform(k1, (IN_FEATURES, HIDDEN), jnp.float32, -lim1, lim1)
    b1 = jax.random.uniform(k2, (1, HIDDEN), jnp.float32, -lim1, lim1)
    w2 = jax.random.uniform(k3, (HIDDEN, N_ACTIONS), jnp.float32, -lim2, lim2)
    b2 = jax.random.uniform(k4, (1, N_ACTIONS), jnp.float32, -lim2, lim2)
    w3t = jax.random.uniform(k5, (1, HIDDEN), jnp.float32, -lim2, lim2)
    b3 = jax.random.uniform(k6, (1, 1), jnp.float32, -lim2, lim2)
    return w1, b1, w2, b2, w3t, b3


def _reference(x, w1, b1, w2, b2, w3t, b3):
    """Pure-f32 JAX reference matching the PyTorch module semantics."""
    h = jnp.maximum(x @ w1 + b1, 0.0)
    probs = jax.nn.softmax(h @ w2 + b2, axis=-1)
    values = jnp.sum(h * w3t, axis=-1, keepdims=True) + b3
    return probs, values


if __name__ == "__main__":
    key = jax.random.PRNGKey(0)
    kx, kp = jax.random.split(key)
    B = 2
    x = jax.random.uniform(kx, (B, IN_FEATURES), jnp.float32)  # pixel-ish input
    params = _init_params(kp)

    packed_params = prepare_params(*params)
    fwd = jax.jit(actor_critic_forward)
    probs, values = fwd(x, *packed_params)
    jax.block_until_ready((probs, values))

    # sanity check against pure-f32 JAX reference (bf16 W1/x -> looser tolerance)
    ref_probs, ref_values = _reference(x, *params)
    assert probs.shape == (B, N_ACTIONS) and values.shape == (B, 1)
    assert jnp.allclose(probs, ref_probs, atol=2e-2, rtol=2e-2)
    assert jnp.allclose(values, ref_values, atol=3e-2, rtol=3e-2)
    assert jnp.allclose(jnp.sum(probs, axis=-1), 1.0, atol=2e-3)

    print("KERNEL_OK")
</pallas_src>

<mosaic_0001>
module attributes {stable_mosaic.version = 11 : i64} {
  func.func @_ac_kernel(%arg0: i32, %arg1: memref<2x6400xf32, #tpu.memory_space<vmem>>, %arg2: memref<6400x200xbf16, #tpu.memory_space<vmem>>, %arg3: memref<1x200xf32, #tpu.memory_space<vmem>>, %arg4: memref<200x128xf32, #tpu.memory_space<vmem>>, %arg5: memref<1x128xf32, #tpu.memory_space<vmem>>, %arg6: memref<2x128xf32, #tpu.memory_space<vmem>>) attributes {dimension_semantics = [#tpu.dimension_semantics<arbitrary>], iteration_bounds = array<i64: 1>, scalar_prefetch = 0 : i64, scratch_operands = 0 : i64, tpu.core_type = #tpu.core_type<tc>, window_params = [{pipeline_mode = #tpu.pipeline_mode<synchronous>, transform_indices = @transform_0, window_bounds = array<i64: 2, 6400>}, {pipeline_mode = #tpu.pipeline_mode<synchronous>, transform_indices = @transform_1, window_bounds = array<i64: 6400, 200>}, {pipeline_mode = #tpu.pipeline_mode<synchronous>, transform_indices = @transform_2, window_bounds = array<i64: 1, 200>}, {pipeline_mode = #tpu.pipeline_mode<synchronous>, transform_indices = @transform_3, window_bounds = array<i64: 200, 128>}, {pipeline_mode = #tpu.pipeline_mode<synchronous>, transform_indices = @transform_4, window_bounds = array<i64: 1, 128>}, {pipeline_mode = #tpu.pipeline_mode<synchronous>, transform_indices = @transform_5, window_bounds = array<i64: 2, 128>}]} {
    %c0 = arith.constant 0 : index
    %c0_0 = arith.constant 0 : index
    %0 = vector.load %arg1[%c0, %c0_0] : memref<2x6400xf32, #tpu.memory_space<vmem>>, vector<2x6400xf32>
    %1 = arith.truncf %0 : vector<2x6400xf32> to vector<2x6400xbf16>
    %c0_1 = arith.constant 0 : index
    %c0_2 = arith.constant 0 : index
    %2 = vector.load %arg2[%c0_1, %c0_2] : memref<6400x200xbf16, #tpu.memory_space<vmem>>, vector<6400x200xbf16>
    %cst = arith.constant dense<0.000000e+00> : vector<2x200xf32>
    %3 = tpu.matmul %1, %2, %cst {dimension_numbers = #tpu.dot_dimension_numbers<[1], [0], [0], [1], [0, 0, 1, 1], [], []>} : vector<2x6400xbf16>, vector<6400x200xbf16>, vector<2x200xf32> -> vector<2x200xf32>
    %c0_3 = arith.constant 0 : index
    %c0_4 = arith.constant 0 : index
    %4 = vector.load %arg3[%c0_3, %c0_4] : memref<1x200xf32, #tpu.memory_space<vmem>>, vector<1x200xf32>
    %5 = vector.broadcast %4 : vector<1x200xf32> to vector<2x200xf32>
    %6 = arith.addf %3, %5 : vector<2x200xf32>
    %cst_5 = arith.constant 0.000000e+00 : f32
    %7 = vector.broadcast %cst_5 : f32 to vector<2x200xf32>
    %8 = arith.maximumf %6, %7 : vector<2x200xf32>
    %c0_6 = arith.constant 0 : index
    %c0_7 = arith.constant 0 : index
    %9 = vector.load %arg4[%c0_6, %c0_7] : memref<200x128xf32, #tpu.memory_space<vmem>>, vector<200x128xf32>
    %cst_8 = arith.constant dense<0.000000e+00> : vector<2x128xf32>
    %10 = tpu.matmul %8, %9, %cst_8 {dimension_numbers = #tpu.dot_dimension_numbers<[1], [0], [0], [1], [0, 0, 1, 1], [], []>} : vector<2x200xf32>, vector<200x128xf32>, vector<2x128xf32> -> vector<2x128xf32>
    %c0_9 = arith.constant 0 : index
    %c0_10 = arith.constant 0 : index
    %11 = vector.load %arg5[%c0_9, %c0_10] : memref<1x128xf32, #tpu.memory_space<vmem>>, vector<1x128xf32>
    %12 = vector.broadcast %11 : vector<1x128xf32> to vector<2x128xf32>
    %13 = arith.addf %10, %12 : vector<2x128xf32>
    %14 = tpu.iota {dimensions = array<i32: 1>} : vector<2x128xi32>
    %c6_i32 = arith.constant 6 : i32
    %15 = vector.broadcast %c6_i32 : i32 to vector<2x128xi32>
    %16 = arith.cmpi slt, %14, %15 : vector<2x128xi32>
    %cst_11 = arith.constant 0xFF800000 : f32
    %17 = vector.broadcast %cst_11 : f32 to vector<2x128xf32>
    %18 = arith.select %16, %13, %17 : vector<2x128xi1>, vector<2x128xf32>
    %cst_12 = arith.constant dense<0xFF800000> : vector<2xf32>
    %19 = vector.multi_reduction <maximumf>, %18, %cst_12 [1] : vector<2x128xf32> to vector<2xf32>
    %20 = vector.shape_cast %19 : vector<2xf32> to vector<2x1xf32>
    %21 = vector.broadcast %20 : vector<2x1xf32> to vector<2x128xf32>
    %22 = arith.subf %18, %21 : vector<2x128xf32>
    %23 = math.exp %22 : vector<2x128xf32>
    %cst_13 = arith.constant dense<0.000000e+00> : vector<2xf32>
    %24 = vector.multi_reduction <add>, %23, %cst_13 [1] : vector<2x128xf32> to vector<2xf32>
    %25 = vector.shape_cast %24 : vector<2xf32> to vector<2x1xf32>
    %26 = vector.broadcast %25 : vector<2x1xf32> to vector<2x128xf32>
    %27 = arith.divf %23, %26 : vector<2x128xf32>
    %c6_i32_14 = arith.constant 6 : i32
    %28 = vector.broadcast %c6_i32_14 : i32 to vector<2x128xi32>
    %29 = arith.cmpi eq, %14, %28 : vector<2x128xi32>
    %30 = arith.select %29, %13, %27 : vector<2x128xi1>, vector<2x128xf32>
    %c0_15 = arith.constant 0 : index
    %c0_16 = arith.constant 0 : index
    %31 = vector.load %arg6[%c0_15, %c0_16] : memref<2x128xf32, #tpu.memory_space<vmem>>, vector<2x128xf32>
    tpu.vector_store %arg6[%c0_15, %c0_16], %30 {strides = array<i32>} : memref<2x128xf32, #tpu.memory_space<vmem>>, vector<2x128xf32>,
    return
  }
  func.func @transform_0(%arg0: i32) -> (i32, i32) {
    %c0_i32 = arith.constant 0 : i32
    %c0_i32_0 = arith.constant 0 : i32
    %c0_i32_1 = arith.constant 0 : i32
    return %c0_i32, %c0_i32_0 : i32, i32
  }
  func.func @transform_1(%arg0: i32) -> (i32, i32) {
    %c0_i32 = arith.constant 0 : i32
    %c0_i32_0 = arith.constant 0 : i32
    %c0_i32_1 = arith.constant 0 : i32
    return %c0_i32, %c0_i32_0 : i32, i32
  }
  func.func @transform_2(%arg0: i32) -> (i32, i32) {
    %c0_i32 = arith.constant 0 : i32
    %c0_i32_0 = arith.constant 0 : i32
    %c0_i32_1 = arith.constant 0 : i32
    return %c0_i32, %c0_i32_0 : i32, i32
  }
  func.func @transform_3(%arg0: i32) -> (i32, i32) {
    %c0_i32 = arith.constant 0 : i32
    %c0_i32_0 = arith.constant 0 : i32
    %c0_i32_1 = arith.constant 0 : i32
    return %c0_i32, %c0_i32_0 : i32, i32
  }
  func.func @transform_4(%arg0: i32) -> (i32, i32) {
    %c0_i32 = arith.constant 0 : i32
    %c0_i32_0 = arith.constant 0 : i32
    %c0_i32_1 = arith.constant 0 : i32
    return %c0_i32, %c0_i32_0 : i32, i32
  }
  func.func @transform_5(%arg0: i32) -> (i32, i32) {
    %c0_i32 = arith.constant 0 : i32
    %c0_i32_0 = arith.constant 0 : i32
    %c0_i32_1 = arith.constant 0 : i32
    return %c0_i32, %c0_i32_0 : i32, i32
  }
}

</mosaic_0001>

<bundles_post_ra>
// kernel: actor_critic_forward.1
= control target key start
LH: loop header
LB: loop body
LE: loop exit
PB: predicated region body
PF: predicated region fallthrough
CT: control target
= control target key end

     0   :  { %vm6347_vm0 = vcmask 588800   ;;  %vm6395_vm2 = vcmask 1041408   ;;  %s15727_s1 = inlined_call_operand.vmem [shape: bf16[6400,200], index: 1, kind: input, shape index: {}]   ;;  %s15728_s0 = inlined_call_operand.vmem [shape: f32[2,6400], index: 0, kind: input, shape index: {}]   ;;  %s15729_s2 = inlined_call_operand.vmem [shape: f32[1,200], index: 2, kind: input, shape index: {}]   ;;  %s15730_s3 = inlined_call_operand.vmem [shape: f32[200,128], index: 3, kind: input, shape index: {}]   ;;  %s15731_s4 = inlined_call_operand.vmem [shape: f32[1,128], index: 4, kind: input, shape index: {}]   ;;  %s15732_s5 = inlined_call_operand.vmem [shape: f32[2,128], index: 5, kind: output, shape index: {}]  }
   0x1   :  { %v6485_v0 = vld [vmem:[%s15727_s1 + $0x70] sm:$0xf]  ;;  %v9643_v1 = vld [vmem:[%s15727_s1 + $0x74] sm:$0xf0]  ;;  %v6477_v11 = vld [vmem:[%s15727_s1 + $0x60] sm:$0xf] }
   0x2   :  { %v6549_v2 = vld [vmem:[%s15727_s1 + $0xf0] sm:$0xf]  ;;  %v6486_v3 = vor.u32 %v9643_v1, %v6485_v0  ;;  %v9659_v4 = vld [vmem:[%s15727_s1 + $0xf4] sm:$0xf0]  ;;  %v9641_v13 = vld [vmem:[%s15727_s1 + $0x64] sm:$0xf0] }
   0x3   :  { %v6613_v5 = vld [vmem:[%s15727_s1 + $0x170] sm:$0xf]  ;;  %v9675_v6 = vld [vmem:[%s15727_s1 + $0x174] sm:$0xf0]  ;;  %v6550_v7 = vor.u32 %v9659_v4, %v6549_v2  ;;  %v6541_v14 = vld [vmem:[%s15727_s1 + $0xe0] sm:$0xf]  ;;  %v6478_v16 = vor.u32 %v9641_v13, %v6477_v11 }
   0x4   :  { %v6614_v8 = vor.u32 %v9675_v6, %v6613_v5  ;;  %v6677_v9 = vld [vmem:[%s15727_s1 + $0x1f0] sm:$0xf]  ;;  %v9691_v10 = vld [vmem:[%s15727_s1 + $0x1f4] sm:$0xf0]  ;;  %5016 = vmatpush.bf16.msra.mxu0 %v6486_v3  ;;  %v9657_v15 = vld [vmem:[%s15727_s1 + $0xe4] sm:$0xf0] }
   0x5   :  { %v6678_v12 = vor.u32 %v9691_v10, %v6677_v9  ;;  %5029 = vmatpush.bf16.msra.mxu1 %v6550_v7  ;;  %v6542_v17 = vor.u32 %v9657_v15, %v6541_v14  ;;  %v6605_v18 = vld [vmem:[%s15727_s1 + $0x160] sm:$0xf]  ;;  %v9673_v19 = vld [vmem:[%s15727_s1 + $0x164] sm:$0xf0]  ;;  %v6469_v23 = vld [vmem:[%s15727_s1 + $0x50] sm:$0xf] }
   0x6   :  { %5042 = vmatpush.bf16.msra.mxu2 %v6614_v8  ;;  %v6669_v20 = vld [vmem:[%s15727_s1 + $0x1e0] sm:$0xf]  ;;  %v6606_v21 = vor.u32 %v9673_v19, %v6605_v18  ;;  %v9689_v22 = vld [vmem:[%s15727_s1 + $0x1e4] sm:$0xf0]  ;;  %v9639_v24 = vld [vmem:[%s15727_s1 + $0x54] sm:$0xf0] }
   0x7   :  { %5055 = vmatpush.bf16.msra.mxu3 %v6678_v12  ;;  %v6670_v25 = vor.u32 %v9689_v22, %v6669_v20  ;;  %v6533_v26 = vld [vmem:[%s15727_s1 + $0xd0] sm:$0xf]  ;;  %v9655_v27 = vld [vmem:[%s15727_s1 + $0xd4] sm:$0xf0]  ;;  %v6470_v29 = vor.u32 %v9639_v24, %v6469_v23  ;;  %v6461_v35 = vld [vmem:[%s15727_s1 + $0x40] sm:$0xf] }
   0x8   :  { %v6597_v28 = vld [vmem:[%s15727_s1 + $0x150] sm:$0xf]  ;;  %5017 = vmatpush.bf16.msra.mxu0 %v6478_v16  ;;  %v9671_v30 = vld [vmem:[%s15727_s1 + $0x154] sm:$0xf0]  ;;  %v6534_v33 = vor.u32 %v9655_v27, %v6533_v26  ;;  %v9637_v36 = vld [vmem:[%s15727_s1 + $0x44] sm:$0xf0] }
   0x9   :  { %v6661_v31 = vld [vmem:[%s15727_s1 + $0x1d0] sm:$0xf]  ;;  %v9687_v32 = vld [vmem:[%s15727_s1 + $0x1d4] sm:$0xf0]  ;;  %5030 = vmatpush.bf16.msra.mxu1 %v6542_v17  ;;  %v6598_v34 = vor.u32 %v9671_v30, %v6597_v28  ;;  %v6525_v37 = vld [vmem:[%s15727_s1 + $0xc0] sm:$0xf]  ;;  %v6462_v44 = vor.u32 %v9637_v36, %v6461_v35 }
   0xa   :  { %5043 = vmatpush.bf16.msra.mxu2 %v6606_v21  ;;  %v6662_v38 = vor.u32 %v9687_v32, %v6661_v31  ;;  %v9653_v39 = vld [vmem:[%s15727_s1 + $0xc4] sm:$0xf0]  ;;  %v6589_v40 = vld [vmem:[%s15727_s1 + $0x140] sm:$0xf]  ;;  %v6453_v47 = vld [vmem:[%s15727_s1 + $0x30] sm:$0xf] }
   0xb   :  { %5056 = vmatpush.bf16.msra.mxu3 %v6670_v25  ;;  %v9669_v41 = vld [vmem:[%s15727_s1 + $0x144] sm:$0xf0]  ;;  %v6653_v42 = vld [vmem:[%s15727_s1 + $0x1c0] sm:$0xf]  ;;  %v6526_v45 = vor.u32 %v9653_v39, %v6525_v37  ;;  %v9635_v48 = vld [vmem:[%s15727_s1 + $0x34] sm:$0xf0] }
   0xc   :  { %v9685_v43 = vld [vmem:[%s15727_s1 + $0x1c4] sm:$0xf0]  ;;  %5018 = vmatpush.bf16.msra.mxu0 %v6470_v29  ;;  %v6590_v46 = vor.u32 %v9669_v41, %v6589_v40  ;;  %v6517_v49 = vld [vmem:[%s15727_s1 + $0xb0] sm:$0xf]  ;;  %v9651_v51 = vld [vmem:[%s15727_s1 + $0xb4] sm:$0xf0]  ;;  %v6454_v56 = vor.u32 %v9635_v48, %v6453_v47 }
   0xd   :  { %5031 = vmatpush.bf16.msra.mxu1 %v6534_v33  ;;  %v6654_v50 = vor.u32 %v9685_v43, %v6653_v42  ;;  %v6581_v52 = vld [vmem:[%s15727_s1 + $0x130] sm:$0xf]  ;;  %v9667_v53 = vld [vmem:[%s15727_s1 + $0x134] sm:$0xf0]  ;;  %v6518_v57 = vor.u32 %v9651_v51, %v6517_v49  ;;  %v6445_v59 = vld [vmem:[%s15727_s1 + $0x20] sm:$0xf] }
   0xe   :  { %5044 = vmatpush.bf16.msra.mxu2 %v6598_v34  ;;  %v6645_v54 = vld [vmem:[%s15727_s1 + $0x1b0] sm:$0xf]  ;;  %v9683_v55 = vld [vmem:[%s15727_s1 + $0x1b4] sm:$0xf0]  ;;  %v6582_v58 = vor.u32 %v9667_v53, %v6581_v52  ;;  %v9633_v60 = vld [vmem:[%s15727_s1 + $0x24] sm:$0xf0] }
   0xf   :  { %5057 = vmatpush.bf16.msra.mxu3 %v6662_v38  ;;  %v6509_v61 = vld [vmem:[%s15727_s1 + $0xa0] sm:$0xf]  ;;  %v6646_v62 = vor.u32 %v9683_v55, %v6645_v54  ;;  %v9649_v63 = vld [vmem:[%s15727_s1 + $0xa4] sm:$0xf0]  ;;  %v6446_v4 = vor.u32 %v9633_v60, %v6445_v59  ;;  %v6437_v7 = vld [vmem:[%s15727_s1 + $0x10] sm:$0xf] }
  0x10   :  { %5019 = vmatpush.bf16.msra.mxu0 %v6462_v44  ;;  %v6573_v0 = vld [vmem:[%s15727_s1 + $0x120] sm:$0xf]  ;;  %v9665_v1 = vld [vmem:[%s15727_s1 + $0x124] sm:$0xf0]  ;;  %v6510_v5 = vor.u32 %v9649_v63, %v6509_v61  ;;  %v9631_v8 = vld [vmem:[%s15727_s1 + $0x14] sm:$0xf0] }
  0x11   :  { %5032 = vmatpush.bf16.msra.mxu1 %v6526_v45  ;;  %v6637_v2 = vld [vmem:[%s15727_s1 + $0x1a0] sm:$0xf]  ;;  %v9681_v3 = vld [vmem:[%s15727_s1 + $0x1a4] sm:$0xf0]  ;;  %v6574_v6 = vor.u32 %v9665_v1, %v6573_v0  ;;  %v6501_v9 = vld [vmem:[%s15727_s1 + $0x90] sm:$0xf]  ;;  %v6438_v16 = vor.u32 %v9631_v8, %v6437_v7 }
  0x12   :  { %5045 = vmatpush.bf16.msra.mxu2 %v6590_v46  ;;  %v6638_v10 = vor.u32 %v9681_v3, %v6637_v2  ;;  %v9647_v11 = vld [vmem:[%s15727_s1 + $0x94] sm:$0xf0]  ;;  %v6565_v12 = vld [vmem:[%s15727_s1 + $0x110] sm:$0xf]  ;;  %v6429_v17 = vld [vmem:[%s15727_s1] sm:$0xf] }
  0x13   :  { %5058 = vmatpush.bf16.msra.mxu3 %v6654_v50  ;;  %v9663_v13 = vld [vmem:[%s15727_s1 + $0x114] sm:$0xf0]  ;;  %v6629_v14 = vld [vmem:[%s15727_s1 + $0x190] sm:$0xf]  ;;  %v9629_v18 = vld [vmem:[%s15727_s1 + $0x4] sm:$0xf0]  ;;  %v6502_v19 = vor.u32 %v9647_v11, %v6501_v9 }
  0x14   :  { %5020 = vmatpush.bf16.msra.mxu0 %v6454_v56  ;;  %v9679_v15 = vld [vmem:[%s15727_s1 + $0x194] sm:$0xf0]  ;;  %v6566_v20 = vor.u32 %v9663_v13, %v6565_v12  ;;  %v6493_v21 = vld [vmem:[%s15727_s1 + $0x80] sm:$0xf]  ;;  %v9645_v22 = vld [vmem:[%s15727_s1 + $0x84] sm:$0xf0]  ;;  %v6430_v31 = vor.u32 %v9629_v18, %v6429_v17 }
  0x15   :  { %5033 = vmatpush.bf16.msra.mxu1 %v6518_v57  ;;  %v6557_v23 = vld [vmem:[%s15727_s1 + $0x100] sm:$0xf]  ;;  %v6630_v24 = vor.u32 %v9679_v15, %v6629_v14  ;;  %v9661_v25 = vld [vmem:[%s15727_s1 + $0x104] sm:$0xf0]  ;;  %v6741_v28 = vld [vmem:[%s15727_s1 + $0x270] sm:$0xf]  ;;  %v6494_v35 = vor.u32 %v9645_v22, %v6493_v21 }
  0x16   :  { %5046 = vmatpush.bf16.msra.mxu2 %v6582_v58  ;;  %v6621_v26 = vld [vmem:[%s15727_s1 + $0x180] sm:$0xf]  ;;  %v9677_v27 = vld [vmem:[%s15727_s1 + $0x184] sm:$0xf0]  ;;  %v9707_v29 = vld [vmem:[%s15727_s1 + $0x274] sm:$0xf0]  ;;  %v6558_v36 = vor.u32 %v9661_v25, %v6557_v23 }
  0x17   :  { %5059 = vmatpush.bf16.msra.mxu3 %v6646_v62  ;;  %v6805_v30 = vld [vmem:[%s15727_s1 + $0x2f0] sm:$0xf]  ;;  %v9723_v32 = vld [vmem:[%s15727_s1 + $0x2f4] sm:$0xf0]  ;;  %v6622_v39 = vor.u32 %v9677_v27, %v6621_v26  ;;  %v6742_v40 = vor.u32 %v9707_v29, %v6741_v28  ;;  %v6733_v43 = vld [vmem:[%s15727_s1 + $0x260] sm:$0xf] }
  0x18   :  { %5021 = vmatpush.bf16.msra.mxu0 %v6446_v4  ;;  %v6869_v33 = vld [vmem:[%s15727_s1 + $0x370] sm:$0xf]  ;;  %v9739_v34 = vld [vmem:[%s15727_s1 + $0x374] sm:$0xf0]  ;;  %v6806_v41 = vor.u32 %v9723_v32, %v6805_v30  ;;  %v9705_v44 = vld [vmem:[%s15727_s1 + $0x264] sm:$0xf0] }
  0x19   :  { %5034 = vmatpush.bf16.msra.mxu1 %v6510_v5  ;;  %v6933_v37 = vld [vmem:[%s15727_s1 + $0x3f0] sm:$0xf]  ;;  %v9755_v38 = vld [vmem:[%s15727_s1 + $0x3f4] sm:$0xf0]  ;;  %v6870_v42 = vor.u32 %v9739_v34, %v6869_v33  ;;  %v6797_v45 = vld [vmem:[%s15727_s1 + $0x2e0] sm:$0xf]  ;;  %v6734_v52 = vor.u32 %v9705_v44, %v6733_v43 }
  0x1a   :  { %5047 = vmatpush.bf16.msra.mxu2 %v6574_v6  ;;  %v6934_v46 = vor.u32 %v9755_v38, %v6933_v37  ;;  %v9721_v47 = vld [vmem:[%s15727_s1 + $0x2e4] sm:$0xf0]  ;;  %v6861_v48 = vld [vmem:[%s15727_s1 + $0x360] sm:$0xf]  ;;  %v6725_v55 = vld [vmem:[%s15727_s1 + $0x250] sm:$0xf] }
  0x1b   :  { %5060 = vmatpush.bf16.msra.mxu3 %v6638_v10  ;;  %v9737_v49 = vld [vmem:[%s15727_s1 + $0x364] sm:$0xf0]  ;;  %v6925_v50 = vld [vmem:[%s15727_s1 + $0x3e0] sm:$0xf]  ;;  %v6798_v53 = vor.u32 %v9721_v47, %v6797_v45  ;;  %v9703_v56 = vld [vmem:[%s15727_s1 + $0x254] sm:$0xf0] }
  0x1c   :  { %5022 = vmatpush.bf16.msra.mxu0 %v6438_v16  ;;  %v9753_v51 = vld [vmem:[%s15727_s1 + $0x3e4] sm:$0xf0]  ;;  %v6862_v54 = vor.u32 %v9737_v49, %v6861_v48  ;;  %v6789_v57 = vld [vmem:[%s15727_s1 + $0x2d0] sm:$0xf]  ;;  %v9719_v59 = vld [vmem:[%s15727_s1 + $0x2d4] sm:$0xf0]  ;;  %v6726_v0 = vor.u32 %v9703_v56, %v6725_v55 }
  0x1d   :  { %5035 = vmatpush.bf16.msra.mxu1 %v6502_v19  ;;  %v6926_v58 = vor.u32 %v9753_v51, %v6925_v50  ;;  %v6853_v60 = vld [vmem:[%s15727_s1 + $0x350] sm:$0xf]  ;;  %v9735_v61 = vld [vmem:[%s15727_s1 + $0x354] sm:$0xf0]  ;;  %v6717_v1 = vld [vmem:[%s15727_s1 + $0x240] sm:$0xf]  ;;  %v6790_v3 = vor.u32 %v9719_v59, %v6789_v57 }
  0x1e   :  { %5048 = vmatpush.bf16.msra.mxu2 %v6566_v20  ;;  %v6917_v62 = vld [vmem:[%s15727_s1 + $0x3d0] sm:$0xf]  ;;  %v9751_v63 = vld [vmem:[%s15727_s1 + $0x3d4] sm:$0xf0]  ;;  %v20_v2 = vld [vmem:[%s15728_s0] sm:$0xff]  ;;  %v6854_v4 = vor.u32 %v9735_v61, %v6853_v60 }
  0x1f   :  { %5061 = vmatpush.bf16.msra.mxu3 %v6630_v24  ;;  %v9701_v5 = vld [vmem:[%s15727_s1 + $0x244] sm:$0xf0]  ;;  %v6781_v6 = vld [vmem:[%s15727_s1 + $0x2c0] sm:$0xf]  ;;  %46 = vst [vmem:[#allocation1] ss:$4 sm:$0xff] %v20_v2  ;;  %v6918_v7 = vor.u32 %v9751_v63, %v6917_v62 }
  0x20   :  { %5023 = vmatpush.bf16.msra.mxu0 %v6430_v31  ;;  %v9717_v8 = vld [vmem:[%s15727_s1 + $0x2c4] sm:$0xf0]  ;;  %v6845_v9 = vld [vmem:[%s15727_s1 + $0x340] sm:$0xf]  ;;  %v6718_v13 = vor.u32 %v9701_v5, %v6717_v1  ;;  %v6709_v14 = vld [vmem:[%s15727_s1 + $0x230] sm:$0xf] }
  0x21   :  { %5036 = vmatpush.bf16.msra.mxu1 %v6494_v35  ;;  %v9733_v10 = vld [vmem:[%s15727_s1 + $0x344] sm:$0xf0]  ;;  %v6909_v11 = vld [vmem:[%s15727_s1 + $0x3c0] sm:$0xf]  ;;  %v9699_v15 = vld [vmem:[%s15727_s1 + $0x234] sm:$0xf0]  ;;  %v6782_v16 = vor.u32 %v9717_v8, %v6781_v6 }
  0x22   :  { %5049 = vmatpush.bf16.msra.mxu2 %v6558_v36  ;;  %v9749_v12 = vld [vmem:[%s15727_s1 + $0x3c4] sm:$0xf0]  ;;  %v6846_v17 = vor.u32 %v9733_v10, %v6845_v9  ;;  %v6773_v18 = vld [vmem:[%s15727_s1 + $0x2b0] sm:$0xf]  ;;  %v9715_v19 = vld [vmem:[%s15727_s1 + $0x2b4] sm:$0xf0]  ;;  %v6710_v28 = vor.u32 %v9699_v15, %v6709_v14 }
  0x23   :  { %5062 = vmatpush.bf16.msra.mxu3 %v6622_v39  ;;  %v6837_v20 = vld [vmem:[%s15727_s1 + $0x330] sm:$0xf]  ;;  %v6910_v21 = vor.u32 %v9749_v12, %v6909_v11  ;;  %v9731_v22 = vld [vmem:[%s15727_s1 + $0x334] sm:$0xf0]  ;;  %v6701_v25 = vld [vmem:[%s15727_s1 + $0x220] sm:$0xf]  ;;  %v6774_v29 = vor.u32 %v9715_v19, %v6773_v18 }
  0x24   :  { %5068 = vmatpush.bf16.msrb.mxu0 %v6742_v40  ;;  %v6901_v23 = vld [vmem:[%s15727_s1 + $0x3b0] sm:$0xf]  ;;  %v9747_v24 = vld [vmem:[%s15727_s1 + $0x3b4] sm:$0xf0]  ;;  %v9697_v26 = vld [vmem:[%s15727_s1 + $0x224] sm:$0xf0]  ;;  %v6838_v34 = vor.u32 %v9731_v22, %v6837_v20 }
  0x25   :  { %5081 = vmatpush.bf16.msrb.mxu1 %v6806_v41  ;;  %v22_v27 = vld [vmem:[%s15728_s0 + $0x10] sm:$0xff]  ;;  %v6765_v30 = vld [vmem:[%s15727_s1 + $0x2a0] sm:$0xf]  ;;  %v9713_v31 = vld [vmem:[%s15727_s1 + $0x2a4] sm:$0xf0]  ;;  %v6902_v39 = vor.u32 %v9747_v24, %v6901_v23 }
  0x26   :  { %5094 = vmatpush.bf16.msrb.mxu2 %v6870_v42  ;;  %v51_v32 = vld.sshfl [vmem:[#allocation1 + $0x10] sm:$0xff pattern:$0x73625140]  ;;  %v49_v33 = vld.sshfl [vmem:[#allocation1] sm:$0xff pattern:$0x73625140]  ;;  %v6766_v48 = vor.u32 %v9713_v31, %v6765_v30 }
  0x27   :  { %5107 = vmatpush.bf16.msrb.mxu3 %v6934_v46  ;;  %v10794_v35 = vpack.c.bf16 %v51_v32, %v51_v32  ;;  %v10796_v36 = vpack.c.bf16 %v49_v33, %v49_v33  ;;  %v52_v37 = vld.sshfl [vmem:[#allocation1 + $0x18] sm:$0xff pattern:$0x73625140]  ;;  %v50_v38 = vld.sshfl [vmem:[#allocation1 + $0x8] sm:$0xff pattern:$0x73625140]  ;;  %v6702_v46 = vor.u32 %v9697_v26, %v6701_v25 }
  0x28   :  { %5069 = vmatpush.bf16.msrb.mxu0 %v6734_v52  ;;  %v6829_v40 = vld [vmem:[%s15727_s1 + $0x320] sm:$0xf]  ;;  %v9729_v41 = vld [vmem:[%s15727_s1 + $0x324] sm:$0xf0]  ;;  %v10804_v42 = vpack.c.bf16 %v52_v37, %v52_v37  ;;  %57 = vst [vmem:[#allocation1] ss:$4 sm:$0xff] %v22_v27  ;;  %v10806_v43 = vpack.c.bf16 %v50_v38, %v50_v38 }
  0x29   :  { %5082 = vmatpush.bf16.msrb.mxu1 %v6798_v53  ;;  %v6893_v44 = vld [vmem:[%s15727_s1 + $0x3a0] sm:$0xf]  ;;  %v9745_v45 = vld [vmem:[%s15727_s1 + $0x3a4] sm:$0xf0]  ;;  %5050 = vmatmul.bf16.vlgmr.msra.gmra.mxu2 %v10794_v35  ;;  %v6693_v47 = vld [vmem:[%s15727_s1 + $0x210] sm:$0xf]  ;;  %v6830_v49 = vor.u32 %v9729_v41, %v6829_v40 }
  0x2a   :  { %5095 = vmatpush.bf16.msrb.mxu2 %v6862_v54  ;;  %5024 = vmatmul.bf16.vlgmr.msra.gmra.mxu0 %v10796_v36  ;;  %v9695_v50 = vld [vmem:[%s15727_s1 + $0x214] sm:$0xf0]  ;;  %v6757_v51 = vld [vmem:[%s15727_s1 + $0x290] sm:$0xf]  ;;  %v6894_v53 = vor.u32 %v9745_v45, %v6893_v44  ;;  %v21_v59 = vld [vmem:[%s15728_s0 + $0x8] sm:$0xff] }
  0x2b   :  { %5108 = vmatpush.bf16.msrb.mxu3 %v6926_v58  ;;  %v9711_v52 = vld [vmem:[%s15727_s1 + $0x294] sm:$0xf0]  ;;  %v6821_v54 = vld [vmem:[%s15727_s1 + $0x310] sm:$0xf]  ;;  %5037 = vmatmul.bf16.vlgmr.msra.gmra.mxu1 %v10806_v43  ;;  %v6685_v58 = vld [vmem:[%s15727_s1 + $0x200] sm:$0xf]  ;;  %v6694_v60 = vor.u32 %v9695_v50, %v6693_v47 }
  0x2c   :  { %5070 = vmatpush.bf16.msrb.mxu0 %v6726_v0  ;;  %5063 = vmatmul.bf16.vlgmr.msra.gmra.mxu3 %v10804_v42  ;;  %v9727_v55 = vld [vmem:[%s15727_s1 + $0x314] sm:$0xf0]  ;;  %v6885_v56 = vld [vmem:[%s15727_s1 + $0x390] sm:$0xf]  ;;  %v9693_v61 = vld [vmem:[%s15727_s1 + $0x204] sm:$0xf0]  ;;  %v6758_v63 = vor.u32 %v9711_v52, %v6757_v51 }
  0x2d   :  { %5083 = vmatpush.bf16.msrb.mxu1 %v6790_v3  ;;  %v9743_v57 = vld [vmem:[%s15727_s1 + $0x394] sm:$0xf0]  ;;  %v6749_v62 = vld [vmem:[%s15727_s1 + $0x280] sm:$0xf]  ;;  %48 = vst [vmem:[#allocation1 + $0x20] ss:$4 sm:$0xff] %v21_v59  ;;  %v6822_v0 = vor.u32 %v9727_v55, %v6821_v54  ;;  %v6686_v11 = vor.u32 %v9693_v61, %v6685_v58 }
  0x2e   :  { %5096 = vmatpush.bf16.msrb.mxu2 %v6854_v4  ;;  %v9709_v1 = vld [vmem:[%s15727_s1 + $0x284] sm:$0xf0]  ;;  %v6813_v2 = vld [vmem:[%s15727_s1 + $0x300] sm:$0xf]  ;;  %v6886_v4 = vor.u32 %v9743_v57, %v6885_v56  ;;  %v9771_v8 = vld [vmem:[%s15727_s1 + $0x474] sm:$0xf0] }
  0x2f   :  { %5109 = vmatpush.bf16.msrb.mxu3 %v6918_v7  ;;  %v9725_v3 = vld [vmem:[%s15727_s1 + $0x304] sm:$0xf0]  ;;  %v6877_v5 = vld [vmem:[%s15727_s1 + $0x380] sm:$0xf]  ;;  %v6997_v7 = vld [vmem:[%s15727_s1 + $0x470] sm:$0xf]  ;;  %v6750_v15 = vor.u32 %v9709_v1, %v6749_v62 }
  0x30   :  { %5071 = vmatpush.bf16.msrb.mxu0 %v6718_v13  ;;  %v9741_v6 = vld [vmem:[%s15727_s1 + $0x384] sm:$0xf0]  ;;  %v7061_v9 = vld [vmem:[%s15727_s1 + $0x4f0] sm:$0xf]  ;;  %v9787_v10 = vld [vmem:[%s15727_s1 + $0x4f4] sm:$0xf0] }
  0x31   :  { %5084 = vmatpush.bf16.msrb.mxu1 %v6782_v16  ;;  %v7125_v12 = vld [vmem:[%s15727_s1 + $0x570] sm:$0xf]  ;;  %v9803_v13 = vld [vmem:[%s15727_s1 + $0x574] sm:$0xf0]  ;;  %v6814_v16 = vor.u32 %v9725_v3, %v6813_v2  ;;  %v6989_v18 = vld [vmem:[%s15727_s1 + $0x460] sm:$0xf]  ;;  %v6878_v20 = vor.u32 %v9741_v6, %v6877_v5  ;;  %v7062_v27 = vor.u32 %v9787_v10, %v7061_v9 }
  0x32   :  { %5097 = vmatpush.bf16.msrb.mxu2 %v6846_v17  ;;  %v7189_v14 = vld [vmem:[%s15727_s1 + $0x5f0] sm:$0xf]  ;;  %v9819_v17 = vld [vmem:[%s15727_s1 + $0x5f4] sm:$0xf0]  ;;  %v9769_v19 = vld [vmem:[%s15727_s1 + $0x464] sm:$0xf0] }
  0x33   :  { %5110 = vmatpush.bf16.msrb.mxu3 %v6910_v21  ;;  %v6998_v21 = vor.u32 %v9771_v8, %v6997_v7  ;;  %v7053_v22 = vld [vmem:[%s15727_s1 + $0x4e0] sm:$0xf]  ;;  %v9785_v23 = vld [vmem:[%s15727_s1 + $0x4e4] sm:$0xf0]  ;;  %v23_v26 = vld [vmem:[%s15728_s0 + $0x18] sm:$0xff]  ;;  %v7190_v31 = vor.u32 %v9819_v17, %v7189_v14  ;;  %v6990_v41 = vor.u32 %v9769_v19, %v6989_v18 }
  0x34   :  { %5072 = vmatpush.bf16.msrb.mxu0 %v6710_v28  ;;  %v7117_v24 = vld [vmem:[%s15727_s1 + $0x560] sm:$0xf]  ;;  %v9801_v25 = vld [vmem:[%s15727_s1 + $0x564] sm:$0xf0]  ;;  %v7126_v28 = vor.u32 %v9803_v13, %v7125_v12  ;;  %v7054_v45 = vor.u32 %v9785_v23, %v7053_v22  ;;  %v6981_v47 = vld [vmem:[%s15727_s1 + $0x450] sm:$0xf] }
  0x35   :  { %5085 = vmatpush.bf16.msrb.mxu1 %v6774_v29  ;;  %v55_v29 = vld.sshfl [vmem:[#allocation1 + $0x30] sm:$0xff pattern:$0x73625140]  ;;  %v53_v30 = vld.sshfl [vmem:[#allocation1 + $0x20] sm:$0xff pattern:$0x73625140] }
  0x36   :  { %5098 = vmatpush.bf16.msrb.mxu2 %v6838_v34  ;;  %v10914_v32 = vpack.c.bf16 %v55_v29, %v55_v29  ;;  %v56_v33 = vld.sshfl [vmem:[#allocation1 + $0x38] sm:$0xff pattern:$0x73625140]  ;;  %v54_v34 = vld.sshfl [vmem:[#allocation1 + $0x28] sm:$0xff pattern:$0x73625140] }
  0x37   :  { %5111 = vmatpush.bf16.msrb.mxu3 %v6902_v39  ;;  %v7181_v37 = vld [vmem:[%s15727_s1 + $0x5e0] sm:$0xf]  ;;  %v9817_v38 = vld [vmem:[%s15727_s1 + $0x5e4] sm:$0xf0]  ;;  %v10922_v39 = vpack.c.bf16 %v53_v30, %v53_v30  ;;  %v10924_v40 = vpack.c.bf16 %v56_v33, %v56_v33  ;;  %58 = vst [vmem:[#allocation1 + $0x20] ss:$4 sm:$0xff] %v23_v26  ;;  %v10926_v44 = vpack.c.bf16 %v54_v34, %v54_v34 }
  0x38   :  { %5073 = vmatpush.bf16.msrb.mxu0 %v6702_v46  ;;  %v7118_v46 = vor.u32 %v9801_v25, %v7117_v24  ;;  %v7182_v50 = vor.u32 %v9817_v38, %v7181_v37  ;;  %v9783_v51 = vld [vmem:[%s15727_s1 + $0x4d4] sm:$0xf0]  ;;  %v7109_v52 = vld [vmem:[%s15727_s1 + $0x550] sm:$0xf]  ;;  %v6973_v59 = vld [vmem:[%s15727_s1 + $0x440] sm:$0xf] }
  0x39   :  { %5086 = vmatpush.bf16.msrb.mxu1 %v6766_v48  ;;  %v9767_v48 = vld [vmem:[%s15727_s1 + $0x454] sm:$0xf0]  ;;  %v7173_v54 = vld [vmem:[%s15727_s1 + $0x5d0] sm:$0xf]  ;;  %v7037_v61 = vld [vmem:[%s15727_s1 + $0x4c0] sm:$0xf] }
  0x3a   :  { %5099 = vmatpush.bf16.msrb.mxu2 %v6830_v49  ;;  %v7045_v49 = vld [vmem:[%s15727_s1 + $0x4d0] sm:$0xf]  ;;  %v9815_v55 = vld [vmem:[%s15727_s1 + $0x5d4] sm:$0xf0]  ;;  %v6982_v56 = vor.u32 %v9767_v48, %v6981_v47  ;;  %v9797_v1 = vld [vmem:[%s15727_s1 + $0x544] sm:$0xf0] }
  0x3b   :  { %5112 = vmatpush.bf16.msrb.mxu3 %v6894_v53  ;;  %v9799_v53 = vld [vmem:[%s15727_s1 + $0x554] sm:$0xf0]  ;;  %v7046_v57 = vor.u32 %v9783_v51, %v7045_v49  ;;  %v7174_v62 = vor.u32 %v9815_v55, %v7173_v54  ;;  %v7165_v2 = vld [vmem:[%s15727_s1 + $0x5c0] sm:$0xf]  ;;  %v9813_v3 = vld [vmem:[%s15727_s1 + $0x5c4] sm:$0xf0] }
  0x3c   :  { %5074 = vmatpush.bf16.msrb.mxu0 %v6694_v60  ;;  %v7110_v58 = vor.u32 %v9799_v53, %v7109_v52  ;;  %v9765_v60 = vld [vmem:[%s15727_s1 + $0x444] sm:$0xf0]  ;;  %v6965_v5 = vld [vmem:[%s15727_s1 + $0x430] sm:$0xf]  ;;  %v9763_v6 = vld [vmem:[%s15727_s1 + $0x434] sm:$0xf0]  ;;  %v7166_v12 = vor.u32 %v9813_v3, %v7165_v2 }
  0x3d   :  { %5087 = vmatpush.bf16.msrb.mxu1 %v6758_v63  ;;  %v9781_v63 = vld [vmem:[%s15727_s1 + $0x4c4] sm:$0xf0]  ;;  %v7029_v9 = vld [vmem:[%s15727_s1 + $0x4b0] sm:$0xf]  ;;  %v9779_v10 = vld [vmem:[%s15727_s1 + $0x4b4] sm:$0xf0]  ;;  %v6966_v19 = vor.u32 %v9763_v6, %v6965_v5 }
  0x3e   :  { %5100 = vmatpush.bf16.msrb.mxu2 %v6822_v0  ;;  %v7101_v0 = vld [vmem:[%s15727_s1 + $0x540] sm:$0xf]  ;;  %v7038_v7 = vor.u32 %v9781_v63, %v7037_v61  ;;  %v9795_v13 = vld [vmem:[%s15727_s1 + $0x534] sm:$0xf0]  ;;  %v7157_v14 = vld [vmem:[%s15727_s1 + $0x5b0] sm:$0xf]  ;;  %v7030_v24 = vor.u32 %v9779_v10, %v7029_v9 }
  0x3f   :  { %5113 = vmatpush.bf16.msrb.mxu3 %v6886_v4  ;;  %v6974_v4 = vor.u32 %v9765_v60, %v6973_v59  ;;  %v7102_v8 = vor.u32 %v9797_v1, %v7101_v0  ;;  %v9761_v17 = vld [vmem:[%s15727_s1 + $0x424] sm:$0xf0]  ;;  %v11010_v18 = vld.sshfl [vmem:[#allocation1] sm:$0xff pattern:$0x73625140] }
  0x40   :  { %5075 = vmatpush.bf16.msrb.mxu0 %v6686_v11  ;;  %v7093_v11 = vld [vmem:[%s15727_s1 + $0x530] sm:$0xf]  ;;  %v24_v23 = vld [vmem:[%s15728_s0 + $0x20] sm:$0xff]  ;;  %v11023_v26 = vld.sshfl [vmem:[#allocation1 + $0x8] sm:$0xff pattern:$0x73625140] }
  0x41   :  { %5088 = vmatpush.bf16.msrb.mxu1 %v6750_v15  ;;  %v9811_v15 = vld [vmem:[%s15727_s1 + $0x5b4] sm:$0xf0]  ;;  %v11018_v22 = vld.sshfl [vmem:[#allocation1 + $0x10] sm:$0xff pattern:$0x73625140]  ;;  %v7094_v25 = vor.u32 %v9795_v13, %v7093_v11 }
  0x42   :  { %5101 = vmatpush.bf16.msrb.mxu2 %v6814_v16  ;;  %v6957_v16 = vld [vmem:[%s15727_s1 + $0x420] sm:$0xf]  ;;  %v9793_v30 = vld [vmem:[%s15727_s1 + $0x524] sm:$0xf0]  ;;  %v9775_v48 = vld [vmem:[%s15727_s1 + $0x494] sm:$0xf0] }
  0x43   :  { %5114 = vmatpush.bf16.msrb.mxu3 %v6878_v20  ;;  %5076 = vmatmul.bf16.vlgmr.msrb.gmra.mxu0 %v10922_v39  ;;  %v7021_v20 = vld [vmem:[%s15727_s1 + $0x4a0] sm:$0xf]  ;;  %v9809_v33 = vld [vmem:[%s15727_s1 + $0x5a4] sm:$0xf0]  ;;  %v6958_v34 = vor.u32 %v9761_v17, %v6957_v16  ;;  %v7077_v49 = vld [vmem:[%s15727_s1 + $0x510] sm:$0xf] }
  0x44   :  { %5120 = vmatpush.bf16.msra.mxu0 %v6998_v21  ;;  %5089 = vmatmul.bf16.vlgmr.msrb.gmra.mxu1 %v10926_v44  ;;  %v9777_v21 = vld [vmem:[%s15727_s1 + $0x4a4] sm:$0xf0]  ;;  %v7085_v29 = vld [vmem:[%s15727_s1 + $0x520] sm:$0xf]  ;;  %v7141_v51 = vld [vmem:[%s15727_s1 + $0x590] sm:$0xf] }
  0x45   :  { %5133 = vmatpush.bf16.msra.mxu1 %v7062_v27  ;;  %5102 = vmatmul.bf16.vlgmr.msrb.gmra.mxu2 %v10914_v32  ;;  %v11025_v27 = vld.sshfl [vmem:[#allocation1 + $0x18] sm:$0xff pattern:$0x73625140]  ;;  %v7022_v37 = vor.u32 %v9777_v21, %v7021_v20  ;;  %v7086_v38 = vor.u32 %v9793_v30, %v7085_v29  ;;  %v6941_v54 = vld [vmem:[%s15727_s1 + $0x400] sm:$0xf]  ;;  %v11122_v21 = vpack.c.bf16 %v11010_v18, %v11010_v18 }
  0x46   :  { %5146 = vmatpush.bf16.msra.mxu2 %v7126_v28  ;;  %5115 = vmatmul.bf16.vlgmr.msrb.gmra.mxu3 %v10924_v40  ;;  %v7158_v28 = vor.u32 %v9811_v15, %v7157_v14  ;;  %67 = vst [vmem:[#allocation1] ss:$4 sm:$0xff] %v24_v23  ;;  %v9807_v52 = vld [vmem:[%s15727_s1 + $0x594] sm:$0xf0]  ;;  %v9757_v55 = vld [vmem:[%s15727_s1 + $0x404] sm:$0xf0]  ;;  %v11139_v18 = vpack.c.bf16 %v11023_v26, %v11023_v26 }
  0x47   :  { %5159 = vmatpush.bf16.msra.mxu3 %v7190_v31  ;;  %v7149_v31 = vld [vmem:[%s15727_s1 + $0x5a0] sm:$0xf]  ;;  %v9773_v59 = vld [vmem:[%s15727_s1 + $0x484] sm:$0xf0]  ;;  %v7142_v61 = vor.u32 %v9807_v52, %v7141_v51  ;;  %v7253_v1 = vld [vmem:[%s15727_s1 + $0x670] sm:$0xf] }
  0x48   :  { %5121 = vmatpush.bf16.msra.mxu0 %v6990_v41  ;;  %v6949_v41 = vld [vmem:[%s15727_s1 + $0x410] sm:$0xf]  ;;  %v7150_v47 = vor.u32 %v9809_v33, %v7149_v31  ;;  %v7069_v60 = vld [vmem:[%s15727_s1 + $0x500] sm:$0xf]  ;;  %v9805_v0 = vld [vmem:[%s15727_s1 + $0x584] sm:$0xf0]  ;;  %v11149_v31 = vpack.c.bf16 %v11025_v27, %v11025_v27 }
  0x49   :  { %5134 = vmatpush.bf16.msra.mxu1 %v7054_v45  ;;  %v9759_v45 = vld [vmem:[%s15727_s1 + $0x414] sm:$0xf0]  ;;  %v7133_v63 = vld [vmem:[%s15727_s1 + $0x580] sm:$0xf]  ;;  %v7317_v3 = vld [vmem:[%s15727_s1 + $0x6f0] sm:$0xf] }
  0x4a   :  { %5147 = vmatpush.bf16.msra.mxu2 %v7118_v46  ;;  %v7013_v46 = vld [vmem:[%s15727_s1 + $0x490] sm:$0xf]  ;;  %v6950_v53 = vor.u32 %v9759_v45, %v6949_v41  ;;  %v9835_v2 = vld [vmem:[%s15727_s1 + $0x674] sm:$0xf0]  ;;  %v7245_v16 = vld [vmem:[%s15727_s1 + $0x660] sm:$0xf] }
  0x4b   :  { %5160 = vmatpush.bf16.msra.mxu3 %v7182_v50  ;;  %v9791_v50 = vld [vmem:[%s15727_s1 + $0x514] sm:$0xf0]  ;;  %v7381_v6 = vld [vmem:[%s15727_s1 + $0x770] sm:$0xf]  ;;  %v7254_v13 = vor.u32 %v9835_v2, %v7253_v1  ;;  %v9833_v17 = vld [vmem:[%s15727_s1 + $0x664] sm:$0xf0] }
  0x4c   :  { %5122 = vmatpush.bf16.msra.mxu0 %v6982_v56  ;;  %v7014_v56 = vor.u32 %v9775_v48, %v7013_v46  ;;  %v9851_v5 = vld [vmem:[%s15727_s1 + $0x6f4] sm:$0xf0]  ;;  %v7445_v10 = vld [vmem:[%s15727_s1 + $0x7f0] sm:$0xf]  ;;  %v9849_v23 = vld [vmem:[%s15727_s1 + $0x6e4] sm:$0xf0] }
  0x4d   :  { %5135 = vmatpush.bf16.msra.mxu1 %v7046_v57  ;;  %v7078_v57 = vor.u32 %v9791_v50, %v7077_v49  ;;  %v9883_v11 = vld [vmem:[%s15727_s1 + $0x7f4] sm:$0xf0]  ;;  %v7318_v14 = vor.u32 %v9851_v5, %v7317_v3  ;;  %v7437_v29 = vld [vmem:[%s15727_s1 + $0x7e0] sm:$0xf]  ;;  %v9881_v30 = vld [vmem:[%s15727_s1 + $0x7e4] sm:$0xf0] }
  0x4e   :  { %5148 = vmatpush.bf16.msra.mxu2 %v7110_v58  ;;  %v7005_v58 = vld [vmem:[%s15727_s1 + $0x480] sm:$0xf]  ;;  %v7446_v20 = vor.u32 %v9883_v11, %v7445_v10  ;;  %v7237_v26 = vld [vmem:[%s15727_s1 + $0x650] sm:$0xf]  ;;  %v9847_v27 = vld [vmem:[%s15727_s1 + $0x6d4] sm:$0xf0]  ;;  %v7438_v41 = vor.u32 %v9881_v30, %v7437_v29 }
  0x4f   :  { %5161 = vmatpush.bf16.msra.mxu3 %v7174_v62  ;;  %v9789_v62 = vld [vmem:[%s15727_s1 + $0x504] sm:$0xf0]  ;;  %v7365_v45 = vld [vmem:[%s15727_s1 + $0x750] sm:$0xf]  ;;  %v9863_v46 = vld [vmem:[%s15727_s1 + $0x754] sm:$0xf0] }
  0x50   :  { %5123 = vmatpush.bf16.msra.mxu0 %v6974_v4  ;;  %v6942_v4 = vor.u32 %v9757_v55, %v6941_v54  ;;  %v7070_v9 = vor.u32 %v9789_v62, %v7069_v60  ;;  %v9879_v48 = vld [vmem:[%s15727_s1 + $0x7d4] sm:$0xf0]  ;;  %v7229_v49 = vld [vmem:[%s15727_s1 + $0x640] sm:$0xf]  ;;  %v9829_v50 = vld [vmem:[%s15727_s1 + $0x644] sm:$0xf0] }
  0x51   :  { %5136 = vmatpush.bf16.msra.mxu1 %v7038_v7  ;;  %v9867_v7 = vld [vmem:[%s15727_s1 + $0x774] sm:$0xf0]  ;;  %v7293_v52 = vld [vmem:[%s15727_s1 + $0x6c0] sm:$0xf]  ;;  %v9861_v55 = vld [vmem:[%s15727_s1 + $0x744] sm:$0xf0]  ;;  %v7230_v2 = vor.u32 %v9829_v50, %v7229_v49 }
  0x52   :  { %5149 = vmatpush.bf16.msra.mxu2 %v7102_v8  ;;  %v7006_v8 = vor.u32 %v9773_v59, %v7005_v58  ;;  %v7382_v15 = vor.u32 %v9867_v7, %v7381_v6  ;;  %v7357_v54 = vld [vmem:[%s15727_s1 + $0x740] sm:$0xf]  ;;  %v11205_v62 = vld.sshfl [vmem:[#allocation1 + $0x30] sm:$0xff pattern:$0x73625140] }
  0x53   :  { %5162 = vmatpush.bf16.msra.mxu3 %v7166_v12  ;;  %v7134_v12 = vor.u32 %v9805_v0, %v7133_v63  ;;  %v7421_v58 = vld [vmem:[%s15727_s1 + $0x7c0] sm:$0xf]  ;;  %v25_v63 = vld [vmem:[%s15728_s0 + $0x28] sm:$0xff]  ;;  %v11212_v1 = vld.sshfl [vmem:[#allocation1 + $0x38] sm:$0xff pattern:$0x73625140] }
  0x54   :  { %5124 = vmatpush.bf16.msra.mxu0 %v6966_v19  ;;  %v7309_v19 = vld [vmem:[%s15727_s1 + $0x6e0] sm:$0xf]  ;;  %v11210_v0 = vld.sshfl [vmem:[#allocation1 + $0x28] sm:$0xff pattern:$0x73625140] }
  0x55   :  { %5137 = vmatpush.bf16.msra.mxu1 %v7030_v24  ;;  %v7373_v24 = vld [vmem:[%s15727_s1 + $0x760] sm:$0xf]  ;;  %v7310_v33 = vor.u32 %v9849_v23, %v7309_v19  ;;  %v7221_v5 = vld [vmem:[%s15727_s1 + $0x630] sm:$0xf]  ;;  %v9827_v6 = vld [vmem:[%s15727_s1 + $0x634] sm:$0xf0] }
  0x56   :  { %5150 = vmatpush.bf16.msra.mxu2 %v7094_v25  ;;  %v9865_v25 = vld [vmem:[%s15727_s1 + $0x764] sm:$0xf0]  ;;  %v11200_v59 = vld.sshfl [vmem:[#allocation1 + $0x20] sm:$0xff pattern:$0x73625140] }
  0x57   :  { %5163 = vmatpush.bf16.msra.mxu3 %v7158_v28  ;;  %v11135_v28 = vpack.c.bf16 %v11018_v22, %v11018_v22  ;;  %v7246_v22 = vor.u32 %v9833_v17, %v7245_v16  ;;  %68 = vst [vmem:[#allocation1 + $0x20] ss:$4 sm:$0xff] %v25_v63  ;;  %v7285_v7 = vld [vmem:[%s15727_s1 + $0x6b0] sm:$0xf]  ;;  %v9859_v11 = vld [vmem:[%s15727_s1 + $0x734] sm:$0xf0] }
  0x58   :  { %5125 = vmatpush.bf16.msra.mxu0 %v6958_v34  ;;  %v7374_v34 = vor.u32 %v9865_v25, %v7373_v24  ;;  %v7349_v10 = vld [vmem:[%s15727_s1 + $0x730] sm:$0xf]  ;;  %v7213_v17 = vld [vmem:[%s15727_s1 + $0x620] sm:$0xf]  ;;  %v9825_v19 = vld [vmem:[%s15727_s1 + $0x624] sm:$0xf0] }
  0x59   :  { %5138 = vmatpush.bf16.msra.mxu1 %v7022_v37  ;;  %v9831_v37 = vld [vmem:[%s15727_s1 + $0x654] sm:$0xf0]  ;;  %v7350_v16 = vor.u32 %v9859_v11, %v7349_v10  ;;  %v9841_v24 = vld [vmem:[%s15727_s1 + $0x6a4] sm:$0xf0]  ;;  %v7341_v25 = vld [vmem:[%s15727_s1 + $0x720] sm:$0xf] }
  0x5a   :  { %5151 = vmatpush.bf16.msra.mxu2 %v7086_v38  ;;  %v7301_v38 = vld [vmem:[%s15727_s1 + $0x6d0] sm:$0xf]  ;;  %v7238_v51 = vor.u32 %v9831_v37, %v7237_v26  ;;  %v9857_v29 = vld [vmem:[%s15727_s1 + $0x724] sm:$0xf0]  ;;  %v7405_v30 = vld [vmem:[%s15727_s1 + $0x7a0] sm:$0xf]  ;;  %v7214_v26 = vor.u32 %v9825_v19, %v7213_v17 }
  0x5b   :  { %5164 = vmatpush.bf16.msra.mxu3 %v7150_v47  ;;  %v7429_v47 = vld [vmem:[%s15727_s1 + $0x7d0] sm:$0xf]  ;;  %v9871_v49 = vld [vmem:[%s15727_s1 + $0x794] sm:$0xf0]  ;;  %v9869_v63 = vld [vmem:[%s15727_s1 + $0x784] sm:$0xf0] }
  0x5c   :  { %5126 = vmatpush.bf16.msra.mxu0 %v6950_v53  ;;  %v9845_v53 = vld [vmem:[%s15727_s1 + $0x6c4] sm:$0xf0]  ;;  %v7430_v60 = vor.u32 %v9879_v48, %v7429_v47  ;;  %v7205_v37 = vld [vmem:[%s15727_s1 + $0x610] sm:$0xf]  ;;  %v9855_v47 = vld [vmem:[%s15727_s1 + $0x714] sm:$0xf0] }
  0x5d   :  { %5139 = vmatpush.bf16.msra.mxu1 %v7014_v56  ;;  %v7302_v56 = vor.u32 %v9847_v27, %v7301_v38  ;;  %v7294_v3 = vor.u32 %v9845_v53, %v7293_v52  ;;  %v9823_v38 = vld [vmem:[%s15727_s1 + $0x614] sm:$0xf0]  ;;  %v7269_v27 = vld [vmem:[%s15727_s1 + $0x690] sm:$0xf]  ;;  %v9821_v52 = vld [vmem:[%s15727_s1 + $0x604] sm:$0xf0] }
  0x5e   :  { %5152 = vmatpush.bf16.msra.mxu2 %v7078_v57  ;;  %v7366_v57 = vor.u32 %v9863_v46, %v7365_v45  ;;  %v9839_v45 = vld [vmem:[%s15727_s1 + $0x694] sm:$0xf0]  ;;  %v7333_v46 = vld [vmem:[%s15727_s1 + $0x710] sm:$0xf]  ;;  %v7206_v50 = vor.u32 %v9823_v38, %v7205_v37  ;;  %v7501_v17 = vld [vmem:[%s15727_s1 + $0x860] sm:$0xf] }
  0x5f   :  { %5165 = vmatpush.bf16.msra.mxu3 %v7142_v61  ;;  %v9877_v61 = vld [vmem:[%s15727_s1 + $0x7c4] sm:$0xf0]  ;;  %v7397_v48 = vld [vmem:[%s15727_s1 + $0x790] sm:$0xf]  ;;  %v7270_v53 = vor.u32 %v9839_v45, %v7269_v27  ;;  %v9895_v27 = vld [vmem:[%s15727_s1 + $0x854] sm:$0xf0] }
  0x60   :  { %5127 = vmatpush.bf16.msra.mxu0 %v6942_v4  ;;  %v7358_v4 = vor.u32 %v9861_v55, %v7357_v54  ;;  %v7334_v54 = vor.u32 %v9855_v47, %v7333_v46  ;;  %v7261_v55 = vld [vmem:[%s15727_s1 + $0x680] sm:$0xf]  ;;  %v7701_v11 = vld [vmem:[%s15727_s1 + $0x9f0] sm:$0xf]  ;;  %v9897_v19 = vld [vmem:[%s15727_s1 + $0x864] sm:$0xf0] }
  0x61   :  { %5140 = vmatpush.bf16.msra.mxu1 %v7006_v8  ;;  %v7422_v8 = vor.u32 %v9877_v61, %v7421_v58  ;;  %v7398_v58 = vor.u32 %v9871_v49, %v7397_v48  ;;  %v7389_v61 = vld [vmem:[%s15727_s1 + $0x780] sm:$0xf]  ;;  %v7493_v38 = vld [vmem:[%s15727_s1 + $0x850] sm:$0xf]  ;;  %v9911_v45 = vld [vmem:[%s15727_s1 + $0x8d4] sm:$0xf0] }
  0x62   :  { %5153 = vmatpush.bf16.msra.mxu2 %v7070_v9  ;;  %v9843_v9 = vld [vmem:[%s15727_s1 + $0x6b4] sm:$0xf0]  ;;  %v7621_v46 = vld [vmem:[%s15727_s1 + $0x950] sm:$0xf] }
  0x63   :  { %5166 = vmatpush.bf16.msra.mxu3 %v7134_v12  ;;  %5128 = vmatmul.bf16.vlgmr.msra.gmra.mxu0 %v11122_v21  ;;  %v7413_v12 = vld [vmem:[%s15727_s1 + $0x7b0] sm:$0xf]  ;;  %v9927_v47 = vld [vmem:[%s15727_s1 + $0x954] sm:$0xf0] }
  0x64   :  { %5172 = vmatpush.bf16.msrb.mxu0 %v7254_v13  ;;  %5141 = vmatmul.bf16.vlgmr.msra.gmra.mxu1 %v11139_v18  ;;  %v9875_v13 = vld [vmem:[%s15727_s1 + $0x7b4] sm:$0xf0]  ;;  %v7685_v48 = vld [vmem:[%s15727_s1 + $0x9d0] sm:$0xf] }
  0x65   :  { %5185 = vmatpush.bf16.msrb.mxu1 %v7318_v14  ;;  %5154 = vmatmul.bf16.vlgmr.msra.gmra.mxu2 %v11135_v28  ;;  %v7222_v14 = vor.u32 %v9827_v6, %v7221_v5  ;;  %v7414_v23 = vor.u32 %v9875_v13, %v7413_v12  ;;  %v9915_v6 = vld [vmem:[%s15727_s1 + $0x8f4] sm:$0xf0]  ;;  %v7390_v13 = vor.u32 %v9869_v63, %v7389_v61  ;;  %v7677_v61 = vld [vmem:[%s15727_s1 + $0x9c0] sm:$0xf]  ;;  %v9941_v63 = vld [vmem:[%s15727_s1 + $0x9c4] sm:$0xf0] }
  0x66   :  { %5198 = vmatpush.bf16.msrb.mxu2 %v7382_v15  ;;  %5167 = vmatmul.bf16.vlgmr.msra.gmra.mxu3 %v11149_v31  ;;  %v7286_v15 = vor.u32 %v9843_v9, %v7285_v7  ;;  %v7637_v7 = vld [vmem:[%s15727_s1 + $0x970] sm:$0xf]  ;;  %v9947_v12 = vld [vmem:[%s15727_s1 + $0x9f4] sm:$0xf0] }
  0x67   :  { %5211 = vmatpush.bf16.msrb.mxu3 %v7446_v20  ;;  %v7277_v20 = vld [vmem:[%s15727_s1 + $0x6a0] sm:$0xf]  ;;  %v9943_v49 = vld [vmem:[%s15727_s1 + $0x9d4] sm:$0xf0] }
  0x68   :  { %5173 = vmatpush.bf16.msrb.mxu0 %v7246_v22  ;;  %v9873_v22 = vld [vmem:[%s15727_s1 + $0x7a4] sm:$0xf0] }
  0x69   :  { %5186 = vmatpush.bf16.msrb.mxu1 %v7310_v33  ;;  %v7278_v33 = vor.u32 %v9841_v24, %v7277_v20  ;;  %v7565_v20 = vld [vmem:[%s15727_s1 + $0x8e0] sm:$0xf]  ;;  %v11345_v24 = vpack.c.bf16 %v11200_v59, %v11200_v59  ;;  %v11362_v59 = vpack.c.bf16 %v11210_v0, %v11210_v0 }
  0x6a   :  { %5199 = vmatpush.bf16.msrb.mxu2 %v7374_v34  ;;  %v7342_v34 = vor.u32 %v9857_v29, %v7341_v25  ;;  %v9913_v25 = vld [vmem:[%s15727_s1 + $0x8e4] sm:$0xf0]  ;;  %v7629_v29 = vld [vmem:[%s15727_s1 + $0x960] sm:$0xf] }
  0x6b   :  { %5212 = vmatpush.bf16.msrb.mxu3 %v7438_v41  ;;  %v7406_v41 = vor.u32 %v9873_v22, %v7405_v30  ;;  %v9929_v30 = vld [vmem:[%s15727_s1 + $0x964] sm:$0xf0]  ;;  %v11358_v22 = vpack.c.bf16 %v11205_v62, %v11205_v62  ;;  %v7502_v62 = vor.u32 %v9897_v19, %v7501_v17  ;;  %v7566_v37 = vor.u32 %v9913_v25, %v7565_v20  ;;  %v7469_v17 = vld [vmem:[%s15727_s1 + $0x820] sm:$0xf] }
  0x6c   :  { %5174 = vmatpush.bf16.msrb.mxu0 %v7238_v51  ;;  %v7197_v51 = vld [vmem:[%s15727_s1 + $0x600] sm:$0xf]  ;;  %v7630_v0 = vor.u32 %v9929_v30, %v7629_v29  ;;  %v9889_v19 = vld [vmem:[%s15727_s1 + $0x824] sm:$0xf0] }
  0x6d   :  { %5187 = vmatpush.bf16.msrb.mxu1 %v7302_v56  ;;  %v9837_v56 = vld [vmem:[%s15727_s1 + $0x684] sm:$0xf0]  ;;  %v7198_v5 = vor.u32 %v9821_v52, %v7197_v51  ;;  %v7622_v52 = vor.u32 %v9927_v47, %v7621_v46  ;;  %v7533_v20 = vld [vmem:[%s15727_s1 + $0x8a0] sm:$0xf]  ;;  %v7589_v46 = vld [vmem:[%s15727_s1 + $0x910] sm:$0xf] }
  0x6e   :  { %5200 = vmatpush.bf16.msrb.mxu2 %v7366_v57  ;;  %v7325_v57 = vld [vmem:[%s15727_s1 + $0x700] sm:$0xf]  ;;  %v7262_v9 = vor.u32 %v9837_v56, %v7261_v55  ;;  %v7686_v56 = vor.u32 %v9943_v49, %v7685_v48  ;;  %v9905_v25 = vld [vmem:[%s15727_s1 + $0x8a4] sm:$0xf0]  ;;  %v9919_v47 = vld [vmem:[%s15727_s1 + $0x914] sm:$0xf0] }
  0x6f   :  { %5213 = vmatpush.bf16.msrb.mxu3 %v7430_v60  ;;  %v9853_v60 = vld [vmem:[%s15727_s1 + $0x704] sm:$0xf0]  ;;  %v7549_v55 = vld [vmem:[%s15727_s1 + $0x8c0] sm:$0xf]  ;;  %v7653_v48 = vld [vmem:[%s15727_s1 + $0x990] sm:$0xf] }
  0x70   :  { %5175 = vmatpush.bf16.msrb.mxu0 %v7230_v2  ;;  %v7509_v2 = vld [vmem:[%s15727_s1 + $0x870] sm:$0xf]  ;;  %v7326_v10 = vor.u32 %v9853_v60, %v7325_v57  ;;  %v9909_v57 = vld [vmem:[%s15727_s1 + $0x8c4] sm:$0xf0]  ;;  %v7597_v29 = vld [vmem:[%s15727_s1 + $0x920] sm:$0xf] }
  0x71   :  { %5188 = vmatpush.bf16.msrb.mxu1 %v7294_v3  ;;  %v9899_v3 = vld [vmem:[%s15727_s1 + $0x874] sm:$0xf0]  ;;  %v9925_v60 = vld [vmem:[%s15727_s1 + $0x944] sm:$0xf0] }
  0x72   :  { %5201 = vmatpush.bf16.msrb.mxu2 %v7358_v4  ;;  %v7573_v4 = vld [vmem:[%s15727_s1 + $0x8f0] sm:$0xf]  ;;  %v9921_v30 = vld [vmem:[%s15727_s1 + $0x924] sm:$0xf0]  ;;  %v9935_v49 = vld [vmem:[%s15727_s1 + $0x994] sm:$0xf0] }
  0x73   :  { %5214 = vmatpush.bf16.msrb.mxu3 %v7422_v8  ;;  %v9931_v8 = vld [vmem:[%s15727_s1 + $0x974] sm:$0xf0] }
  0x74   :  { %5176 = vmatpush.bf16.msrb.mxu0 %v7222_v14  ;;  %v7510_v14 = vor.u32 %v9899_v3, %v7509_v2  ;;  %v7550_v3 = vor.u32 %v9909_v57, %v7549_v55  ;;  %v7581_v57 = vld [vmem:[%s15727_s1 + $0x900] sm:$0xf] }
  0x75   :  { %5189 = vmatpush.bf16.msrb.mxu1 %v7286_v15  ;;  %v7574_v15 = vor.u32 %v9915_v6, %v7573_v4  ;;  %v9891_v6 = vld [vmem:[%s15727_s1 + $0x834] sm:$0xf0] }
  0x76   :  { %5202 = vmatpush.bf16.msrb.mxu2 %v7350_v16  ;;  %v7638_v16 = vor.u32 %v9931_v8, %v7637_v7  ;;  %v7541_v7 = vld [vmem:[%s15727_s1 + $0x8b0] sm:$0xf]  ;;  %v7678_v8 = vor.u32 %v9941_v63, %v7677_v61  ;;  %v7654_v61 = vor.u32 %v9935_v49, %v7653_v48  ;;  %v9933_v63 = vld [vmem:[%s15727_s1 + $0x984] sm:$0xf0] }
  0x77   :  { %5215 = vmatpush.bf16.msrb.mxu3 %v7414_v23  ;;  %v7702_v23 = vor.u32 %v9947_v12, %v7701_v11  ;;  %v9923_v11 = vld [vmem:[%s15727_s1 + $0x934] sm:$0xf0]  ;;  %v7669_v12 = vld [vmem:[%s15727_s1 + $0x9b0] sm:$0xf] }
  0x78   :  { %5177 = vmatpush.bf16.msrb.mxu0 %v7214_v26  ;;  %v7693_v26 = vld [vmem:[%s15727_s1 + $0x9e0] sm:$0xf]  ;;  %v7749_v49 = vld [vmem:[%s15727_s1 + $0xa50] sm:$0xf] }
  0x79   :  { %5190 = vmatpush.bf16.msrb.mxu1 %v7278_v33  ;;  %v9945_v33 = vld [vmem:[%s15727_s1 + $0x9e4] sm:$0xf0] }
  0x7a   :  { %5203 = vmatpush.bf16.msrb.mxu2 %v7342_v34  ;;  %v11372_v34 = vpack.c.bf16 %v11212_v1, %v11212_v1  ;;  %v7694_v1 = vor.u32 %v9945_v33, %v7693_v26  ;;  %v7661_v26 = vld [vmem:[%s15727_s1 + $0x9a0] sm:$0xf]  ;;  %v9937_v33 = vld [vmem:[%s15727_s1 + $0x9a4] sm:$0xf0] }
  0x7b   :  { %5216 = vmatpush.bf16.msrb.mxu3 %v7406_v41  ;;  %v7557_v41 = vld [vmem:[%s15727_s1 + $0x8d0] sm:$0xf] }
  0x7c   :  { %5178 = vmatpush.bf16.msrb.mxu0 %v7206_v50  ;;  %v7494_v50 = vor.u32 %v9895_v27, %v7493_v38  ;;  %v7558_v51 = vor.u32 %v9911_v45, %v7557_v41  ;;  %v7461_v38 = vld [vmem:[%s15727_s1 + $0x810] sm:$0xf]  ;;  %v9887_v27 = vld [vmem:[%s15727_s1 + $0x814] sm:$0xf0] }
  0x7d   :  { %5191 = vmatpush.bf16.msrb.mxu1 %v7270_v53  ;;  %v7485_v53 = vld [vmem:[%s15727_s1 + $0x840] sm:$0xf]  ;;  %v7525_v41 = vld [vmem:[%s15727_s1 + $0x890] sm:$0xf]  ;;  %v9903_v45 = vld [vmem:[%s15727_s1 + $0x894] sm:$0xf0] }
  0x7e   :  { %5204 = vmatpush.bf16.msrb.mxu2 %v7334_v54  ;;  %v9893_v54 = vld [vmem:[%s15727_s1 + $0x844] sm:$0xf0]  ;;  %v7526_v55 = vor.u32 %v9903_v45, %v7525_v41  ;;  %v7949_v41 = vld [vmem:[%s15727_s1 + $0xbe0] sm:$0xf] }
  0x7f   :  { %5217 = vmatpush.bf16.msrb.mxu3 %v7398_v58  ;;  %v7613_v58 = vld [vmem:[%s15727_s1 + $0x940] sm:$0xf]  ;;  %v7486_v2 = vor.u32 %v9893_v54, %v7485_v53  ;;  %v9901_v54 = vld [vmem:[%s15727_s1 + $0x884] sm:$0xf0] }
  0x80   :  { %5179 = vmatpush.bf16.msrb.mxu0 %v7198_v5  ;;  %v7614_v4 = vor.u32 %v9925_v60, %v7613_v58  ;;  %v7477_v5 = vld [vmem:[%s15727_s1 + $0x830] sm:$0xf]  ;;  %v7517_v53 = vld [vmem:[%s15727_s1 + $0x880] sm:$0xf]  ;;  %v9917_v58 = vld [vmem:[%s15727_s1 + $0x904] sm:$0xf0] }
  0x81   :  { %5192 = vmatpush.bf16.msrb.mxu1 %v7262_v9  ;;  %v9907_v9 = vld [vmem:[%s15727_s1 + $0x8b4] sm:$0xf0]  ;;  %v7645_v60 = vld [vmem:[%s15727_s1 + $0x980] sm:$0xf] }
  0x82   :  { %5205 = vmatpush.bf16.msrb.mxu2 %v7326_v10  ;;  %v7605_v10 = vld [vmem:[%s15727_s1 + $0x930] sm:$0xf] }
  0x83   :  { %5218 = vmatpush.bf16.msrb.mxu3 %v7390_v13  ;;  %5180 = vmatmul.bf16.vlgmr.msrb.gmra.mxu0 %v11345_v24  ;;  %v9939_v13 = vld [vmem:[%s15727_s1 + $0x9b4] sm:$0xf0] }
  0x84   :  { %5224 = vmatpush.bf16.msra.mxu0 %v7510_v14  ;;  %5193 = vmatmul.bf16.vlgmr.msrb.gmra.mxu1 %v11362_v59  ;;  %v7478_v14 = vor.u32 %v9891_v6, %v7477_v5  ;;  %v9979_v5 = vld [vmem:[%s15727_s1 + $0xaf4] sm:$0xf0]  ;;  %v7893_v6 = vld [vmem:[%s15727_s1 + $0xb70] sm:$0xf] }
  0x85   :  { %5237 = vmatpush.bf16.msra.mxu1 %v7574_v15  ;;  %5206 = vmatmul.bf16.vlgmr.msrb.gmra.mxu2 %v11358_v22  ;;  %v7542_v15 = vor.u32 %v9907_v9, %v7541_v7  ;;  %v7957_v9 = vld [vmem:[%s15727_s1 + $0xbf0] sm:$0xf] }
  0x86   :  { %5250 = vmatpush.bf16.msra.mxu2 %v7638_v16  ;;  %5219 = vmatmul.bf16.vlgmr.msrb.gmra.mxu3 %v11372_v34  ;;  %v7606_v16 = vor.u32 %v9923_v11, %v7605_v10  ;;  %v10011_v10 = vld [vmem:[%s15727_s1 + $0xbf4] sm:$0xf0]  ;;  %v7518_v11 = vor.u32 %v9901_v54, %v7517_v53  ;;  %v7877_v54 = vld [vmem:[%s15727_s1 + $0xb50] sm:$0xf] }
  0x87   :  { %5263 = vmatpush.bf16.msra.mxu3 %v7702_v23  ;;  %v7670_v23 = vor.u32 %v9939_v13, %v7669_v12  ;;  %v7582_v12 = vor.u32 %v9917_v58, %v7581_v57  ;;  %v69_v13 = vld.sshfl [vmem:[#allocation1] sm:$0xff pattern:$0x73625140]  ;;  %v9975_v53 = vld [vmem:[%s15727_s1 + $0xad4] sm:$0xf0] }
  0x88   :  { %5225 = vmatpush.bf16.msra.mxu0 %v7502_v62  ;;  %v7470_v62 = vor.u32 %v9889_v19, %v7469_v17  ;;  %v70_v17 = vld.sshfl [vmem:[#allocation1 + $0x8] sm:$0xff pattern:$0x73625140]  ;;  %v72_v19 = vld.sshfl [vmem:[#allocation1 + $0x18] sm:$0xff pattern:$0x73625140] }
  0x89   :  { %5238 = vmatpush.bf16.msra.mxu1 %v7566_v37  ;;  %v7534_v37 = vor.u32 %v9905_v25, %v7533_v20  ;;  %v7757_v25 = vld [vmem:[%s15727_s1 + $0xa60] sm:$0xf]  ;;  %v11576_v45 = vpack.c.bf16 %v72_v19, %v72_v19  ;;  %v10007_v57 = vld [vmem:[%s15727_s1 + $0xbd4] sm:$0xf0]  ;;  %v7861_v19 = vld [vmem:[%s15727_s1 + $0xb30] sm:$0xf] }
  0x8a   :  { %5251 = vmatpush.bf16.msra.mxu2 %v7630_v0  ;;  %v7598_v0 = vor.u32 %v9921_v30, %v7597_v29  ;;  %v9961_v29 = vld [vmem:[%s15727_s1 + $0xa64] sm:$0xf0]  ;;  %v7821_v30 = vld [vmem:[%s15727_s1 + $0xae0] sm:$0xf] }
  0x8b   :  { %5264 = vmatpush.bf16.msra.mxu3 %v7694_v1  ;;  %v7662_v1 = vor.u32 %v9937_v33, %v7661_v26  ;;  %v7958_v26 = vor.u32 %v10011_v10, %v7957_v9  ;;  %v11555_v33 = vpack.c.bf16 %v69_v13, %v69_v13  ;;  %v10005_v9 = vld [vmem:[%s15727_s1 + $0xbc4] sm:$0xf0]  ;;  %v7733_v13 = vld [vmem:[%s15727_s1 + $0xa30] sm:$0xf] }
  0x8c   :  { %5226 = vmatpush.bf16.msra.mxu0 %v7494_v50  ;;  %v7453_v50 = vld [vmem:[%s15727_s1 + $0x800] sm:$0xf] }
  0x8d   :  { %5239 = vmatpush.bf16.msra.mxu1 %v7558_v51  ;;  %v7462_v51 = vor.u32 %v9887_v27, %v7461_v38  ;;  %v11568_v27 = vpack.c.bf16 %v70_v17, %v70_v17  ;;  %v9971_v17 = vld [vmem:[%s15727_s1 + $0xab4] sm:$0xf0] }
  0x8e   :  { %5252 = vmatpush.bf16.msra.mxu2 %v7622_v52  ;;  %v9885_v52 = vld [vmem:[%s15727_s1 + $0x804] sm:$0xf0] }
  0x8f   :  { %5265 = vmatpush.bf16.msra.mxu3 %v7686_v56  ;;  %v7590_v56 = vor.u32 %v9919_v47, %v7589_v46  ;;  %v7454_v7 = vor.u32 %v9885_v52, %v7453_v50  ;;  %v7758_v46 = vor.u32 %v9961_v29, %v7757_v25  ;;  %v9959_v50 = vld [vmem:[%s15727_s1 + $0xa54] sm:$0xf0] }
  0x90   :  { %5227 = vmatpush.bf16.msra.mxu0 %v7486_v2  ;;  %v7765_v2 = vld [vmem:[%s15727_s1 + $0xa70] sm:$0xf]  ;;  %v7750_v58 = vor.u32 %v9959_v50, %v7749_v49  ;;  %v10003_v25 = vld [vmem:[%s15727_s1 + $0xbb4] sm:$0xf0]  ;;  %v7917_v49 = vld [vmem:[%s15727_s1 + $0xba0] sm:$0xf] }
  0x91   :  { %5240 = vmatpush.bf16.msra.mxu1 %v7550_v3  ;;  %v9963_v3 = vld [vmem:[%s15727_s1 + $0xa74] sm:$0xf0]  ;;  %v10001_v50 = vld [vmem:[%s15727_s1 + $0xba4] sm:$0xf0] }
  0x92   :  { %5253 = vmatpush.bf16.msra.mxu2 %v7614_v4  ;;  %v7829_v4 = vld [vmem:[%s15727_s1 + $0xaf0] sm:$0xf] }
  0x93   :  { %5266 = vmatpush.bf16.msra.mxu3 %v7678_v8  ;;  %v9995_v8 = vld [vmem:[%s15727_s1 + $0xb74] sm:$0xf0]  ;;  %v7830_v20 = vor.u32 %v9979_v5, %v7829_v4  ;;  %v9973_v5 = vld [vmem:[%s15727_s1 + $0xac4] sm:$0xf0] }
  0x94   :  { %5228 = vmatpush.bf16.msra.mxu0 %v7478_v14  ;;  %v71_v14 = vld.sshfl [vmem:[#allocation1 + $0x10] sm:$0xff pattern:$0x73625140] }
  0x95   :  { %5241 = vmatpush.bf16.msra.mxu1 %v7542_v15  ;;  %v7646_v15 = vor.u32 %v9933_v63, %v7645_v60  ;;  %v11566_v38 = vpack.c.bf16 %v71_v14, %v71_v14  ;;  %v7741_v63 = vld [vmem:[%s15727_s1 + $0xa40] sm:$0xf]  ;;  %v9955_v14 = vld [vmem:[%s15727_s1 + $0xa34] sm:$0xf0] }
  0x96   :  { %5254 = vmatpush.bf16.msra.mxu2 %v7606_v16  ;;  %v7766_v16 = vor.u32 %v9963_v3, %v7765_v2  ;;  %v9957_v2 = vld [vmem:[%s15727_s1 + $0xa44] sm:$0xf0]  ;;  %v7805_v3 = vld [vmem:[%s15727_s1 + $0xac0] sm:$0xf]  ;;  %v7734_v29 = vor.u32 %v9955_v14, %v7733_v13 }
  0x97   :  { %5267 = vmatpush.bf16.msra.mxu3 %v7670_v23  ;;  %v7894_v23 = vor.u32 %v9995_v8, %v7893_v6  ;;  %v7869_v6 = vld [vmem:[%s15727_s1 + $0xb40] sm:$0xf]  ;;  %v7742_v10 = vor.u32 %v9957_v2, %v7741_v63  ;;  %v9983_v63 = vld [vmem:[%s15727_s1 + $0xb14] sm:$0xf0]  ;;  %v7909_v2 = vld [vmem:[%s15727_s1 + $0xb90] sm:$0xf] }
  0x98   :  { %5229 = vmatpush.bf16.msra.mxu0 %v7470_v62  ;;  %v9977_v62 = vld [vmem:[%s15727_s1 + $0xae4] sm:$0xf0]  ;;  %v7933_v8 = vld [vmem:[%s15727_s1 + $0xbc0] sm:$0xf] }
  0x99   :  { %5242 = vmatpush.bf16.msra.mxu1 %v7534_v37  ;;  %v7885_v37 = vld [vmem:[%s15727_s1 + $0xb60] sm:$0xf]  ;;  %v7822_v47 = vor.u32 %v9977_v62, %v7821_v30 }
  0x9a   :  { %5255 = vmatpush.bf16.msra.mxu2 %v7598_v0  ;;  %v9993_v0 = vld [vmem:[%s15727_s1 + $0xb64] sm:$0xf0]  ;;  %v7725_v30 = vld [vmem:[%s15727_s1 + $0xa20] sm:$0xf] }
  0x9b   :  { %5268 = vmatpush.bf16.msra.mxu3 %v7662_v1  ;;  %v10009_v1 = vld [vmem:[%s15727_s1 + $0xbe4] sm:$0xf0]  ;;  %v7886_v48 = vor.u32 %v9993_v0, %v7885_v37  ;;  %v7789_v0 = vld [vmem:[%s15727_s1 + $0xaa0] sm:$0xf] }
  0x9c   :  { %5230 = vmatpush.bf16.msra.mxu0 %v7462_v51  ;;  %v7813_v51 = vld [vmem:[%s15727_s1 + $0xad0] sm:$0xf]  ;;  %v7950_v52 = vor.u32 %v10009_v1, %v7949_v41  ;;  %v9953_v37 = vld [vmem:[%s15727_s1 + $0xa24] sm:$0xf0]  ;;  %v7901_v14 = vld [vmem:[%s15727_s1 + $0xb80] sm:$0xf] }
  0x9d   :  { %5243 = vmatpush.bf16.msra.mxu1 %v7526_v55  ;;  %v9991_v55 = vld [vmem:[%s15727_s1 + $0xb54] sm:$0xf0]  ;;  %v7814_v60 = vor.u32 %v9975_v53, %v7813_v51  ;;  %v9969_v41 = vld [vmem:[%s15727_s1 + $0xaa4] sm:$0xf0]  ;;  %v7726_v51 = vor.u32 %v9953_v37, %v7725_v30 }
  0x9e   :  { %5256 = vmatpush.bf16.msra.mxu2 %v7590_v56  ;;  %v7941_v56 = vld [vmem:[%s15727_s1 + $0xbd0] sm:$0xf]  ;;  %v9951_v53 = vld [vmem:[%s15727_s1 + $0xa14] sm:$0xf0] }
  0x9f   :  { %5269 = vmatpush.bf16.msra.mxu3 %v7654_v61  ;;  %v7878_v61 = vor.u32 %v9991_v55, %v7877_v54  ;;  %v7942_v4 = vor.u32 %v10007_v57, %v7941_v56  ;;  %v7790_v54 = vor.u32 %v9969_v41, %v7789_v0  ;;  %v7781_v56 = vld [vmem:[%s15727_s1 + $0xa90] sm:$0xf]  ;;  %v9967_v57 = vld [vmem:[%s15727_s1 + $0xa94] sm:$0xf0] }
  0xa0   :  { %5231 = vmatpush.bf16.msra.mxu0 %v7454_v7  ;;  %v9989_v7 = vld [vmem:[%s15727_s1 + $0xb44] sm:$0xf0]  ;;  %v10059_v30 = vld [vmem:[%s15727_s1 + $0xd74] sm:$0xf0]  ;;  %v8213_v0 = vld [vmem:[%s15727_s1 + $0xdf0] sm:$0xf] }
  0xa1   :  { %5244 = vmatpush.bf16.msra.mxu1 %v7518_v11  ;;  %v7806_v11 = vor.u32 %v9973_v5, %v7805_v3  ;;  %v9999_v3 = vld [vmem:[%s15727_s1 + $0xb94] sm:$0xf0]  ;;  %v9949_v5 = vld [vmem:[%s15727_s1 + $0xa04] sm:$0xf0] }
  0xa2   :  { %5257 = vmatpush.bf16.msra.mxu2 %v7582_v12  ;;  %v7870_v12 = vor.u32 %v9989_v7, %v7869_v6  ;;  %v7773_v7 = vld [vmem:[%s15727_s1 + $0xa80] sm:$0xf]  ;;  %v10075_v41 = vld [vmem:[%s15727_s1 + $0xdf4] sm:$0xf0] }
  0xa3   :  { %5270 = vmatpush.bf16.msra.mxu3 %v7646_v15  ;;  %5232 = vmatmul.bf16.vlgmr.msra.gmra.mxu0 %v11555_v33  ;;  %v7797_v15 = vld [vmem:[%s15727_s1 + $0xab0] sm:$0xf] }
  0xa4   :  { %5276 = vmatpush.bf16.msrb.mxu0 %v7766_v16  ;;  %5245 = vmatmul.bf16.vlgmr.msra.gmra.mxu1 %v11568_v27  ;;  %v7934_v16 = vor.u32 %v10005_v9, %v7933_v8  ;;  %v9965_v8 = vld [vmem:[%s15727_s1 + $0xa84] sm:$0xf0]  ;;  %v7837_v9 = vld [vmem:[%s15727_s1 + $0xb00] sm:$0xf] }
  0xa5   :  { %5289 = vmatpush.bf16.msrb.mxu1 %v7830_v20  ;;  %5258 = vmatmul.bf16.vlgmr.msra.gmra.mxu2 %v11566_v38  ;;  %v9987_v20 = vld [vmem:[%s15727_s1 + $0xb34] sm:$0xf0] }
  0xa6   :  { %5302 = vmatpush.bf16.msrb.mxu2 %v7894_v23  ;;  %5271 = vmatmul.bf16.vlgmr.msra.gmra.mxu3 %v11576_v45  ;;  %v7925_v23 = vld [vmem:[%s15727_s1 + $0xbb0] sm:$0xf]  ;;  %v7862_v62 = vor.u32 %v9987_v20, %v7861_v19  ;;  %v7910_v19 = vor.u32 %v9999_v3, %v7909_v2  ;;  %v10027_v20 = vld [vmem:[%s15727_s1 + $0xc74] sm:$0xf0]  ;;  %v8214_v2 = vor.u32 %v10075_v41, %v8213_v0 }
  0xa7   :  { %5315 = vmatpush.bf16.msrb.mxu3 %v7958_v26  ;;  %v7798_v26 = vor.u32 %v9971_v17, %v7797_v15  ;;  %v7926_v1 = vor.u32 %v10003_v25, %v7925_v23  ;;  %v9997_v15 = vld [vmem:[%s15727_s1 + $0xb84] sm:$0xf0]  ;;  %v8085_v23 = vld [vmem:[%s15727_s1 + $0xcf0] sm:$0xf]  ;;  %v10043_v25 = vld [vmem:[%s15727_s1 + $0xcf4] sm:$0xf0] }
  0xa8   :  { %5277 = vmatpush.bf16.msrb.mxu0 %v7758_v46  ;;  %v7853_v46 = vld [vmem:[%s15727_s1 + $0xb20] sm:$0xf] }
  0xa9   :  { %5290 = vmatpush.bf16.msrb.mxu1 %v7822_v47  ;;  %v9985_v47 = vld [vmem:[%s15727_s1 + $0xb24] sm:$0xf0] }
  0xaa   :  { %5303 = vmatpush.bf16.msrb.mxu2 %v7886_v48  ;;  %v1010_v48 = vld [vmem:[%s15729_s2] sm:$0x3]  ;;  %v7854_v55 = vor.u32 %v9985_v47, %v7853_v46  ;;  %v7774_v46 = vor.u32 %v9965_v8, %v7773_v7 }
  0xab   :  { %5316 = vmatpush.bf16.msrb.mxu3 %v7950_v52  ;;  %v7717_v52 = vld [vmem:[%s15727_s1 + $0xa10] sm:$0xf] }
  0xac   :  { %5278 = vmatpush.bf16.msrb.mxu0 %v7750_v58  ;;  %v1012_v58 = vperm.slane %v1010_v48, 0  ;;  %v7718_v6 = vor.u32 %v9951_v53, %v7717_v52  ;;  %v73_v48 = vld.sshfl [vmem:[#allocation1 + $0x20] sm:$0xff pattern:$0x73625140] }
  0xad   :  { %5291 = vmatpush.bf16.msrb.mxu1 %v7814_v60  ;;  %v7918_v60 = vor.u32 %v10001_v50, %v7917_v49  ;;  %v75_v49 = vld.sshfl [vmem:[#allocation1 + $0x30] sm:$0xff pattern:$0x73625140]  ;;  %v7902_v50 = vor.u32 %v9997_v15, %v7901_v14  ;;  %v74_v52 = vld.sshfl [vmem:[#allocation1 + $0x28] sm:$0xff pattern:$0x73625140]  ;;  %v11765_v3 = vpack.c.bf16 %v73_v48, %v73_v48 }
  0xae   :  { %5304 = vmatpush.bf16.msrb.mxu2 %v7878_v61  ;;  %v7845_v61 = vld [vmem:[%s15727_s1 + $0xb10] sm:$0xf]  ;;  %v76_v53 = vld.sshfl [vmem:[#allocation1 + $0x38] sm:$0xff pattern:$0x73625140]  ;;  %v11776_v8 = vpack.c.bf16 %v75_v49, %v75_v49 }
  0xaf   :  { %5317 = vmatpush.bf16.msrb.mxu3 %v7942_v4  ;;  %v7709_v4 = vld [vmem:[%s15727_s1 + $0xa00] sm:$0xf]  ;;  %v7846_v13 = vor.u32 %v9983_v63, %v7845_v61  ;;  %v5064_v63 = vpop.f32.mrf.mxu3  ;;  %v10021_v48 = vld [vmem:[%s15727_s1 + $0xc44] sm:$0xf0] }
  0xb0   :  { %5279 = vmatpush.bf16.msrb.mxu0 %v7742_v10  ;;  %v9981_v10 = vld [vmem:[%s15727_s1 + $0xb04] sm:$0xf0]  ;;  %v7710_v37 = vor.u32 %v9949_v5, %v7709_v4  ;;  %v8141_v5 = vld [vmem:[%s15727_s1 + $0xd60] sm:$0xf] }
  0xb1   :  { %5292 = vmatpush.bf16.msrb.mxu1 %v7806_v11  ;;  %v5025_v11 = vpop.f32.mrf.mxu0  ;;  %v7838_v47 = vor.u32 %v9981_v10, %v7837_v9  ;;  %v10041_v4 = vld [vmem:[%s15727_s1 + $0xce4] sm:$0xf0]  ;;  %v11778_v9 = vpack.c.bf16 %v74_v52, %v74_v52  ;;  %v8205_v10 = vld [vmem:[%s15727_s1 + $0xde0] sm:$0xf] }
  0xb2   :  { %5305 = vmatpush.bf16.msrb.mxu2 %v7870_v12  ;;  %v7782_v12 = vor.u32 %v9967_v57, %v7781_v56  ;;  %v5026_v17 = vadd.f32 %v5025_v11, %v1012_v58  ;;  %v8013_v57 = vld [vmem:[%s15727_s1 + $0xc60] sm:$0xf]  ;;  %v10025_v58 = vld [vmem:[%s15727_s1 + $0xc64] sm:$0xf0] }
  0xb3   :  { %5318 = vmatpush.bf16.msrb.mxu3 %v7934_v16  ;;  %v8021_v16 = vld [vmem:[%s15727_s1 + $0xc70] sm:$0xf]  ;;  %v10073_v11 = vld [vmem:[%s15727_s1 + $0xde4] sm:$0xf0]  ;;  %v8014_v14 = vor.u32 %v10025_v58, %v8013_v57  ;;  %v8061_v49 = vld [vmem:[%s15727_s1 + $0xcc0] sm:$0xf] }
  0xb4   :  { %5280 = vmatpush.bf16.msrb.mxu0 %v7734_v29  ;;  %v8149_v29 = vld [vmem:[%s15727_s1 + $0xd70] sm:$0xf]  ;;  %v10037_v52 = vld [vmem:[%s15727_s1 + $0xcc4] sm:$0xf0] }
  0xb5   :  { %5293 = vmatpush.bf16.msrb.mxu1 %v7798_v26  ;;  %v5038_v26 = vpop.f32.mrf.mxu1  ;;  %v8150_v56 = vor.u32 %v10059_v30, %v8149_v29  ;;  %v10039_v29 = vld [vmem:[%s15727_s1 + $0xcd4] sm:$0xf0]  ;;  %v8133_v30 = vld [vmem:[%s15727_s1 + $0xd50] sm:$0xf] }
  0xb6   :  { %5306 = vmatpush.bf16.msrb.mxu2 %v7862_v62  ;;  %v26_v62 = vld [vmem:[%s15728_s0 + $0x30] sm:$0xff] }
  0xb7   :  { %5319 = vmatpush.bf16.msrb.mxu3 %v7926_v1  ;;  %v5039_v1 = vadd.f32 %v5038_v26, %v5026_v17  ;;  %77 = vst [vmem:[#allocation1] ss:$4 sm:$0xff] %v26_v62  ;;  %v8005_v17 = vld [vmem:[%s15727_s1 + $0xc50] sm:$0xf]  ;;  %v10055_v26 = vld [vmem:[%s15727_s1 + $0xd54] sm:$0xf0] }
  0xb8   :  { %5281 = vmatpush.bf16.msrb.mxu0 %v7726_v51  ;;  %v8022_v51 = vor.u32 %v10027_v20, %v8021_v16  ;;  %v8069_v20 = vld [vmem:[%s15727_s1 + $0xcd0] sm:$0xf] }
  0xb9   :  { %5294 = vmatpush.bf16.msrb.mxu1 %v7790_v54  ;;  %v5051_v54 = vpop.f32.mrf.mxu2  ;;  %v5027_v7 = vpop.f32.mrf.mxu0  ;;  %v8197_v62 = vld [vmem:[%s15727_s1 + $0xdd0] sm:$0xf] }
  0xba   :  { %5307 = vmatpush.bf16.msrb.mxu2 %v7854_v55  ;;  %v8086_v55 = vor.u32 %v10043_v25, %v8085_v23  ;;  %v5052_v61 = vadd.f32 %v5051_v54, %v5039_v1  ;;  %v8206_v25 = vor.u32 %v10073_v11, %v8205_v10  ;;  %v8070_v1 = vor.u32 %v10039_v29, %v8069_v20  ;;  %v10053_v54 = vld [vmem:[%s15727_s1 + $0xd44] sm:$0xf0]  ;;  %v10035_v10 = vld [vmem:[%s15727_s1 + $0xcb4] sm:$0xf0]  ;;  %v8117_v11 = vld [vmem:[%s15727_s1 + $0xd30] sm:$0xf] }
  0xbb   :  { %5320 = vmatpush.bf16.msrb.mxu3 %v7918_v60  ;;  %v8077_v60 = vld [vmem:[%s15727_s1 + $0xce0] sm:$0xf] }
  0xbc   :  { %5282 = vmatpush.bf16.msrb.mxu0 %v7718_v6  ;;  %v10057_v6 = vld [vmem:[%s15727_s1 + $0xd64] sm:$0xf0]  ;;  %v8078_v15 = vor.u32 %v10041_v4, %v8077_v60  ;;  %v8062_v60 = vor.u32 %v10037_v52, %v8061_v49  ;;  %v8053_v4 = vld [vmem:[%s15727_s1 + $0xcb0] sm:$0xf]  ;;  %v8045_v29 = vld [vmem:[%s15727_s1 + $0xca0] sm:$0xf] }
  0xbd   :  { %5295 = vmatpush.bf16.msrb.mxu1 %v7782_v12  ;;  %v5065_v12 = vadd.f32 %v5064_v63, %v5052_v61  ;;  %v8142_v16 = vor.u32 %v10057_v6, %v8141_v5  ;;  %v5040_v23 = vpop.f32.mrf.mxu1  ;;  %v7989_v63 = vld [vmem:[%s15727_s1 + $0xc30] sm:$0xf] }
  0xbe   :  { %5308 = vmatpush.bf16.msrb.mxu2 %v7846_v13  ;;  %v11786_v13 = vpack.c.bf16 %v76_v53, %v76_v53  ;;  %v8125_v53 = vld [vmem:[%s15727_s1 + $0xd40] sm:$0xf]  ;;  %v7973_v49 = vld [vmem:[%s15727_s1 + $0xc10] sm:$0xf] }
  0xbf   :  { %5321 = vmatpush.bf16.msrb.mxu3 %v7910_v19  ;;  %v10023_v19 = vld [vmem:[%s15727_s1 + $0xc54] sm:$0xf0]  ;;  %v8126_v61 = vor.u32 %v10053_v54, %v8125_v53  ;;  %v7981_v23 = vld [vmem:[%s15727_s1 + $0xc20] sm:$0xf] }
  0xc0   :  { %5283 = vmatpush.bf16.msrb.mxu0 %v7710_v37  ;;  %v10071_v37 = vld [vmem:[%s15727_s1 + $0xdd4] sm:$0xf0]  ;;  %v8006_v0 = vor.u32 %v10023_v19, %v8005_v17  ;;  %v8054_v19 = vor.u32 %v10035_v10, %v8053_v4  ;;  %v7965_v4 = vld [vmem:[%s15727_s1 + $0xc00] sm:$0xf]  ;;  %v10029_v10 = vld [vmem:[%s15727_s1 + $0xc84] sm:$0xf0] }
  0xc1   :  { %5296 = vmatpush.bf16.msrb.mxu1 %v7774_v46  ;;  %v5053_v41 = vpop.f32.mrf.mxu2  ;;  %v8134_v46 = vor.u32 %v10055_v26, %v8133_v30  ;;  %v5077_v58 = vpop.f32.mrf.mxu0  ;;  %v10015_v54 = vld [vmem:[%s15727_s1 + $0xc14] sm:$0xf0] }
  0xc2   :  { %5309 = vmatpush.bf16.msrb.mxu2 %v7838_v47  ;;  %v7997_v47 = vld [vmem:[%s15727_s1 + $0xc40] sm:$0xf]  ;;  %v5078_v5 = vadd.f32 %v5077_v58, %v5065_v12  ;;  %v10067_v12 = vld [vmem:[%s15727_s1 + $0xdb4] sm:$0xf0] }
  0xc3   :  { %5322 = vmatpush.bf16.msrb.mxu3 %v7902_v50  ;;  %5284 = vmatmul.bf16.vlgmr.msrb.gmra.mxu0 %v11765_v3  ;;  %v5066_v50 = vpop.f32.mrf.mxu3  ;;  %v7998_v57 = vor.u32 %v10021_v48, %v7997_v47  ;;  %v10065_v47 = vld [vmem:[%s15727_s1 + $0xda4] sm:$0xf0] }
  0xc4   :  { %5328 = vmatpush.bf16.msra.mxu0 %v8022_v51  ;;  %5297 = vmatmul.bf16.vlgmr.msrb.gmra.mxu1 %v11778_v9  ;;  %v8198_v51 = vor.u32 %v10071_v37, %v8197_v62  ;;  %v10033_v62 = vld [vmem:[%s15727_s1 + $0xca4] sm:$0xf0]  ;;  %v8109_v37 = vld [vmem:[%s15727_s1 + $0xd20] sm:$0xf] }
  0xc5   :  { %5341 = vmatpush.bf16.msra.mxu1 %v8086_v55  ;;  %5310 = vmatmul.bf16.vlgmr.msrb.gmra.mxu2 %v11776_v8  ;;  %v8189_v55 = vld [vmem:[%s15727_s1 + $0xdc0] sm:$0xf]  ;;  %v5090_v6 = vpop.f32.mrf.mxu1  ;;  %v8046_v52 = vor.u32 %v10033_v62, %v8045_v29  ;;  %v8341_v29 = vld [vmem:[%s15727_s1 + $0xef0] sm:$0xf] }
  0xc6   :  { %5354 = vmatpush.bf16.msra.mxu2 %v8150_v56  ;;  %5323 = vmatmul.bf16.vlgmr.msrb.gmra.mxu3 %v11786_v13  ;;  %v10069_v56 = vld [vmem:[%s15727_s1 + $0xdc4] sm:$0xf0]  ;;  %v8405_v62 = vld [vmem:[%s15727_s1 + $0xf70] sm:$0xf] }
  0xc7   :  { %5367 = vmatpush.bf16.msra.mxu3 %v8214_v2  ;;  %v10019_v2 = vld [vmem:[%s15727_s1 + $0xc34] sm:$0xf0]  ;;  %v8190_v7 = vor.u32 %v10069_v56, %v8189_v55  ;;  %v8037_v55 = vld [vmem:[%s15727_s1 + $0xc90] sm:$0xf] }
  0xc8   :  { %5329 = vmatpush.bf16.msra.mxu0 %v8014_v14  ;;  %v10051_v14 = vld [vmem:[%s15727_s1 + $0xd34] sm:$0xf0]  ;;  %v7990_v17 = vor.u32 %v10019_v2, %v7989_v63  ;;  %v8165_v63 = vld [vmem:[%s15727_s1 + $0xd90] sm:$0xf] }
  0xc9   :  { %5342 = vmatpush.bf16.msra.mxu1 %v8078_v15  ;;  %v8181_v15 = vld [vmem:[%s15727_s1 + $0xdb0] sm:$0xf]  ;;  %v8118_v20 = vor.u32 %v10051_v14, %v8117_v11  ;;  %v5103_v30 = vpop.f32.mrf.mxu2  ;;  %v10031_v56 = vld [vmem:[%s15727_s1 + $0xc94] sm:$0xf0]  ;;  %v8093_v11 = vld [vmem:[%s15727_s1 + $0xd00] sm:$0xf] }
  0xca   :  { %5355 = vmatpush.bf16.msra.mxu2 %v8142_v16  ;;  %v5091_v16 = vadd.f32 %v5090_v6, %v5078_v5  ;;  %v8182_v26 = vor.u32 %v10067_v12, %v8181_v15  ;;  %v10063_v2 = vld [vmem:[%s15727_s1 + $0xd94] sm:$0xf0]  ;;  %v10013_v5 = vld [vmem:[%s15727_s1 + $0xc04] sm:$0xf0]  ;;  %v7974_v6 = vor.u32 %v10015_v54, %v7973_v49  ;;  %v8038_v15 = vor.u32 %v10031_v56, %v8037_v55 }
  0xcb   :  { %5368 = vmatpush.bf16.msra.mxu3 %v8206_v25  ;;  %v10017_v25 = vld [vmem:[%s15727_s1 + $0xc24] sm:$0xf0]  ;;  %v79_v49 = vld.sshfl [vmem:[#allocation1] sm:$0xff pattern:$0x73625140] }
  0xcc   :  { %5330 = vmatpush.bf16.msra.mxu0 %v8006_v0  ;;  %v10049_v0 = vld [vmem:[%s15727_s1 + $0xd24] sm:$0xf0]  ;;  %v5104_v41 = vadd.f32 %v5103_v30, %v5091_v16  ;;  %v7982_v48 = vor.u32 %v10017_v25, %v7981_v23  ;;  %v8157_v16 = vld [vmem:[%s15727_s1 + $0xd80] sm:$0xf]  ;;  %v8166_v23 = vor.u32 %v10063_v2, %v8165_v63  ;;  %v10091_v25 = vld [vmem:[%s15727_s1 + $0xe74] sm:$0xf0]  ;;  %v11974_v2 = vpack.c.bf16 %v79_v49, %v79_v49 }
  0xcd   :  { %5343 = vmatpush.bf16.msra.mxu1 %v8070_v1  ;;  %v5116_v1 = vpop.f32.mrf.mxu3  ;;  %v8110_v53 = vor.u32 %v10049_v0, %v8109_v37  ;;  %v10045_v14 = vld [vmem:[%s15727_s1 + $0xd04] sm:$0xf0]  ;;  %v10107_v30 = vld [vmem:[%s15727_s1 + $0xef4] sm:$0xf0] }
  0xce   :  { %5356 = vmatpush.bf16.msra.mxu2 %v8134_v46  ;;  %v8173_v46 = vld [vmem:[%s15727_s1 + $0xda0] sm:$0xf]  ;;  %v11891_v50 = vadd.f32 %v5116_v1, %v5104_v41  ;;  %v10123_v37 = vld [vmem:[%s15727_s1 + $0xf74] sm:$0xf0]  ;;  %v7966_v41 = vor.u32 %v10013_v5, %v7965_v4  ;;  %v8469_v1 = vld [vmem:[%s15727_s1 + $0xff0] sm:$0xf]  ;;  %v8342_v56 = vor.u32 %v10107_v30, %v8341_v29 }
  0xcf   :  { %5369 = vmatpush.bf16.msra.mxu3 %v8198_v51  ;;  %v5079_v51 = vpop.f32.mrf.mxu0  ;;  %v8174_v58 = vor.u32 %v10065_v47, %v8173_v46  ;;  %v27_v0 = vld [vmem:[%s15728_s0 + $0x38] sm:$0xff]  ;;  %v80_v54 = vld.sshfl [vmem:[#allocation1 + $0x8] sm:$0xff pattern:$0x73625140]  ;;  %v8397_v5 = vld [vmem:[%s15727_s1 + $0xf60] sm:$0xf] }
  0xd0   :  { %5331 = vmatpush.bf16.msra.mxu0 %v7998_v57  ;;  %v5092_v57 = vpop.f32.mrf.mxu1  ;;  %v10139_v46 = vld [vmem:[%s15727_s1 + $0xff4] sm:$0xf0]  ;;  %78 = vst [vmem:[#allocation1 + $0x20] ss:$4 sm:$0xff] %v27_v0  ;;  %v10105_v4 = vld [vmem:[%s15727_s1 + $0xee4] sm:$0xf0] }
  0xd1   :  { %5344 = vmatpush.bf16.msra.mxu1 %v8062_v60  ;;  %v8101_v60 = vld [vmem:[%s15727_s1 + $0xd10] sm:$0xf]  ;;  %v82_v55 = vld.sshfl [vmem:[#allocation1 + $0x18] sm:$0xff pattern:$0x73625140]  ;;  %v8406_v57 = vor.u32 %v10123_v37, %v8405_v62  ;;  %v8470_v63 = vor.u32 %v10139_v46, %v8469_v1 }
  0xd2   :  { %5357 = vmatpush.bf16.msra.mxu2 %v8126_v61  ;;  %v10047_v61 = vld [vmem:[%s15727_s1 + $0xd14] sm:$0xf0]  ;;  %v81_v51 = vld.sshfl [vmem:[#allocation1 + $0x10] sm:$0xff pattern:$0x73625140] }
  0xd3   :  { %5370 = vmatpush.bf16.msra.mxu3 %v8190_v7  ;;  %v8029_v7 = vld [vmem:[%s15727_s1 + $0xc80] sm:$0xf]  ;;  %v8102_v12 = vor.u32 %v10047_v61, %v8101_v60  ;;  %v10089_v60 = vld [vmem:[%s15727_s1 + $0xe64] sm:$0xf0]  ;;  %v10103_v29 = vld [vmem:[%s15727_s1 + $0xed4] sm:$0xf0] }
  0xd4   :  { %5332 = vmatpush.bf16.msra.mxu0 %v7990_v17  ;;  %v10061_v17 = vld [vmem:[%s15727_s1 + $0xd84] sm:$0xf0]  ;;  %v8030_v47 = vor.u32 %v10029_v10, %v8029_v7  ;;  %v8333_v61 = vld [vmem:[%s15727_s1 + $0xee0] sm:$0xf]  ;;  %v11985_v7 = vpack.c.bf16 %v81_v51, %v81_v51  ;;  %v11987_v10 = vpack.c.bf16 %v80_v54, %v80_v54  ;;  %v8389_v30 = vld [vmem:[%s15727_s1 + $0xf50] sm:$0xf] }
  0xd5   :  { %5345 = vmatpush.bf16.msra.mxu1 %v8054_v19  ;;  %v8277_v19 = vld [vmem:[%s15727_s1 + $0xe70] sm:$0xf]  ;;  %v10135_v37 = vld [vmem:[%s15727_s1 + $0xfd4] sm:$0xf0]  ;;  %v8253_v46 = vld [vmem:[%s15727_s1 + $0xe40] sm:$0xf] }
  0xd6   :  { %5358 = vmatpush.bf16.msra.mxu2 %v8118_v20  ;;  %v5105_v20 = vpop.f32.mrf.mxu2  ;;  %v8453_v62 = vld [vmem:[%s15727_s1 + $0xfd0] sm:$0xf]  ;;  %v10101_v51 = vld [vmem:[%s15727_s1 + $0xec4] sm:$0xf0] }
  0xd7   :  { %5371 = vmatpush.bf16.msra.mxu3 %v8182_v26  ;;  %v5118_v26 = vpop.f32.mrf.mxu3  ;;  %v10087_v20 = vld [vmem:[%s15727_s1 + $0xe54] sm:$0xf0]  ;;  %v8454_v49 = vor.u32 %v10135_v37, %v8453_v62 }
  0xd8   :  { %5333 = vmatpush.bf16.msra.mxu0 %v7982_v48  ;;  %v8094_v48 = vor.u32 %v10045_v14, %v8093_v11  ;;  %v8461_v11 = vld [vmem:[%s15727_s1 + $0xfe0] sm:$0xf]  ;;  %v10137_v14 = vld [vmem:[%s15727_s1 + $0xfe4] sm:$0xf0]  ;;  %v10119_v26 = vld [vmem:[%s15727_s1 + $0xf54] sm:$0xf0] }
  0xd9   :  { %5346 = vmatpush.bf16.msra.mxu1 %v8046_v52  ;;  %v8158_v52 = vor.u32 %v10061_v17, %v8157_v16  ;;  %v8334_v16 = vor.u32 %v10105_v4, %v8333_v61  ;;  %v8390_v1 = vor.u32 %v10119_v26, %v8389_v30  ;;  %v8245_v4 = vld [vmem:[%s15727_s1 + $0xe30] sm:$0xf]  ;;  %v10081_v30 = vld [vmem:[%s15727_s1 + $0xe24] sm:$0xf0]  ;;  %v8301_v26 = vld [vmem:[%s15727_s1 + $0xea0] sm:$0xf] }
  0xda   :  { %5359 = vmatpush.bf16.msra.mxu2 %v8110_v53  ;;  %v8278_v53 = vor.u32 %v10091_v25, %v8277_v19  ;;  %v8261_v19 = vld [vmem:[%s15727_s1 + $0xe50] sm:$0xf]  ;;  %v8462_v25 = vor.u32 %v10137_v14, %v8461_v11  ;;  %v10099_v14 = vld [vmem:[%s15727_s1 + $0xeb4] sm:$0xf0] }
  0xdb   :  { %5372 = vmatpush.bf16.msra.mxu3 %v8174_v58  ;;  %v8269_v58 = vld [vmem:[%s15727_s1 + $0xe60] sm:$0xf]  ;;  %v8262_v0 = vor.u32 %v10087_v20, %v8261_v19  ;;  %v10131_v19 = vld [vmem:[%s15727_s1 + $0xfb4] sm:$0xf0] }
  0xdc   :  { %5334 = vmatpush.bf16.msra.mxu0 %v7974_v6  ;;  %v10121_v6 = vld [vmem:[%s15727_s1 + $0xf64] sm:$0xf0] }
  0xdd   :  { %5347 = vmatpush.bf16.msra.mxu1 %v8038_v15  ;;  %v11995_v15 = vpack.c.bf16 %v82_v55, %v82_v55  ;;  %v8398_v17 = vor.u32 %v10121_v6, %v8397_v5  ;;  %v8445_v55 = vld [vmem:[%s15727_s1 + $0xfc0] sm:$0xf]  ;;  %v10083_v5 = vld [vmem:[%s15727_s1 + $0xe34] sm:$0xf0]  ;;  %v8309_v6 = vld [vmem:[%s15727_s1 + $0xeb0] sm:$0xf] }
  0xde   :  { %5360 = vmatpush.bf16.msra.mxu2 %v8102_v12  ;;  %v8270_v12 = vor.u32 %v10089_v60, %v8269_v58  ;;  %v8246_v20 = vor.u32 %v10083_v5, %v8245_v4  ;;  %v8357_v4 = vld [vmem:[%s15727_s1 + $0xf10] sm:$0xf]  ;;  %v10111_v5 = vld [vmem:[%s15727_s1 + $0xf14] sm:$0xf0] }
  0xdf   :  { %5373 = vmatpush.bf16.msra.mxu3 %v8166_v23  ;;  %v8325_v23 = vld [vmem:[%s15727_s1 + $0xed0] sm:$0xf] }
  0xe0   :  { %5335 = vmatpush.bf16.msra.mxu0 %v7966_v41  ;;  %v8326_v41 = vor.u32 %v10103_v29, %v8325_v23  ;;  %v5129_v54 = vpop.f32.mrf.mxu0  ;;  %v8310_v23 = vor.u32 %v10099_v14, %v8309_v6  ;;  %v8237_v29 = vld [vmem:[%s15727_s1 + $0xe20] sm:$0xf]  ;;  %v8421_v6 = vld [vmem:[%s15727_s1 + $0xf90] sm:$0xf]  ;;  %v10077_v14 = vld [vmem:[%s15727_s1 + $0xe04] sm:$0xf0] }
  0xe1   :  { %5348 = vmatpush.bf16.msra.mxu1 %v8030_v47  ;;  %v10085_v47 = vld [vmem:[%s15727_s1 + $0xe44] sm:$0xf0]  ;;  %v5142_v60 = vpop.f32.mrf.mxu1 }
  0xe2   :  { %5361 = vmatpush.bf16.msra.mxu2 %v8094_v48  ;;  %v8317_v48 = vld [vmem:[%s15727_s1 + $0xec0] sm:$0xf]  ;;  %v8254_v58 = vor.u32 %v10085_v47, %v8253_v46 }
  0xe3   :  { %5374 = vmatpush.bf16.msra.mxu3 %v8158_v52  ;;  %5336 = vmatmul.bf16.vlgmr.msra.gmra.mxu0 %v11974_v2  ;;  %v8381_v52 = vld [vmem:[%s15727_s1 + $0xf40] sm:$0xf]  ;;  %v8318_v61 = vor.u32 %v10101_v51, %v8317_v48 }
  0xe4   :  { %5380 = vmatpush.bf16.msrb.mxu0 %v8278_v53  ;;  %5349 = vmatmul.bf16.vlgmr.msra.gmra.mxu1 %v11987_v10  ;;  %v10117_v53 = vld [vmem:[%s15727_s1 + $0xf44] sm:$0xf0]  ;;  %v8429_v48 = vld [vmem:[%s15727_s1 + $0xfa0] sm:$0xf] }
  0xe5   :  { %5393 = vmatpush.bf16.msrb.mxu1 %v8342_v56  ;;  %5362 = vmatmul.bf16.vlgmr.msra.gmra.mxu2 %v11985_v7  ;;  %v10133_v56 = vld [vmem:[%s15727_s1 + $0xfc4] sm:$0xf0] }
  0xe6   :  { %5406 = vmatpush.bf16.msrb.mxu2 %v8406_v57  ;;  %5375 = vmatmul.bf16.vlgmr.msra.gmra.mxu3 %v11995_v15  ;;  %v5130_v57 = vadd.f32 %v5129_v54, %v11891_v50  ;;  %v8446_v50 = vor.u32 %v10133_v56, %v8445_v55 }
  0xe7   :  { %5419 = vmatpush.bf16.msrb.mxu3 %v8470_v63  ;;  %v8382_v63 = vor.u32 %v10117_v53, %v8381_v52  ;;  %v8238_v52 = vor.u32 %v10081_v30, %v8237_v29  ;;  %v8229_v53 = vld [vmem:[%s15727_s1 + $0xe10] sm:$0xf]  ;;  %v8413_v29 = vld [vmem:[%s15727_s1 + $0xf80] sm:$0xf]  ;;  %v10125_v30 = vld [vmem:[%s15727_s1 + $0xf84] sm:$0xf0] }
  0xe8   :  { %5381 = vmatpush.bf16.msrb.mxu0 %v8270_v12  ;;  %v5143_v11 = vadd.f32 %v5142_v60, %v5130_v57  ;;  %v8373_v12 = vld [vmem:[%s15727_s1 + $0xf30] sm:$0xf]  ;;  %v5155_v37 = vpop.f32.mrf.mxu2  ;;  %v5131_v51 = vpop.f32.mrf.mxu0 }
  0xe9   :  { %5394 = vmatpush.bf16.msrb.mxu1 %v8334_v16  ;;  %v10115_v16 = vld [vmem:[%s15727_s1 + $0xf34] sm:$0xf0]  ;;  %v5168_v47 = vpop.f32.mrf.mxu3  ;;  %v5144_v54 = vpop.f32.mrf.mxu1  ;;  %v8293_v60 = vld [vmem:[%s15727_s1 + $0xe90] sm:$0xf] }
  0xea   :  { %5407 = vmatpush.bf16.msrb.mxu2 %v8398_v17  ;;  %v8437_v17 = vld [vmem:[%s15727_s1 + $0xfb0] sm:$0xf]  ;;  %v5156_v46 = vadd.f32 %v5155_v37, %v5143_v11  ;;  %v8221_v11 = vld [vmem:[%s15727_s1 + $0xe00] sm:$0xf] }
  0xeb   :  { %5420 = vmatpush.bf16.msrb.mxu3 %v8462_v25  ;;  %v8374_v25 = vor.u32 %v10115_v16, %v8373_v12  ;;  %v8438_v62 = vor.u32 %v10131_v19, %v8437_v17  ;;  %v8285_v16 = vld [vmem:[%s15727_s1 + $0xe80] sm:$0xf]  ;;  %v10093_v17 = vld [vmem:[%s15727_s1 + $0xe84] sm:$0xf0] }
  0xec   :  { %5382 = vmatpush.bf16.msrb.mxu0 %v8262_v0  ;;  %v10097_v0 = vld [vmem:[%s15727_s1 + $0xea4] sm:$0xf0]  ;;  %v12101_v55 = vadd.f32 %v5168_v47, %v5156_v46  ;;  %v8349_v19 = vld [vmem:[%s15727_s1 + $0xf00] sm:$0xf]  ;;  %v10187_v46 = vld [vmem:[%s15727_s1 + $0x1174] sm:$0xf0] }
  0xed   :  { %5395 = vmatpush.bf16.msrb.mxu1 %v8326_v41  ;;  %v8365_v41 = vld [vmem:[%s15727_s1 + $0xf20] sm:$0xf]  ;;  %v8302_v56 = vor.u32 %v10097_v0, %v8301_v26  ;;  %v8533_v26 = vld [vmem:[%s15727_s1 + $0x1070] sm:$0xf] }
  0xee   :  { %5408 = vmatpush.bf16.msrb.mxu2 %v8390_v1  ;;  %v10113_v1 = vld [vmem:[%s15727_s1 + $0xf24] sm:$0xf0]  ;;  %v8597_v0 = vld [vmem:[%s15727_s1 + $0x10f0] sm:$0xf] }
  0xef   :  { %5421 = vmatpush.bf16.msrb.mxu3 %v8454_v49  ;;  %v10129_v49 = vld [vmem:[%s15727_s1 + $0xfa4] sm:$0xf0]  ;;  %v8366_v57 = vor.u32 %v10113_v1, %v8365_v41  ;;  %v10171_v41 = vld [vmem:[%s15727_s1 + $0x10f4] sm:$0xf0]  ;;  %v8661_v1 = vld [vmem:[%s15727_s1 + $0x1170] sm:$0xf] }
  0xf0   :  { %5383 = vmatpush.bf16.msrb.mxu0 %v8254_v58  ;;  %v10079_v58 = vld [vmem:[%s15727_s1 + $0xe14] sm:$0xf0]  ;;  %v5157_v47 = vpop.f32.mrf.mxu2  ;;  %v83_v54 = vld.sshfl [vmem:[#allocation1 + $0x20] sm:$0xff pattern:$0x73625140] }
  0xf1   :  { %5396 = vmatpush.bf16.msrb.mxu1 %v8318_v61  ;;  %v10095_v61 = vld [vmem:[%s15727_s1 + $0xe94] sm:$0xf0]  ;;  %v8230_v12 = vor.u32 %v10079_v58, %v8229_v53  ;;  %v5170_v51 = vpop.f32.mrf.mxu3  ;;  %v8222_v53 = vor.u32 %v10077_v14, %v8221_v11  ;;  %v85_v58 = vld.sshfl [vmem:[#allocation1 + $0x30] sm:$0xff pattern:$0x73625140] }
  0xf2   :  { %5409 = vmatpush.bf16.msrb.mxu2 %v8382_v63  ;;  %v8430_v63 = vor.u32 %v10129_v49, %v8429_v48  ;;  %v8725_v48 = vld [vmem:[%s15727_s1 + $0x11f0] sm:$0xf]  ;;  %v10203_v49 = vld [vmem:[%s15727_s1 + $0x11f4] sm:$0xf0]  ;;  %v10153_v11 = vld [vmem:[%s15727_s1 + $0x1064] sm:$0xf0] }
  0xf3   :  { %5422 = vmatpush.bf16.msrb.mxu3 %v8446_v50  ;;  %v10127_v50 = vld [vmem:[%s15727_s1 + $0xf94] sm:$0xf0]  ;;  %v8589_v14 = vld [vmem:[%s15727_s1 + $0x10e0] sm:$0xf]  ;;  %v8645_v47 = vld [vmem:[%s15727_s1 + $0x1150] sm:$0xf] }
  0xf4   :  { %5384 = vmatpush.bf16.msrb.mxu0 %v8246_v20  ;;  %v10109_v20 = vld [vmem:[%s15727_s1 + $0xf04] sm:$0xf0]  ;;  %v8422_v37 = vor.u32 %v10127_v50, %v8421_v6  ;;  %v8598_v6 = vor.u32 %v10171_v41, %v8597_v0  ;;  %v8662_v50 = vor.u32 %v10187_v46, %v8661_v1  ;;  %v8581_v1 = vld [vmem:[%s15727_s1 + $0x10d0] sm:$0xf]  ;;  %v10167_v46 = vld [vmem:[%s15727_s1 + $0x10d4] sm:$0xf0] }
  0xf5   :  { %5397 = vmatpush.bf16.msrb.mxu1 %v8310_v23  ;;  %v8294_v23 = vor.u32 %v10095_v61, %v8293_v60  ;;  %v84_v60 = vld.sshfl [vmem:[#allocation1 + $0x28] sm:$0xff pattern:$0x73625140]  ;;  %v8414_v61 = vor.u32 %v10125_v30, %v8413_v29  ;;  %v12201_v29 = vpack.c.bf16 %v85_v58, %v85_v58  ;;  %v8709_v58 = vld [vmem:[%s15727_s1 + $0x11d0] sm:$0xf] }
  0xf6   :  { %5410 = vmatpush.bf16.msrb.mxu2 %v8374_v25  ;;  %v8358_v25 = vor.u32 %v10111_v5, %v8357_v4  ;;  %v86_v4 = vld.sshfl [vmem:[#allocation1 + $0x38] sm:$0xff pattern:$0x73625140]  ;;  %v8525_v5 = vld [vmem:[%s15727_s1 + $0x1060] sm:$0xf]  ;;  %v12203_v30 = vpack.c.bf16 %v84_v60, %v84_v60 }
  0xf7   :  { %5423 = vmatpush.bf16.msrb.mxu3 %v8438_v62  ;;  %v10155_v62 = vld [vmem:[%s15727_s1 + $0x1074] sm:$0xf0]  ;;  %v12214_v0 = vpack.c.bf16 %v86_v4, %v86_v4  ;;  %v8526_v41 = vor.u32 %v10153_v11, %v8525_v5  ;;  %v8509_v5 = vld [vmem:[%s15727_s1 + $0x1040] sm:$0xf] }
  0xf8   :  { %5385 = vmatpush.bf16.msrb.mxu0 %v8238_v52  ;;  %v28_v52 = vld [vmem:[%s15728_s0 + $0x40] sm:$0xff]  ;;  %v10199_v60 = vld [vmem:[%s15727_s1 + $0x11d4] sm:$0xf0] }
  0xf9   :  { %5398 = vmatpush.bf16.msrb.mxu1 %v8302_v56  ;;  %87 = vst [vmem:[#allocation1] ss:$4 sm:$0xff] %v28_v52  ;;  %v8286_v56 = vor.u32 %v10093_v17, %v8285_v16  ;;  %v30_v16 = vld [vmem:[%s15728_s0 + $0x50] sm:$0xff]  ;;  %v8726_v17 = vor.u32 %v10203_v49, %v8725_v48  ;;  %v10183_v48 = vld [vmem:[%s15727_s1 + $0x1154] sm:$0xf0]  ;;  %v8710_v11 = vor.u32 %v10199_v60, %v8709_v58 }
  0xfa   :  { %5411 = vmatpush.bf16.msrb.mxu2 %v8366_v57  ;;  %v8350_v57 = vor.u32 %v10109_v20, %v8349_v19  ;;  %v12190_v19 = vpack.c.bf16 %v83_v54, %v83_v54  ;;  %v8653_v20 = vld [vmem:[%s15727_s1 + $0x1160] sm:$0xf]  ;;  %v8646_v4 = vor.u32 %v10183_v48, %v8645_v47  ;;  %v8565_v47 = vld [vmem:[%s15727_s1 + $0x10b0] sm:$0xf]  ;;  %v10195_v60 = vld [vmem:[%s15727_s1 + $0x11b4] sm:$0xf0] }
  0xfb   :  { %5424 = vmatpush.bf16.msrb.mxu3 %v8430_v63  ;;  %v8534_v63 = vor.u32 %v10155_v62, %v8533_v26  ;;  %v10201_v26 = vld [vmem:[%s15727_s1 + $0x11e4] sm:$0xf0]  ;;  %v8517_v62 = vld [vmem:[%s15727_s1 + $0x1050] sm:$0xf] }
  0xfc   :  { %5386 = vmatpush.bf16.msrb.mxu0 %v8230_v12  ;;  %v10169_v12 = vld [vmem:[%s15727_s1 + $0x10e4] sm:$0xf0]  ;;  %v8693_v58 = vld [vmem:[%s15727_s1 + $0x11b0] sm:$0xf] }
  0xfd   :  { %5399 = vmatpush.bf16.msrb.mxu1 %v8294_v23  ;;  %v10185_v23 = vld [vmem:[%s15727_s1 + $0x1164] sm:$0xf0]  ;;  %v8590_v49 = vor.u32 %v10169_v12, %v8589_v14  ;;  %v8637_v12 = vld [vmem:[%s15727_s1 + $0x1140] sm:$0xf] }
  0xfe   :  { %5412 = vmatpush.bf16.msrb.mxu2 %v8358_v25  ;;  %v8717_v25 = vld [vmem:[%s15727_s1 + $0x11e0] sm:$0xf]  ;;  %v8654_v51 = vor.u32 %v10185_v23, %v8653_v20  ;;  %v10165_v14 = vld [vmem:[%s15727_s1 + $0x10c4] sm:$0xf0] }
  0xff   :  { %5425 = vmatpush.bf16.msrb.mxu3 %v8422_v37  ;;  %v10151_v37 = vld [vmem:[%s15727_s1 + $0x1054] sm:$0xf0]  ;;  %v8718_v54 = vor.u32 %v10201_v26, %v8717_v25  ;;  %v8701_v20 = vld [vmem:[%s15727_s1 + $0x11c0] sm:$0xf]  ;;  %v10197_v23 = vld [vmem:[%s15727_s1 + $0x11c4] sm:$0xf0] }
 0x100   :  { %5387 = vmatpush.bf16.msrb.mxu0 %v8222_v53  ;;  %v12228_v52 = vld.sshfl [vmem:[#allocation1] sm:$0xff pattern:$0x73625140]  ;;  %v12230_v53 = vld.sshfl [vmem:[#allocation1 + $0x10] sm:$0xff pattern:$0x73625140] }
 0x101   :  { %5400 = vmatpush.bf16.msrb.mxu1 %v8286_v56  ;;  %v12233_v56 = vld.sshfl [vmem:[#allocation1 + $0x8] sm:$0xff pattern:$0x73625140] }
 0x102   :  { %5413 = vmatpush.bf16.msrb.mxu2 %v8350_v57  ;;  %v12235_v57 = vld.sshfl [vmem:[#allocation1 + $0x18] sm:$0xff pattern:$0x73625140] }
 0x103   :  { %5426 = vmatpush.bf16.msrb.mxu3 %v8414_v61  ;;  %5388 = vmatmul.bf16.vlgmr.msrb.gmra.mxu0 %v12190_v19  ;;  %97 = vst [vmem:[#allocation1] ss:$4 sm:$0xff] %v30_v16  ;;  %v8518_v61 = vor.u32 %v10151_v37, %v8517_v62  ;;  %v10181_v16 = vld [vmem:[%s15727_s1 + $0x1144] sm:$0xf0]  ;;  %v5194_v62 = vpop.f32.mrf.mxu1 }
 0x104   :  { %5432 = vmatpush.bf16.msra.mxu0 %v8534_v63  ;;  %5401 = vmatmul.bf16.vlgmr.msrb.gmra.mxu1 %v12203_v30  ;;  %v8582_v63 = vor.u32 %v10167_v46, %v8581_v1  ;;  %v8501_v1 = vld [vmem:[%s15727_s1 + $0x1030] sm:$0xf]  ;;  %v10147_v46 = vld [vmem:[%s15727_s1 + $0x1034] sm:$0xf0] }
 0x105   :  { %5445 = vmatpush.bf16.msra.mxu1 %v8598_v6  ;;  %5414 = vmatmul.bf16.vlgmr.msrb.gmra.mxu2 %v12201_v29  ;;  %v10149_v6 = vld [vmem:[%s15727_s1 + $0x1044] sm:$0xf0] }
 0x106   :  { %5458 = vmatpush.bf16.msra.mxu2 %v8662_v50  ;;  %5427 = vmatmul.bf16.vlgmr.msrb.gmra.mxu3 %v12214_v0  ;;  %v8573_v50 = vld [vmem:[%s15727_s1 + $0x10c0] sm:$0xf]  ;;  %v8510_v26 = vor.u32 %v10149_v6, %v8509_v5  ;;  %v10145_v6 = vld [vmem:[%s15727_s1 + $0x1024] sm:$0xf0] }
 0x107   :  { %5471 = vmatpush.bf16.msra.mxu3 %v8726_v17  ;;  %v5181_v17 = vpop.f32.mrf.mxu0  ;;  %v8574_v37 = vor.u32 %v10165_v14, %v8573_v50  ;;  %v8493_v5 = vld [vmem:[%s15727_s1 + $0x1020] sm:$0xf] }
 0x108   :  { %5433 = vmatpush.bf16.msra.mxu0 %v8526_v41  ;;  %v5182_v25 = vadd.f32 %v5181_v17, %v12101_v55  ;;  %v8638_v41 = vor.u32 %v10181_v16, %v8637_v12  ;;  %v8702_v55 = vor.u32 %v10197_v23, %v8701_v20  ;;  %v8557_v50 = vld [vmem:[%s15727_s1 + $0x10a0] sm:$0xf]  ;;  %v5207_v14 = vpop.f32.mrf.mxu2  ;;  %v10161_v12 = vld [vmem:[%s15727_s1 + $0x10a4] sm:$0xf0] }
 0x109   :  { %5446 = vmatpush.bf16.msra.mxu1 %v8590_v49  ;;  %v10163_v49 = vld [vmem:[%s15727_s1 + $0x10b4] sm:$0xf0]  ;;  %v8621_v16 = vld [vmem:[%s15727_s1 + $0x1120] sm:$0xf]  ;;  %v10177_v17 = vld [vmem:[%s15727_s1 + $0x1124] sm:$0xf0]  ;;  %v5220_v23 = vpop.f32.mrf.mxu3 }
 0x10a   :  { %5459 = vmatpush.bf16.msra.mxu2 %v8654_v51  ;;  %v5195_v48 = vadd.f32 %v5194_v62, %v5182_v25  ;;  %v8629_v51 = vld [vmem:[%s15727_s1 + $0x1130] sm:$0xf]  ;;  %v8685_v25 = vld [vmem:[%s15727_s1 + $0x11a0] sm:$0xf] }
 0x10b   :  { %5472 = vmatpush.bf16.msra.mxu3 %v8718_v54  ;;  %v10179_v54 = vld [vmem:[%s15727_s1 + $0x1134] sm:$0xf0] }
 0x10c   :  { %5434 = vmatpush.bf16.msra.mxu0 %v8518_v61  ;;  %v8502_v61 = vor.u32 %v10147_v46, %v8501_v1  ;;  %v5208_v20 = vadd.f32 %v5207_v14, %v5195_v48  ;;  %v8558_v46 = vor.u32 %v10161_v12, %v8557_v50  ;;  %v10143_v48 = vld [vmem:[%s15727_s1 + $0x1014] sm:$0xf0]  ;;  %v8541_v50 = vld [vmem:[%s15727_s1 + $0x1080] sm:$0xf] }
 0x10d   :  { %5447 = vmatpush.bf16.msra.mxu1 %v8582_v63  ;;  %v8566_v63 = vor.u32 %v10163_v49, %v8565_v47  ;;  %v8622_v47 = vor.u32 %v10177_v17, %v8621_v16  ;;  %v8549_v49 = vld [vmem:[%s15727_s1 + $0x1090] sm:$0xf]  ;;  %v8605_v16 = vld [vmem:[%s15727_s1 + $0x1100] sm:$0xf]  ;;  %v10173_v17 = vld [vmem:[%s15727_s1 + $0x1104] sm:$0xf0] }
 0x10e   :  { %5460 = vmatpush.bf16.msra.mxu2 %v8646_v4  ;;  %v8630_v4 = vor.u32 %v10179_v54, %v8629_v51  ;;  %v12319_v1 = vadd.f32 %v5220_v23, %v5208_v20  ;;  %v10159_v54 = vld [vmem:[%s15727_s1 + $0x1094] sm:$0xf0]  ;;  %v8669_v20 = vld [vmem:[%s15727_s1 + $0x1180] sm:$0xf] }
 0x10f   :  { %5473 = vmatpush.bf16.msra.mxu3 %v8710_v11  ;;  %v8694_v11 = vor.u32 %v10195_v60, %v8693_v58  ;;  %v5183_v62 = vpop.f32.mrf.mxu0  ;;  %v8613_v58 = vld [vmem:[%s15727_s1 + $0x1110] sm:$0xf]  ;;  %v10175_v60 = vld [vmem:[%s15727_s1 + $0x1114] sm:$0xf0]  ;;  %v8550_v14 = vor.u32 %v10159_v54, %v8549_v49 }
 0x110   :  { %5435 = vmatpush.bf16.msra.mxu0 %v8510_v26  ;;  %v10193_v26 = vld [vmem:[%s15727_s1 + $0x11a4] sm:$0xf0]  ;;  %v8614_v12 = vor.u32 %v10175_v60, %v8613_v58  ;;  %v10219_v62 = vld [vmem:[%s15727_s1 + $0x1274] sm:$0xf0]  ;;  %v8917_v49 = vld [vmem:[%s15727_s1 + $0x1370] sm:$0xf]  ;;  %v8606_v58 = vor.u32 %v10173_v17, %v8605_v16 }
 0x111   :  { %5448 = vmatpush.bf16.msra.mxu1 %v8574_v37  ;;  %v8494_v37 = vor.u32 %v10145_v6, %v8493_v5  ;;  %v8686_v51 = vor.u32 %v10193_v26, %v8685_v25  ;;  %v10141_v6 = vld [vmem:[%s15727_s1 + $0x1004] sm:$0xf0]  ;;  %v8789_v26 = vld [vmem:[%s15727_s1 + $0x1270] sm:$0xf]  ;;  %v31_v16 = vld [vmem:[%s15728_s0 + $0x58] sm:$0xff] }
 0x112   :  { %5461 = vmatpush.bf16.msra.mxu2 %v8638_v41  ;;  %v5196_v41 = vpop.f32.mrf.mxu1  ;;  %v10189_v25 = vld [vmem:[%s15727_s1 + $0x1184] sm:$0xf0]  ;;  %v8981_v60 = vld [vmem:[%s15727_s1 + $0x13f0] sm:$0xf] }
 0x113   :  { %5474 = vmatpush.bf16.msra.mxu3 %v8702_v55  ;;  %v8485_v55 = vld [vmem:[%s15727_s1 + $0x1010] sm:$0xf] }
 0x114   :  { %5436 = vmatpush.bf16.msra.mxu0 %v8502_v61  ;;  %v8677_v61 = vld [vmem:[%s15727_s1 + $0x1190] sm:$0xf]  ;;  %v8486_v5 = vor.u32 %v10143_v48, %v8485_v55  ;;  %v29_v55 = vld [vmem:[%s15728_s0 + $0x48] sm:$0xff] }
 0x115   :  { %5449 = vmatpush.bf16.msra.mxu1 %v8566_v63  ;;  %v10191_v63 = vld [vmem:[%s15727_s1 + $0x1194] sm:$0xf0]  ;;  %v8853_v41 = vld [vmem:[%s15727_s1 + $0x12f0] sm:$0xf]  ;;  %88 = vst [vmem:[#allocation1 + $0x20] ss:$4 sm:$0xff] %v29_v55 }
 0x116   :  { %5462 = vmatpush.bf16.msra.mxu2 %v8630_v4  ;;  %v8477_v4 = vld [vmem:[%s15727_s1 + $0x1000] sm:$0xf]  ;;  %v8678_v23 = vor.u32 %v10191_v63, %v8677_v61  ;;  %v10267_v61 = vld [vmem:[%s15727_s1 + $0x13f4] sm:$0xf0]  ;;  %v8670_v63 = vor.u32 %v10189_v25, %v8669_v20  ;;  %v12413_v20 = vpack.c.bf16 %v12228_v52, %v12228_v52  ;;  %v10249_v25 = vld [vmem:[%s15727_s1 + $0x1364] sm:$0xf0]  ;;  %v12430_v52 = vpack.c.bf16 %v12233_v56, %v12233_v56 }
 0x117   :  { %5475 = vmatpush.bf16.msra.mxu3 %v8694_v11  ;;  %v10157_v11 = vld [vmem:[%s15727_s1 + $0x1084] sm:$0xf0]  ;;  %v8478_v48 = vor.u32 %v10141_v6, %v8477_v4  ;;  %v8790_v4 = vor.u32 %v10219_v62, %v8789_v26  ;;  %v8982_v17 = vor.u32 %v10267_v61, %v8981_v60  ;;  %v8973_v26 = vld [vmem:[%s15727_s1 + $0x13e0] sm:$0xf]  ;;  %v12426_v62 = vpack.c.bf16 %v12230_v53, %v12230_v53  ;;  %v10231_v55 = vld [vmem:[%s15727_s1 + $0x12d4] sm:$0xf0] }
 0x118   :  { %5437 = vmatpush.bf16.msra.mxu0 %v8494_v37  ;;  %v5209_v37 = vpop.f32.mrf.mxu2  ;;  %v8542_v54 = vor.u32 %v10157_v11, %v8541_v50  ;;  %v10217_v50 = vld [vmem:[%s15727_s1 + $0x1264] sm:$0xf0]  ;;  %v8845_v11 = vld [vmem:[%s15727_s1 + $0x12e0] sm:$0xf]  ;;  %v12443_v53 = vpack.c.bf16 %v12235_v57, %v12235_v57 }
 0x119   :  { %5450 = vmatpush.bf16.msra.mxu1 %v8558_v46  ;;  %v10235_v46 = vld [vmem:[%s15727_s1 + $0x12f4] sm:$0xf0]  ;;  %15745 = vst [vmem:[#allocation2_spill] sm:$0xff] %v12426_v62  ;;  %v10265_v37 = vld [vmem:[%s15727_s1 + $0x13e4] sm:$0xf0] }
 0x11a   :  { %5463 = vmatpush.bf16.msra.mxu2 %v8622_v47  ;;  %v5222_v47 = vpop.f32.mrf.mxu3  ;;  %v8854_v6 = vor.u32 %v10235_v46, %v8853_v41  ;;  %v8773_v41 = vld [vmem:[%s15727_s1 + $0x1250] sm:$0xf]  ;;  %v10215_v46 = vld [vmem:[%s15727_s1 + $0x1254] sm:$0xf0]  ;;  %15746 = vst [vmem:[#allocation3_spill] sm:$0xff] %v12443_v53  ;;  %v8974_v60 = vor.u32 %v10265_v37, %v8973_v26 }
 0x11b   :  { %5476 = vmatpush.bf16.msra.mxu3 %v8686_v51  ;;  %v10251_v51 = vld [vmem:[%s15727_s1 + $0x1374] sm:$0xf0]  ;;  %v8837_v47 = vld [vmem:[%s15727_s1 + $0x12d0] sm:$0xf]  ;;  %v10245_v26 = vld [vmem:[%s15727_s1 + $0x1344] sm:$0xf0] }
 0x11c   :  { %5438 = vmatpush.bf16.msra.mxu0 %v8486_v5  ;;  %v8781_v5 = vld [vmem:[%s15727_s1 + $0x1260] sm:$0xf]  ;;  %v12462_v61 = vld.sshfl [vmem:[#allocation1 + $0x28] sm:$0xff pattern:$0x73625140] }
 0x11d   :  { %5451 = vmatpush.bf16.msra.mxu1 %v8550_v14  ;;  %v8918_v14 = vor.u32 %v10251_v51, %v8917_v49  ;;  %v8782_v56 = vor.u32 %v10217_v50, %v8781_v5  ;;  %v10247_v49 = vld [vmem:[%s15727_s1 + $0x1354] sm:$0xf0] }
 0x11e   :  { %5464 = vmatpush.bf16.msra.mxu2 %v8614_v12  ;;  %v10233_v12 = vld [vmem:[%s15727_s1 + $0x12e4] sm:$0xf0]  ;;  %v10263_v5 = vld [vmem:[%s15727_s1 + $0x13d4] sm:$0xf0] }
 0x11f   :  { %5477 = vmatpush.bf16.msra.mxu3 %v8678_v23  ;;  %v8909_v23 = vld [vmem:[%s15727_s1 + $0x1360] sm:$0xf]  ;;  %v8846_v57 = vor.u32 %v10233_v12, %v8845_v11  ;;  %v10213_v12 = vld [vmem:[%s15727_s1 + $0x1244] sm:$0xf0] }
 0x120   :  { %5439 = vmatpush.bf16.msra.mxu0 %v8478_v48  ;;  %v8901_v48 = vld [vmem:[%s15727_s1 + $0x1350] sm:$0xf]  ;;  %v8910_v51 = vor.u32 %v10249_v25, %v8909_v23  ;;  %v8765_v11 = vld [vmem:[%s15727_s1 + $0x1240] sm:$0xf]  ;;  %v10229_v23 = vld [vmem:[%s15727_s1 + $0x12c4] sm:$0xf0]  ;;  %v5233_v37 = vpop.f32.mrf.mxu0 }
 0x121   :  { %5452 = vmatpush.bf16.msra.mxu1 %v8542_v54  ;;  %v12457_v54 = vld.sshfl [vmem:[#allocation1 + $0x20] sm:$0xff pattern:$0x73625140]  ;;  %v8902_v50 = vor.u32 %v10247_v49, %v8901_v48 }
 0x122   :  { %5465 = vmatpush.bf16.msra.mxu2 %v8606_v58  ;;  %v12459_v58 = vld.sshfl [vmem:[#allocation1 + $0x30] sm:$0xff pattern:$0x73625140]  ;;  %v8893_v25 = vld [vmem:[%s15727_s1 + $0x1340] sm:$0xf] }
 0x123   :  { %5478 = vmatpush.bf16.msra.mxu3 %v8670_v63  ;;  %5440 = vmatmul.bf16.vlgmr.msra.gmra.mxu0 %v12413_v20  ;;  %v12464_v63 = vld.sshfl [vmem:[#allocation1 + $0x38] sm:$0xff pattern:$0x73625140]  ;;  %v8894_v49 = vor.u32 %v10245_v26, %v8893_v25  ;;  %v10209_v25 = vld [vmem:[%s15727_s1 + $0x1224] sm:$0xf0] }
 0x124   :  { %5484 = vmatpush.bf16.msrb.mxu0 %v8790_v4  ;;  %5453 = vmatmul.bf16.vlgmr.msra.gmra.mxu1 %v12430_v52  ;;  %v8965_v4 = vld [vmem:[%s15727_s1 + $0x13d0] sm:$0xf]  ;;  %98 = vst [vmem:[#allocation1 + $0x20] ss:$4 sm:$0xff] %v31_v16  ;;  %v8829_v16 = vld [vmem:[%s15727_s1 + $0x12c0] sm:$0xf] }
 0x125   :  { %5497 = vmatpush.bf16.msrb.mxu1 %v8854_v6  ;;  %5466 = vmatmul.bf16.vlgmr.msra.gmra.mxu2 %v12426_v62  ;;  %v8774_v6 = vor.u32 %v10215_v46, %v8773_v41  ;;  %v8957_v41 = vld [vmem:[%s15727_s1 + $0x13c0] sm:$0xf]  ;;  %v10261_v46 = vld [vmem:[%s15727_s1 + $0x13c4] sm:$0xf0]  ;;  %v8830_v48 = vor.u32 %v10229_v23, %v8829_v16 }
 0x126   :  { %5510 = vmatpush.bf16.msrb.mxu2 %v8918_v14  ;;  %5479 = vmatmul.bf16.vlgmr.msra.gmra.mxu3 %v12443_v53  ;;  %v8838_v14 = vor.u32 %v10231_v55, %v8837_v47  ;;  %v8766_v47 = vor.u32 %v10213_v12, %v8765_v11  ;;  %v5246_v55 = vpop.f32.mrf.mxu1  ;;  %v10259_v11 = vld [vmem:[%s15727_s1 + $0x13b4] sm:$0xf0]  ;;  %v8749_v23 = vld [vmem:[%s15727_s1 + $0x1220] sm:$0xf] }
 0x127   :  { %5523 = vmatpush.bf16.msrb.mxu3 %v8982_v17  ;;  %v8966_v17 = vor.u32 %v10263_v5, %v8965_v4  ;;  %v10227_v5 = vld [vmem:[%s15727_s1 + $0x12b4] sm:$0xf0]  ;;  %v8813_v26 = vld [vmem:[%s15727_s1 + $0x12a0] sm:$0xf] }
 0x128   :  { %5485 = vmatpush.bf16.msrb.mxu0 %v8782_v56  ;;  %v5234_v56 = vadd.f32 %v5233_v37, %v12319_v1  ;;  %v8958_v1 = vor.u32 %v10261_v46, %v8957_v41  ;;  %v5259_v41 = vpop.f32.mrf.mxu2  ;;  %v10225_v46 = vld [vmem:[%s15727_s1 + $0x12a4] sm:$0xf0]  ;;  %v10311_v53 = vld [vmem:[%s15727_s1 + $0x1554] sm:$0xf0]  ;;  %v9549_v62 = vld [vmem:[%s15727_s1 + $0x1860] sm:$0xf] }
 0x129   :  { %5498 = vmatpush.bf16.msrb.mxu1 %v8846_v57  ;;  %v8757_v57 = vld [vmem:[%s15727_s1 + $0x1230] sm:$0xf] }
 0x12a   :  { %5511 = vmatpush.bf16.msrb.mxu2 %v8910_v51  ;;  %v10211_v51 = vld [vmem:[%s15727_s1 + $0x1234] sm:$0xf0]  ;;  %v5247_v4 = vadd.f32 %v5246_v55, %v5234_v56  ;;  %v8877_v56 = vld [vmem:[%s15727_s1 + $0x1320] sm:$0xf] }
 0x12b   :  { %5524 = vmatpush.bf16.msrb.mxu3 %v8974_v60  ;;  %v8821_v60 = vld [vmem:[%s15727_s1 + $0x12b0] sm:$0xf]  ;;  %v8758_v12 = vor.u32 %v10211_v51, %v8757_v57  ;;  %v10257_v57 = vld [vmem:[%s15727_s1 + $0x13a4] sm:$0xf0]  ;;  %v5235_v51 = vpop.f32.mrf.mxu0 }
 0x12c   :  { %5486 = vmatpush.bf16.msrb.mxu0 %v8774_v6  ;;  %v8885_v6 = vld [vmem:[%s15727_s1 + $0x1330] sm:$0xf]  ;;  %v8822_v16 = vor.u32 %v10227_v5, %v8821_v60  ;;  %v5260_v55 = vadd.f32 %v5259_v41, %v5247_v4  ;;  %v8750_v60 = vor.u32 %v10209_v25, %v8749_v23  ;;  %v10239_v23 = vld [vmem:[%s15727_s1 + $0x1314] sm:$0xf0]  ;;  %v8733_v41 = vld [vmem:[%s15727_s1 + $0x1200] sm:$0xf] }
 0x12d   :  { %5499 = vmatpush.bf16.msrb.mxu1 %v8838_v14  ;;  %v10243_v14 = vld [vmem:[%s15727_s1 + $0x1334] sm:$0xf0]  ;;  %v8741_v4 = vld [vmem:[%s15727_s1 + $0x1210] sm:$0xf]  ;;  %v10237_v51 = vld [vmem:[%s15727_s1 + $0x1304] sm:$0xf0] }
 0x12e   :  { %5512 = vmatpush.bf16.msrb.mxu2 %v8902_v50  ;;  %v8949_v50 = vld [vmem:[%s15727_s1 + $0x13b0] sm:$0xf] }
 0x12f   :  { %5525 = vmatpush.bf16.msrb.mxu3 %v8966_v17  ;;  %v8886_v17 = vor.u32 %v10243_v14, %v8885_v6  ;;  %v8950_v37 = vor.u32 %v10259_v11, %v8949_v50  ;;  %v8814_v6 = vor.u32 %v10225_v46, %v8813_v26  ;;  %v10207_v50 = vld [vmem:[%s15727_s1 + $0x1214] sm:$0xf0]  ;;  %v8805_v11 = vld [vmem:[%s15727_s1 + $0x1290] sm:$0xf]  ;;  %v10205_v46 = vld [vmem:[%s15727_s1 + $0x1204] sm:$0xf0] }
 0x130   :  { %5487 = vmatpush.bf16.msrb.mxu0 %v8766_v47  ;;  %v10241_v47 = vld [vmem:[%s15727_s1 + $0x1324] sm:$0xf0]  ;;  %v8933_v25 = vld [vmem:[%s15727_s1 + $0x1390] sm:$0xf]  ;;  %v10255_v26 = vld [vmem:[%s15727_s1 + $0x1394] sm:$0xf0] }
 0x131   :  { %5500 = vmatpush.bf16.msrb.mxu1 %v8830_v48  ;;  %v5272_v48 = vpop.f32.mrf.mxu3  ;;  %v8878_v14 = vor.u32 %v10241_v47, %v8877_v56 }
 0x132   :  { %5513 = vmatpush.bf16.msrb.mxu2 %v8894_v49  ;;  %v8941_v49 = vld [vmem:[%s15727_s1 + $0x13a0] sm:$0xf]  ;;  %v12548_v5 = vadd.f32 %v5272_v48, %v5260_v55  ;;  %v10221_v48 = vld [vmem:[%s15727_s1 + $0x1284] sm:$0xf0] }
 0x133   :  { %5526 = vmatpush.bf16.msrb.mxu3 %v8958_v1  ;;  %v5248_v1 = vpop.f32.mrf.mxu1  ;;  %v8797_v55 = vld [vmem:[%s15727_s1 + $0x1280] sm:$0xf] }
 0x134   :  { %5488 = vmatpush.bf16.msrb.mxu0 %v8758_v12  ;;  %v8942_v12 = vor.u32 %v10257_v57, %v8941_v49  ;;  %v8861_v49 = vld [vmem:[%s15727_s1 + $0x1300] sm:$0xf]  ;;  %v8934_v57 = vor.u32 %v10255_v26, %v8933_v25  ;;  %v10253_v1 = vld [vmem:[%s15727_s1 + $0x1384] sm:$0xf0]  ;;  %v8798_v25 = vor.u32 %v10221_v48, %v8797_v55 }
 0x135   :  { %5501 = vmatpush.bf16.msrb.mxu1 %v8822_v16  ;;  %v10223_v16 = vld [vmem:[%s15727_s1 + $0x1294] sm:$0xf0]  ;;  %v8862_v26 = vor.u32 %v10237_v51, %v8861_v49  ;;  %v10281_v48 = vld [vmem:[%s15727_s1 + $0x1464] sm:$0xf0]  ;;  %v9101_v49 = vld [vmem:[%s15727_s1 + $0x14e0] sm:$0xf] }
 0x136   :  { %5514 = vmatpush.bf16.msrb.mxu2 %v8886_v17  ;;  %v8869_v17 = vld [vmem:[%s15727_s1 + $0x1310] sm:$0xf]  ;;  %v8806_v56 = vor.u32 %v10223_v16, %v8805_v11  ;;  %v10299_v16 = vld [vmem:[%s15727_s1 + $0x14f4] sm:$0xf0] }
 0x137   :  { %5527 = vmatpush.bf16.msrb.mxu3 %v8950_v37  ;;  %v8742_v37 = vor.u32 %v10207_v50, %v8741_v4  ;;  %v8870_v47 = vor.u32 %v10239_v23, %v8869_v17  ;;  %v10283_v4 = vld [vmem:[%s15727_s1 + $0x1474] sm:$0xf0]  ;;  %v9109_v50 = vld [vmem:[%s15727_s1 + $0x14f0] sm:$0xf] }
 0x138   :  { %5489 = vmatpush.bf16.msrb.mxu0 %v8750_v60  ;;  %v8925_v60 = vld [vmem:[%s15727_s1 + $0x1380] sm:$0xf]  ;;  %v9173_v17 = vld [vmem:[%s15727_s1 + $0x1570] sm:$0xf]  ;;  %v10315_v23 = vld [vmem:[%s15727_s1 + $0x1574] sm:$0xf0] }
 0x139   :  { %5502 = vmatpush.bf16.msrb.mxu1 %v8814_v6  ;;  %v5261_v6 = vpop.f32.mrf.mxu2  ;;  %v5274_v11 = vpop.f32.mrf.mxu3  ;;  %v9174_v55 = vor.u32 %v10315_v23, %v9173_v17  ;;  %v10279_v17 = vld [vmem:[%s15727_s1 + $0x1454] sm:$0xf0]  ;;  %v9093_v23 = vld [vmem:[%s15727_s1 + $0x14d0] sm:$0xf] }
 0x13a   :  { %5515 = vmatpush.bf16.msrb.mxu2 %v8878_v14  ;;  %v9045_v14 = vld [vmem:[%s15727_s1 + $0x1470] sm:$0xf]  ;;  %v9037_v11 = vld [vmem:[%s15727_s1 + $0x1460] sm:$0xf] }
 0x13b   :  { %5528 = vmatpush.bf16.msrb.mxu3 %v8942_v12  ;;  %v8734_v12 = vor.u32 %v10205_v46, %v8733_v41  ;;  %v10331_v41 = vld [vmem:[%s15727_s1 + $0x15f4] sm:$0xf0]  ;;  %v8926_v46 = vor.u32 %v10253_v1, %v8925_v60  ;;  %v9046_v6 = vor.u32 %v10283_v4, %v9045_v14  ;;  %v12639_v60 = vpack.c.bf16 %v12457_v54, %v12457_v54  ;;  %v9165_v1 = vld [vmem:[%s15727_s1 + $0x1560] sm:$0xf]  ;;  %v10313_v14 = vld [vmem:[%s15727_s1 + $0x1564] sm:$0xf0] }
 0x13c   :  { %5490 = vmatpush.bf16.msrb.mxu0 %v8742_v37  ;;  %v9237_v37 = vld [vmem:[%s15727_s1 + $0x15f0] sm:$0xf]  ;;  %v9229_v4 = vld [vmem:[%s15727_s1 + $0x15e0] sm:$0xf]  ;;  %v12656_v54 = vpack.c.bf16 %v12462_v61, %v12462_v61  ;;  %v9038_v61 = vor.u32 %v10281_v48, %v9037_v11 }
 0x13d   :  { %5503 = vmatpush.bf16.msrb.mxu1 %v8806_v56  ;;  %v32_v56 = vld [vmem:[%s15728_s0 + $0x60] sm:$0xf]  ;;  %v9238_v51 = vor.u32 %v10331_v41, %v9237_v37  ;;  %15747 = vst [vmem:[#allocation4_spill] sm:$0xff] %v12639_v60  ;;  %v12679_v37 = vld.sshfl [vmem:[#allocation1 + $0x10] sm:$0xff pattern:$0x73625140] }
 0x13e   :  { %5516 = vmatpush.bf16.msrb.mxu2 %v8870_v47  ;;  %v9110_v47 = vor.u32 %v10299_v16, %v9109_v50  ;;  %v12652_v50 = vpack.c.bf16 %v12459_v58, %v12459_v58  ;;  %15749 = vst [vmem:[#allocation6_spill] sm:$0xff] %v12656_v54  ;;  %v9029_v16 = vld [vmem:[%s15727_s1 + $0x1450] sm:$0xf]  ;;  %v12669_v58 = vpack.c.bf16 %v12464_v63, %v12464_v63  ;;  %v12683_v63 = vld.sshfl [vmem:[#allocation1 + $0x18] sm:$0xff pattern:$0x73625140] }
 0x13f   :  { %5529 = vmatpush.bf16.msrb.mxu3 %v8934_v57  ;;  %v10297_v57 = vld [vmem:[%s15727_s1 + $0x14e4] sm:$0xf0]  ;;  %v9157_v48 = vld [vmem:[%s15727_s1 + $0x1550] sm:$0xf] }
 0x140   :  { %5491 = vmatpush.bf16.msrb.mxu0 %v8734_v12  ;;  %15748 = vst [vmem:[#allocation5_spill] sm:$0xff] %v12652_v50  ;;  %v10329_v12 = vld [vmem:[%s15727_s1 + $0x15e4] sm:$0xf0]  ;;  %v9102_v41 = vor.u32 %v10297_v57, %v9101_v49  ;;  %v9030_v49 = vor.u32 %v10279_v17, %v9029_v16  ;;  %v5285_v17 = vpop.f32.mrf.mxu0 }
 0x141   :  { %5504 = vmatpush.bf16.msrb.mxu1 %v8798_v25  ;;  %15750 = vst [vmem:[#allocation7_spill] sm:$0xff] %v12669_v58  ;;  %v10295_v25 = vld [vmem:[%s15727_s1 + $0x14d4] sm:$0xf0]  ;;  %v9230_v11 = vor.u32 %v10329_v12, %v9229_v4  ;;  %v10293_v12 = vld [vmem:[%s15727_s1 + $0x14c4] sm:$0xf0] }
 0x142   :  { %5517 = vmatpush.bf16.msrb.mxu2 %v8862_v26  ;;  %v12677_v26 = vld.sshfl [vmem:[#allocation1] sm:$0xff pattern:$0x73625140]  ;;  %v9094_v57 = vor.u32 %v10295_v25, %v9093_v23  ;;  %v10309_v16 = vld [vmem:[%s15727_s1 + $0x1544] sm:$0xf0]  ;;  %v5286_v25 = vadd.f32 %v5285_v17, %v12548_v5 }
 0x143   :  { %5530 = vmatpush.bf16.msrb.mxu3 %v8926_v46  ;;  %v9166_v46 = vor.u32 %v10313_v14, %v9165_v1  ;;  %5492 = vmatmul.bf16.vlgmr.msrb.gmra.mxu0 %v12639_v60  ;;  %v10277_v1 = vld [vmem:[%s15727_s1 + $0x1444] sm:$0xf0]  ;;  %v9085_v14 = vld [vmem:[%s15727_s1 + $0x14c0] sm:$0xf] }
 0x144   :  { %5536 = vmatpush.bf16.msra.mxu0 %v9046_v6  ;;  %v12681_v6 = vld.sshfl [vmem:[#allocation1 + $0x8] sm:$0xff pattern:$0x73625140]  ;;  %5505 = vmatmul.bf16.vlgmr.msrb.gmra.mxu1 %v12656_v54  ;;  %v9005_v17 = vld [vmem:[%s15727_s1 + $0x1420] sm:$0xf] }
 0x145   :  { %5549 = vmatpush.bf16.msra.mxu1 %v9110_v47  ;;  %107 = vst [vmem:[#allocation1] ss:$4 sm:$0xff] %v32_v56  ;;  %5518 = vmatmul.bf16.vlgmr.msrb.gmra.mxu2 %v12652_v50  ;;  %v9221_v47 = vld [vmem:[%s15727_s1 + $0x15d0] sm:$0xf]  ;;  %v9158_v56 = vor.u32 %v10311_v53, %v9157_v48  ;;  %v9149_v53 = vld [vmem:[%s15727_s1 + $0x1540] sm:$0xf] }
 0x146   :  { %5562 = vmatpush.bf16.msra.mxu2 %v9174_v55  ;;  %v10327_v55 = vld [vmem:[%s15727_s1 + $0x15d4] sm:$0xf0]  ;;  %5531 = vmatmul.bf16.vlgmr.msrb.gmra.mxu3 %v12669_v58  ;;  %v10325_v23 = vld [vmem:[%s15727_s1 + $0x15c4] sm:$0xf0]  ;;  %v9150_v48 = vor.u32 %v10309_v16, %v9149_v53 }
 0x147   :  { %5575 = vmatpush.bf16.msra.mxu3 %v9238_v51  ;;  %v9021_v51 = vld [vmem:[%s15727_s1 + $0x1440] sm:$0xf]  ;;  %v9222_v4 = vor.u32 %v10327_v55, %v9221_v47  ;;  %v9013_v47 = vld [vmem:[%s15727_s1 + $0x1430] sm:$0xf]  ;;  %v10275_v55 = vld [vmem:[%s15727_s1 + $0x1434] sm:$0xf0] }
 0x148   :  { %5537 = vmatpush.bf16.msra.mxu0 %v9038_v61  ;;  %v9213_v61 = vld [vmem:[%s15727_s1 + $0x15c0] sm:$0xf] }
 0x149   :  { %5550 = vmatpush.bf16.msra.mxu1 %v9102_v41  ;;  %v9022_v41 = vor.u32 %v10277_v1, %v9021_v51  ;;  %v9214_v5 = vor.u32 %v10325_v23, %v9213_v61  ;;  %v10307_v1 = vld [vmem:[%s15727_s1 + $0x1534] sm:$0xf0]  ;;  %v10273_v61 = vld [vmem:[%s15727_s1 + $0x1424] sm:$0xf0]  ;;  %v9069_v23 = vld [vmem:[%s15727_s1 + $0x14a0] sm:$0xf] }
 0x14a   :  { %5563 = vmatpush.bf16.msra.mxu2 %v9166_v46  ;;  %v5298_v46 = vpop.f32.mrf.mxu1 }
 0x14b   :  { %5576 = vmatpush.bf16.msra.mxu3 %v9230_v11  ;;  %v9086_v11 = vor.u32 %v10293_v12, %v9085_v14  ;;  %v5299_v51 = vadd.f32 %v5298_v46, %v5286_v25  ;;  %v9205_v14 = vld [vmem:[%s15727_s1 + $0x15b0] sm:$0xf]  ;;  %v9014_v12 = vor.u32 %v10275_v55, %v9013_v47  ;;  %v10289_v46 = vld [vmem:[%s15727_s1 + $0x14a4] sm:$0xf0]  ;;  %v5324_v55 = vpop.f32.mrf.mxu3 }
 0x14c   :  { %5538 = vmatpush.bf16.msra.mxu0 %v9030_v49  ;;  %v9077_v49 = vld [vmem:[%s15727_s1 + $0x14b0] sm:$0xf] }
 0x14d   :  { %5551 = vmatpush.bf16.msra.mxu1 %v9094_v57  ;;  %v10291_v57 = vld [vmem:[%s15727_s1 + $0x14b4] sm:$0xf0] }
 0x14e   :  { %5564 = vmatpush.bf16.msra.mxu2 %v9158_v56  ;;  %v9141_v56 = vld [vmem:[%s15727_s1 + $0x1530] sm:$0xf]  ;;  %v9078_v53 = vor.u32 %v10291_v57, %v9077_v49  ;;  %v9197_v49 = vld [vmem:[%s15727_s1 + $0x15a0] sm:$0xf]  ;;  %v5287_v57 = vpop.f32.mrf.mxu0 }
 0x14f   :  { %5577 = vmatpush.bf16.msra.mxu3 %v9222_v4  ;;  %v10323_v4 = vld [vmem:[%s15727_s1 + $0x15b4] sm:$0xf0]  ;;  %v9142_v16 = vor.u32 %v10307_v1, %v9141_v56  ;;  %v9006_v56 = vor.u32 %v10273_v61, %v9005_v17  ;;  %v9117_v57 = vld [vmem:[%s15727_s1 + $0x1500] sm:$0xf] }
 0x150   :  { %5539 = vmatpush.bf16.msra.mxu0 %v9022_v41  ;;  %v9206_v25 = vor.u32 %v10323_v4, %v9205_v14  ;;  %v5311_v41 = vpop.f32.mrf.mxu2  ;;  %v9070_v4 = vor.u32 %v10289_v46, %v9069_v23  ;;  %v10303_v61 = vld [vmem:[%s15727_s1 + $0x1514] sm:$0xf0]  ;;  %v9189_v23 = vld [vmem:[%s15727_s1 + $0x1590] sm:$0xf] }
 0x151   :  { %5552 = vmatpush.bf16.msra.mxu1 %v9086_v11  ;;  %v9133_v11 = vld [vmem:[%s15727_s1 + $0x1520] sm:$0xf]  ;;  %v5312_v47 = vadd.f32 %v5311_v41, %v5299_v51  ;;  %v8997_v51 = vld [vmem:[%s15727_s1 + $0x1410] sm:$0xf]  ;;  %v10271_v41 = vld [vmem:[%s15727_s1 + $0x1414] sm:$0xf0] }
 0x152   :  { %5565 = vmatpush.bf16.msra.mxu2 %v9150_v48  ;;  %v10305_v48 = vld [vmem:[%s15727_s1 + $0x1524] sm:$0xf0]  ;;  %v5300_v1 = vpop.f32.mrf.mxu1  ;;  %v8998_v46 = vor.u32 %v10271_v41, %v8997_v51  ;;  %v9301_v41 = vld [vmem:[%s15727_s1 + $0x1670] sm:$0xf] }
 0x153   :  { %5578 = vmatpush.bf16.msra.mxu3 %v9214_v5  ;;  %v10321_v5 = vld [vmem:[%s15727_s1 + $0x15a4] sm:$0xf0]  ;;  %v12774_v14 = vadd.f32 %v5324_v55, %v5312_v47  ;;  %v9134_v58 = vor.u32 %v10305_v48, %v9133_v11  ;;  %v8989_v11 = vld [vmem:[%s15727_s1 + $0x1400] sm:$0xf] }
 0x154   :  { %5540 = vmatpush.bf16.msra.mxu0 %v9014_v12  ;;  %v9061_v12 = vld [vmem:[%s15727_s1 + $0x1490] sm:$0xf]  ;;  %v9198_v17 = vor.u32 %v10321_v5, %v9197_v49  ;;  %v10269_v48 = vld [vmem:[%s15727_s1 + $0x1404] sm:$0xf0]  ;;  %v9053_v49 = vld [vmem:[%s15727_s1 + $0x1480] sm:$0xf] }
 0x155   :  { %5553 = vmatpush.bf16.msra.mxu1 %v9078_v53  ;;  %v10287_v53 = vld [vmem:[%s15727_s1 + $0x1494] sm:$0xf0]  ;;  %v10285_v5 = vld [vmem:[%s15727_s1 + $0x1484] sm:$0xf0]  ;;  %v9181_v1 = vld [vmem:[%s15727_s1 + $0x1580] sm:$0xf] }
 0x156   :  { %5566 = vmatpush.bf16.msra.mxu2 %v9142_v16  ;;  %v9125_v16 = vld [vmem:[%s15727_s1 + $0x1510] sm:$0xf]  ;;  %v9062_v47 = vor.u32 %v10287_v53, %v9061_v12  ;;  %v10347_v12 = vld [vmem:[%s15727_s1 + $0x1674] sm:$0xf0]  ;;  %v5326_v53 = vpop.f32.mrf.mxu3 }
 0x157   :  { %5579 = vmatpush.bf16.msra.mxu3 %v9206_v25  ;;  %v10319_v25 = vld [vmem:[%s15727_s1 + $0x1594] sm:$0xf0]  ;;  %v9126_v55 = vor.u32 %v10303_v61, %v9125_v16  ;;  %v8990_v16 = vor.u32 %v10269_v48, %v8989_v11  ;;  %v9302_v53 = vor.u32 %v10347_v12, %v9301_v41  ;;  %v9485_v41 = vld [vmem:[%s15727_s1 + $0x17e0] sm:$0xf]  ;;  %v10393_v12 = vld [vmem:[%s15727_s1 + $0x17e4] sm:$0xf0] }
 0x158   :  { %5541 = vmatpush.bf16.msra.mxu0 %v9006_v56  ;;  %v9190_v56 = vor.u32 %v10319_v25, %v9189_v23  ;;  %v5313_v51 = vpop.f32.mrf.mxu2  ;;  %v10363_v61 = vld [vmem:[%s15727_s1 + $0x16f4] sm:$0xf0]  ;;  %v9429_v23 = vld [vmem:[%s15727_s1 + $0x1770] sm:$0xf] }
 0x159   :  { %5554 = vmatpush.bf16.msra.mxu1 %v9070_v4  ;;  %v10317_v4 = vld [vmem:[%s15727_s1 + $0x1584] sm:$0xf0]  ;;  %v10379_v25 = vld [vmem:[%s15727_s1 + $0x1774] sm:$0xf0]  ;;  %v9054_v51 = vor.u32 %v10285_v5, %v9053_v49  ;;  %v9357_v49 = vld [vmem:[%s15727_s1 + $0x16e0] sm:$0xf] }
 0x15a   :  { %5567 = vmatpush.bf16.msra.mxu2 %v9134_v58  ;;  %v10301_v58 = vld [vmem:[%s15727_s1 + $0x1504] sm:$0xf0]  ;;  %v10395_v11 = vld [vmem:[%s15727_s1 + $0x17f4] sm:$0xf0]  ;;  %v9182_v48 = vor.u32 %v10317_v4, %v9181_v1  ;;  %v9430_v60 = vor.u32 %v10379_v25, %v9429_v23  ;;  %v12872_v4 = vpack.c.bf16 %v12679_v37, %v12679_v37  ;;  %v9349_v23 = vld [vmem:[%s15727_s1 + $0x16d0] sm:$0xf] }
 0x15b   :  { %5580 = vmatpush.bf16.msra.mxu3 %v9198_v17  ;;  %v9365_v17 = vld [vmem:[%s15727_s1 + $0x16f0] sm:$0xf]  ;;  %v9118_v50 = vor.u32 %v10301_v58, %v9117_v57  ;;  %v12859_v57 = vpack.c.bf16 %v12677_v26, %v12677_v26  ;;  %v9421_v58 = vld [vmem:[%s15727_s1 + $0x1760] sm:$0xf]  ;;  %v10377_v1 = vld [vmem:[%s15727_s1 + $0x1764] sm:$0xf0]  ;;  %v12876_v26 = vpack.c.bf16 %v12681_v6, %v12681_v6 }
 0x15c   :  { %5542 = vmatpush.bf16.msra.mxu0 %v8998_v46  ;;  %v9493_v46 = vld [vmem:[%s15727_s1 + $0x17f0] sm:$0xf]  ;;  %v9366_v54 = vor.u32 %v10363_v61, %v9365_v17  ;;  %15752 = vst [vmem:[#allocation9_spill] sm:$0xff] %v12872_v4  ;;  %v9422_v6 = vor.u32 %v10377_v1, %v9421_v58  ;;  %v10343_v61 = vld [vmem:[%s15727_s1 + $0x1654] sm:$0xf0] }
 0x15d   :  { %5555 = vmatpush.bf16.msra.mxu1 %v9062_v47  ;;  %v9293_v47 = vld [vmem:[%s15727_s1 + $0x1660] sm:$0xf]  ;;  %v9494_v5 = vor.u32 %v10395_v11, %v9493_v46  ;;  %15751 = vst [vmem:[#allocation8_spill] sm:$0xff] %v12859_v57  ;;  %v10375_v25 = vld [vmem:[%s15727_s1 + $0x1754] sm:$0xf0] }
 0x15e   :  { %5568 = vmatpush.bf16.msra.mxu2 %v9126_v55  ;;  %v10345_v55 = vld [vmem:[%s15727_s1 + $0x1664] sm:$0xf0]  ;;  %15753 = vst [vmem:[#allocation10_spill] sm:$0xff] %v12876_v26  ;;  %v10391_v46 = vld [vmem:[%s15727_s1 + $0x17d4] sm:$0xf0] }
 0x15f   :  { %5581 = vmatpush.bf16.msra.mxu3 %v9190_v56  ;;  %v10361_v56 = vld [vmem:[%s15727_s1 + $0x16e4] sm:$0xf0]  ;;  %v9294_v37 = vor.u32 %v10345_v55, %v9293_v47  ;;  %v9277_v47 = vld [vmem:[%s15727_s1 + $0x1640] sm:$0xf] }
 0x160   :  { %5543 = vmatpush.bf16.msra.mxu0 %v8990_v16  ;;  %v9358_v17 = vor.u32 %v10361_v56, %v9357_v49  ;;  %v9285_v16 = vld [vmem:[%s15727_s1 + $0x1650] sm:$0xf]  ;;  %v10341_v55 = vld [vmem:[%s15727_s1 + $0x1644] sm:$0xf0]  ;;  %v9341_v49 = vld [vmem:[%s15727_s1 + $0x16c0] sm:$0xf] }
 0x161   :  { %5556 = vmatpush.bf16.msra.mxu1 %v9054_v51  ;;  %v9477_v51 = vld [vmem:[%s15727_s1 + $0x17d0] sm:$0xf]  ;;  %v9286_v11 = vor.u32 %v10343_v61, %v9285_v16  ;;  %v10357_v56 = vld [vmem:[%s15727_s1 + $0x16c4] sm:$0xf0]  ;;  %v9405_v58 = vld [vmem:[%s15727_s1 + $0x1740] sm:$0xf]  ;;  %v5350_v16 = vpop.f32.mrf.mxu1 }
 0x162   :  { %5569 = vmatpush.bf16.msra.mxu2 %v9118_v50  ;;  %v12886_v50 = vpack.c.bf16 %v12683_v63, %v12683_v63  ;;  %v9486_v63 = vor.u32 %v10393_v12, %v9485_v41  ;;  %v10373_v1 = vld [vmem:[%s15727_s1 + $0x1744] sm:$0xf0]  ;;  %v5337_v41 = vpop.f32.mrf.mxu0  ;;  %v9469_v12 = vld [vmem:[%s15727_s1 + $0x17c0] sm:$0xf]  ;;  %v9342_v61 = vor.u32 %v10357_v56, %v9341_v49 }
 0x163   :  { %5582 = vmatpush.bf16.msra.mxu3 %v9182_v48  ;;  %5544 = vmatmul.bf16.vlgmr.msra.gmra.mxu0 %v12859_v57  ;;  %v10337_v56 = vld [vmem:[%s15727_s1 + $0x1624] sm:$0xf0] }
 0x164   :  { %5588 = vmatpush.bf16.msrb.mxu0 %v9302_v53  ;;  %15754 = vst [vmem:[#allocation11_spill] sm:$0xff] %v12886_v50  ;;  %5557 = vmatmul.bf16.vlgmr.msra.gmra.mxu1 %v12876_v26 }
 0x165   :  { %5601 = vmatpush.bf16.msrb.mxu1 %v9366_v54  ;;  %v9413_v54 = vld [vmem:[%s15727_s1 + $0x1750] sm:$0xf]  ;;  %5570 = vmatmul.bf16.vlgmr.msra.gmra.mxu2 %v12872_v4  ;;  %v106_v4 = vld.sshfl [vmem:[#allocation1 + $0x38] sm:$0xff pattern:$0x73625140] }
 0x166   :  { %5614 = vmatpush.bf16.msrb.mxu2 %v9430_v60  ;;  %v10359_v60 = vld [vmem:[%s15727_s1 + $0x16d4] sm:$0xf0]  ;;  %5583 = vmatmul.bf16.vlgmr.msra.gmra.mxu3 %v12886_v50  ;;  %v9414_v53 = vor.u32 %v10375_v25, %v9413_v54  ;;  %v9333_v54 = vld [vmem:[%s15727_s1 + $0x16b0] sm:$0xf] }
 0x167   :  { %5627 = vmatpush.bf16.msrb.mxu3 %v9494_v5  ;;  %v9350_v48 = vor.u32 %v10359_v60, %v9349_v23  ;;  %v9478_v5 = vor.u32 %v10391_v46, %v9477_v51  ;;  %v9406_v23 = vor.u32 %v10373_v1, %v9405_v58  ;;  %v10339_v60 = vld [vmem:[%s15727_s1 + $0x1634] sm:$0xf0]  ;;  %v9397_v46 = vld [vmem:[%s15727_s1 + $0x1730] sm:$0xf]  ;;  %v9325_v58 = vld [vmem:[%s15727_s1 + $0x16a0] sm:$0xf] }
 0x168   :  { %5589 = vmatpush.bf16.msrb.mxu0 %v9294_v37  ;;  %v10389_v37 = vld [vmem:[%s15727_s1 + $0x17c4] sm:$0xf0]  ;;  %v10355_v51 = vld [vmem:[%s15727_s1 + $0x16b4] sm:$0xf0] }
 0x169   :  { %5602 = vmatpush.bf16.msrb.mxu1 %v9358_v17  ;;  %v5338_v17 = vadd.f32 %v5337_v41, %v12774_v14  ;;  %v9470_v14 = vor.u32 %v10389_v37, %v9469_v12  ;;  %v5363_v41 = vpop.f32.mrf.mxu2  ;;  %v10353_v12 = vld [vmem:[%s15727_s1 + $0x16a4] sm:$0xf0]  ;;  %v9389_v37 = vld [vmem:[%s15727_s1 + $0x1720] sm:$0xf] }
 0x16a   :  { %5615 = vmatpush.bf16.msrb.mxu2 %v9422_v6  ;;  %v9278_v6 = vor.u32 %v10341_v55, %v9277_v47  ;;  %v9334_v55 = vor.u32 %v10355_v51, %v9333_v54  ;;  %v5352_v54 = vpop.f32.mrf.mxu1  ;;  %v9326_v51 = vor.u32 %v10353_v12, %v9325_v58  ;;  %v9245_v58 = vld [vmem:[%s15727_s1 + $0x1600] sm:$0xf] }
 0x16b   :  { %5628 = vmatpush.bf16.msrb.mxu3 %v9486_v63  ;;  %v9269_v63 = vld [vmem:[%s15727_s1 + $0x1630] sm:$0xf]  ;;  %v5351_v25 = vadd.f32 %v5350_v16, %v5338_v17  ;;  %v10369_v17 = vld [vmem:[%s15727_s1 + $0x1724] sm:$0xf0]  ;;  %v5376_v16 = vpop.f32.mrf.mxu3  ;;  %v9309_v12 = vld [vmem:[%s15727_s1 + $0x1680] sm:$0xf] }
 0x16c   :  { %5590 = vmatpush.bf16.msrb.mxu0 %v9286_v11  ;;  %v10371_v11 = vld [vmem:[%s15727_s1 + $0x1734] sm:$0xf0]  ;;  %v9270_v47 = vor.u32 %v10339_v60, %v9269_v63  ;;  %v5339_v63 = vpop.f32.mrf.mxu0  ;;  %v9557_v54 = vld [vmem:[%s15727_s1 + $0x1870] sm:$0xf] }
 0x16d   :  { %5603 = vmatpush.bf16.msrb.mxu1 %v9350_v48  ;;  %v9461_v48 = vld [vmem:[%s15727_s1 + $0x17b0] sm:$0xf]  ;;  %v9398_v49 = vor.u32 %v10371_v11, %v9397_v46  ;;  %v9390_v46 = vor.u32 %v10369_v17, %v9389_v37  ;;  %v10335_v11 = vld [vmem:[%s15727_s1 + $0x1614] sm:$0xf0]  ;;  %v10349_v37 = vld [vmem:[%s15727_s1 + $0x1684] sm:$0xf0] }
 0x16e   :  { %5616 = vmatpush.bf16.msrb.mxu2 %v9414_v53  ;;  %v10387_v53 = vld [vmem:[%s15727_s1 + $0x17b4] sm:$0xf0]  ;;  %v103_v50 = vld.sshfl [vmem:[#allocation1 + $0x20] sm:$0xff pattern:$0x73625140] }
 0x16f   :  { %5629 = vmatpush.bf16.msrb.mxu3 %v9478_v5  ;;  %v9261_v5 = vld [vmem:[%s15727_s1 + $0x1620] sm:$0xf]  ;;  %v9462_v1 = vor.u32 %v10387_v53, %v9461_v48  ;;  %v9317_v48 = vld [vmem:[%s15727_s1 + $0x1690] sm:$0xf] }
 0x170   :  { %5591 = vmatpush.bf16.msrb.mxu0 %v9278_v6  ;;  %v5364_v6 = vadd.f32 %v5363_v41, %v5351_v25  ;;  %v9262_v60 = vor.u32 %v10337_v56, %v9261_v5  ;;  %v9253_v25 = vld [vmem:[%s15727_s1 + $0x1610] sm:$0xf]  ;;  %v10383_v56 = vld [vmem:[%s15727_s1 + $0x1794] sm:$0xf0]  ;;  %v10333_v41 = vld [vmem:[%s15727_s1 + $0x1604] sm:$0xf0] }
 0x171   :  { %5604 = vmatpush.bf16.msrb.mxu1 %v9342_v61  ;;  %v9453_v61 = vld [vmem:[%s15727_s1 + $0x17a0] sm:$0xf]  ;;  %v9445_v5 = vld [vmem:[%s15727_s1 + $0x1790] sm:$0xf] }
 0x172   :  { %5617 = vmatpush.bf16.msrb.mxu2 %v9406_v23  ;;  %v10385_v23 = vld [vmem:[%s15727_s1 + $0x17a4] sm:$0xf0]  ;;  %v9446_v63 = vor.u32 %v10383_v56, %v9445_v5  ;;  %v6551_v5 = vld [vmem:[%s15727_s1 + $0xf8] sm:$0xf0]  ;;  %v9310_v56 = vor.u32 %v10349_v37, %v9309_v12  ;;  %v9613_v12 = vld [vmem:[%s15727_s1 + $0x18e0] sm:$0xf] }
 0x173   :  { %5630 = vmatpush.bf16.msrb.mxu3 %v9470_v14  ;;  %v12989_v14 = vadd.f32 %v5376_v16, %v5364_v6  ;;  %v9454_v53 = vor.u32 %v10385_v23, %v9453_v61  ;;  %v9373_v16 = vld [vmem:[%s15727_s1 + $0x1700] sm:$0xf]  ;;  %v10365_v61 = vld [vmem:[%s15727_s1 + $0x1704] sm:$0xf0] }
 0x174   :  { %5592 = vmatpush.bf16.msrb.mxu0 %v9270_v47  ;;  %v10351_v47 = vld [vmem:[%s15727_s1 + $0x1694] sm:$0xf0]  ;;  %v9437_v23 = vld [vmem:[%s15727_s1 + $0x1780] sm:$0xf] }
 0x175   :  { %5605 = vmatpush.bf16.msrb.mxu1 %v9334_v55  ;;  %v9381_v55 = vld [vmem:[%s15727_s1 + $0x1710] sm:$0xf]  ;;  %v9318_v17 = vor.u32 %v10351_v47, %v9317_v48  ;;  %v9642_v48 = vld [vmem:[%s15727_s1 + $0x74] sm:$0xf]  ;;  %v9246_v47 = vor.u32 %v10333_v41, %v9245_v58 }
 0x176   :  { %5618 = vmatpush.bf16.msrb.mxu2 %v9398_v49  ;;  %v10367_v49 = vld [vmem:[%s15727_s1 + $0x1714] sm:$0xf0]  ;;  %v104_v41 = vld.sshfl [vmem:[#allocation1 + $0x28] sm:$0xff pattern:$0x73625140] }
 0x177   :  { %5631 = vmatpush.bf16.msrb.mxu3 %v9462_v1  ;;  %v9254_v1 = vor.u32 %v10335_v11, %v9253_v25  ;;  %v9382_v6 = vor.u32 %v10367_v49, %v9381_v55  ;;  %v9621_v25 = vld [vmem:[%s15727_s1 + $0x18f0] sm:$0xf]  ;;  %v10427_v11 = vld [vmem:[%s15727_s1 + $0x18f4] sm:$0xf0]  ;;  %v6487_v55 = vld [vmem:[%s15727_s1 + $0x78] sm:$0xf0] }
 0x178   :  { %5593 = vmatpush.bf16.msrb.mxu0 %v9262_v60  ;;  %v10381_v60 = vld [vmem:[%s15727_s1 + $0x1784] sm:$0xf0]  ;;  %v9658_v49 = vld [vmem:[%s15727_s1 + $0xf4] sm:$0xf]  ;;  %v9622_v26 = vor.u32 %v10427_v11, %v9621_v25  ;;  %v6490_v57 = vor.u32 %v9642_v48, %v6487_v55  ;;  %v10407_v55 = vld [vmem:[%s15727_s1 + $0x1854] sm:$0xf0] }
 0x179   :  { %5606 = vmatpush.bf16.msrb.mxu1 %v9326_v51  ;;  %v10411_v51 = vld [vmem:[%s15727_s1 + $0x1874] sm:$0xf0]  ;;  %v9438_v58 = vor.u32 %v10381_v60, %v9437_v23  ;;  %v6554_v37 = vor.u32 %v9658_v49, %v6551_v5  ;;  %v6479_v23 = vld [vmem:[%s15727_s1 + $0x68] sm:$0xf0]  ;;  %v13085_v60 = vpack.c.bf16 %v104_v41, %v104_v41  ;;  %v9605_v49 = vld [vmem:[%s15727_s1 + $0x18d0] sm:$0xf] }
 0x17a   :  { %5619 = vmatpush.bf16.msrb.mxu2 %v9390_v46  ;;  %v5365_v46 = vpop.f32.mrf.mxu2  ;;  %v9654_v5 = vld [vmem:[%s15727_s1 + $0xd4] sm:$0xf]  ;;  %v10405_v41 = vld [vmem:[%s15727_s1 + $0x1844] sm:$0xf0] }
 0x17b   :  { %5632 = vmatpush.bf16.msrb.mxu3 %v9454_v53  ;;  %v5378_v53 = vpop.f32.mrf.mxu3  ;;  %v9374_v46 = vor.u32 %v10365_v61, %v9373_v16  ;;  %v10425_v16 = vld [vmem:[%s15727_s1 + $0x18e4] sm:$0xf0]  ;;  %v9640_v61 = vld [vmem:[%s15727_s1 + $0x64] sm:$0xf] }
 0x17c   :  { %5594 = vmatpush.bf16.msrb.mxu0 %v9254_v1  ;;  %v105_v53 = vld.sshfl [vmem:[#allocation1 + $0x30] sm:$0xff pattern:$0x73625140]  ;;  %v9558_v1 = vor.u32 %v10411_v51, %v9557_v54  ;;  %v6543_v54 = vld [vmem:[%s15727_s1 + $0xe8] sm:$0xf0]  ;;  %v13093_v51 = vpack.c.bf16 %v106_v4, %v106_v4  ;;  %v9614_v11 = vor.u32 %v10425_v16, %v9613_v12  ;;  %v6482_v48 = vor.u32 %v9640_v61, %v6479_v23 }
 0x17d   :  { %5607 = vmatpush.bf16.msrb.mxu1 %v9318_v17  ;;  %v10409_v17 = vld [vmem:[%s15727_s1 + $0x1864] sm:$0xf0]  ;;  %v9638_v4 = vld [vmem:[%s15727_s1 + $0x54] sm:$0xf]  ;;  %v9636_v16 = vld [vmem:[%s15727_s1 + $0x44] sm:$0xf] }
 0x17e   :  { %5620 = vmatpush.bf16.msrb.mxu2 %v9382_v6  ;;  %v13072_v6 = vpack.c.bf16 %v103_v50, %v103_v50  ;;  %v9656_v50 = vld [vmem:[%s15727_s1 + $0xe4] sm:$0xf]  ;;  %15756 = vst [vmem:[#allocation13_spill] sm:$0xff] %v13093_v51  ;;  %v9550_v25 = vor.u32 %v10409_v17, %v9549_v62  ;;  %v9597_v17 = vld [vmem:[%s15727_s1 + $0x18c0] sm:$0xf] }
 0x17f   :  { %5633 = vmatpush.bf16.msrb.mxu3 %v9446_v63  ;;  %v13083_v63 = vpack.c.bf16 %v105_v53, %v105_v53  ;;  %v6546_v62 = vor.u32 %v9656_v50, %v6543_v54  ;;  %v6463_v61 = vld [vmem:[%s15727_s1 + $0x48] sm:$0xf0]  ;;  %v9652_v50 = vld [vmem:[%s15727_s1 + $0xc4] sm:$0xf] }
 0x180   :  { %5595 = vmatpush.bf16.msrb.mxu0 %v9246_v47  ;;  %v9541_v47 = vld [vmem:[%s15727_s1 + $0x1850] sm:$0xf]  ;;  %v5389_v23 = vpop.f32.mrf.mxu0  ;;  %v6527_v54 = vld [vmem:[%s15727_s1 + $0xc8] sm:$0xf0] }
 0x181   :  { %5608 = vmatpush.bf16.msrb.mxu1 %v9310_v56  ;;  %15755 = vst [vmem:[#allocation12_spill] sm:$0xff] %v13083_v63  ;;  %v6535_v56 = vld [vmem:[%s15727_s1 + $0xd8] sm:$0xf0] }
 0x182   :  { %5621 = vmatpush.bf16.msrb.mxu2 %v9374_v46  ;;  %v9542_v46 = vor.u32 %v10407_v55, %v9541_v47  ;;  %v6538_v12 = vor.u32 %v9654_v5, %v6535_v56  ;;  %v6466_v55 = vor.u32 %v9636_v16, %v6463_v61  ;;  %v9634_v5 = vld [vmem:[%s15727_s1 + $0x34] sm:$0xf]  ;;  %v6455_v56 = vld [vmem:[%s15727_s1 + $0x38] sm:$0xf0] }
 0x183   :  { %5634 = vmatpush.bf16.msrb.mxu3 %v9438_v58  ;;  %5596 = vmatmul.bf16.vlgmr.msrb.gmra.mxu0 %v13072_v6 }
 0x184   :  { %5640 = vmatpush.bf16.msra.mxu0 %v9558_v1  ;;  %5609 = vmatmul.bf16.vlgmr.msrb.gmra.mxu1 %v13085_v60  ;;  %v9533_v1 = vld [vmem:[%s15727_s1 + $0x1840] sm:$0xf] }
 0x185   :  { %5653 = vmatpush.bf16.msra.mxu1 %v9622_v26  ;;  %v6471_v26 = vld [vmem:[%s15727_s1 + $0x58] sm:$0xf0]  ;;  %5622 = vmatmul.bf16.vlgmr.msrb.gmra.mxu2 %v13083_v63  ;;  %v9672_v63 = vld [vmem:[%s15727_s1 + $0x164] sm:$0xf] }
 0x186   :  { %5666 = vmatpush.bf16.msra.mxu2 %v6490_v57  ;;  %v10423_v57 = vld [vmem:[%s15727_s1 + $0x18d4] sm:$0xf0]  ;;  %5635 = vmatmul.bf16.vlgmr.msrb.gmra.mxu3 %v13093_v51  ;;  %v6474_v58 = vor.u32 %v9638_v4, %v6471_v26 }
 0x187   :  { %5679 = vmatpush.bf16.msra.mxu3 %v6554_v37  ;;  %v9606_v53 = vor.u32 %v10423_v57, %v9605_v49  ;;  %v10421_v37 = vld [vmem:[%s15727_s1 + $0x18c4] sm:$0xf0]  ;;  %v9525_v49 = vld [vmem:[%s15727_s1 + $0x1830] sm:$0xf]  ;;  %v10419_v26 = vld [vmem:[%s15727_s1 + $0x18b4] sm:$0xf0] }
 0x188   :  { %5641 = vmatpush.bf16.msra.mxu0 %v9550_v25  ;;  %v5390_v25 = vadd.f32 %v5389_v23, %v12989_v14  ;;  %v9598_v47 = vor.u32 %v10421_v37, %v9597_v17  ;;  %v9589_v57 = vld [vmem:[%s15727_s1 + $0x18b0] sm:$0xf]  ;;  %v6530_v14 = vor.u32 %v9652_v50, %v6527_v54  ;;  %v9517_v17 = vld [vmem:[%s15727_s1 + $0x1820] sm:$0xf]  ;;  %v5415_v61 = vpop.f32.mrf.mxu2  ;;  %v10417_v23 = vld [vmem:[%s15727_s1 + $0x18a4] sm:$0xf0] }
 0x189   :  { %5654 = vmatpush.bf16.msra.mxu1 %v9614_v11  ;;  %v9534_v11 = vor.u32 %v10405_v41, %v9533_v1  ;;  %v9590_v1 = vor.u32 %v10419_v26, %v9589_v57  ;;  %v6458_v41 = vor.u32 %v9634_v5, %v6455_v56  ;;  %v9581_v37 = vld [vmem:[%s15727_s1 + $0x18a0] sm:$0xf]  ;;  %v9632_v50 = vld [vmem:[%s15727_s1 + $0x24] sm:$0xf]  ;;  %v6447_v54 = vld [vmem:[%s15727_s1 + $0x28] sm:$0xf0] }
 0x18a   :  { %5667 = vmatpush.bf16.msra.mxu2 %v6482_v48  ;;  %v5402_v48 = vpop.f32.mrf.mxu1  ;;  %v6450_v26 = vor.u32 %v9632_v50, %v6447_v54  ;;  %v10399_v5 = vld [vmem:[%s15727_s1 + $0x1814] sm:$0xf0]  ;;  %v9573_v56 = vld [vmem:[%s15727_s1 + $0x1890] sm:$0xf]  ;;  %v10413_v54 = vld [vmem:[%s15727_s1 + $0x1884] sm:$0xf0] }
 0x18b   :  { %5680 = vmatpush.bf16.msra.mxu3 %v6546_v62  ;;  %v10403_v62 = vld [vmem:[%s15727_s1 + $0x1834] sm:$0xf0]  ;;  %v5403_v4 = vadd.f32 %v5402_v48, %v5390_v25  ;;  %v9648_v48 = vld [vmem:[%s15727_s1 + $0xa4] sm:$0xf] }
 0x18c   :  { %5642 = vmatpush.bf16.msra.mxu0 %v9542_v46  ;;  %v9650_v46 = vld [vmem:[%s15727_s1 + $0xb4] sm:$0xf] }
 0x18d   :  { %5655 = vmatpush.bf16.msra.mxu1 %v9606_v53  ;;  %v6519_v53 = vld [vmem:[%s15727_s1 + $0xb8] sm:$0xf0]  ;;  %v5416_v25 = vadd.f32 %v5415_v61, %v5403_v4  ;;  %v9509_v4 = vld [vmem:[%s15727_s1 + $0x1810] sm:$0xf]  ;;  %v9565_v61 = vld [vmem:[%s15727_s1 + $0x1880] sm:$0xf] }
 0x18e   :  { %5668 = vmatpush.bf16.msra.mxu2 %v6474_v58  ;;  %v9526_v58 = vor.u32 %v10403_v62, %v9525_v49  ;;  %v6522_v16 = vor.u32 %v9650_v46, %v6519_v53  ;;  %v10415_v53 = vld [vmem:[%s15727_s1 + $0x1894] sm:$0xf0] }
 0x18f   :  { %5681 = vmatpush.bf16.msra.mxu3 %v6538_v12  ;;  %v10401_v12 = vld [vmem:[%s15727_s1 + $0x1824] sm:$0xf0] }
 0x190   :  { %5643 = vmatpush.bf16.msra.mxu0 %v9534_v11  ;;  %v5428_v11 = vpop.f32.mrf.mxu3  ;;  %v9518_v49 = vor.u32 %v10401_v12, %v9517_v17  ;;  %v6503_v17 = vld [vmem:[%s15727_s1 + $0x98] sm:$0xf0]  ;;  %v9510_v12 = vor.u32 %v10399_v5, %v9509_v4 }
 0x191   :  { %5656 = vmatpush.bf16.msra.mxu1 %v9598_v47  ;;  %v6511_v47 = vld [vmem:[%s15727_s1 + $0xa8] sm:$0xf0]  ;;  %v13196_v57 = vadd.f32 %v5428_v11, %v5416_v25  ;;  %v9628_v25 = vld [vmem:[%s15727_s1 + $0x4] sm:$0xf]  ;;  %v6679_v4 = vld [vmem:[%s15727_s1 + $0x1f8] sm:$0xf0] }
 0x192   :  { %5669 = vmatpush.bf16.msra.mxu2 %v6466_v55  ;;  %v5391_v55 = vpop.f32.mrf.mxu0  ;;  %v5404_v62 = vpop.f32.mrf.mxu1  ;;  %v6514_v46 = vor.u32 %v9648_v48, %v6511_v47  ;;  %v6431_v11 = vld [vmem:[%s15727_s1 + $0x8] sm:$0xf0]  ;;  %v9644_v47 = vld [vmem:[%s15727_s1 + $0x84] sm:$0xf] }
 0x193   :  { %5682 = vmatpush.bf16.msra.mxu3 %v6530_v14  ;;  %v9582_v14 = vor.u32 %v10417_v23, %v9581_v37  ;;  %v9501_v37 = vld [vmem:[%s15727_s1 + $0x1800] sm:$0xf]  ;;  %v9574_v23 = vor.u32 %v10415_v53, %v9573_v56  ;;  %v6495_v55 = vld [vmem:[%s15727_s1 + $0x88] sm:$0xf0]  ;;  %v5417_v62 = vpop.f32.mrf.mxu2  ;;  %v6743_v53 = vld [vmem:[%s15727_s1 + $0x278] sm:$0xf0] }
 0x194   :  { %5644 = vmatpush.bf16.msra.mxu0 %v9526_v58  ;;  %v9630_v58 = vld [vmem:[%s15727_s1 + $0x14] sm:$0xf]  ;;  %v109_v62 = vld.sshfl [vmem:[#allocation1 + $0x8] sm:$0xff pattern:$0x73625140] }
 0x195   :  { %5657 = vmatpush.bf16.msra.mxu1 %v9590_v1  ;;  %v6439_v1 = vld [vmem:[%s15727_s1 + $0x18] sm:$0xf0] }
 0x196   :  { %5670 = vmatpush.bf16.msra.mxu2 %v6458_v41  ;;  %v9646_v41 = vld [vmem:[%s15727_s1 + $0x94] sm:$0xf]  ;;  %v6442_v50 = vor.u32 %v9630_v58, %v6439_v1  ;;  %v9566_v1 = vor.u32 %v10413_v54, %v9565_v61  ;;  %v6607_v61 = vld [vmem:[%s15727_s1 + $0x168] sm:$0xf0] }
 0x197   :  { %5683 = vmatpush.bf16.msra.mxu3 %v6522_v16  ;;  %v10397_v16 = vld [vmem:[%s15727_s1 + $0x1804] sm:$0xf0]  ;;  %v6506_v48 = vor.u32 %v9646_v41, %v6503_v17  ;;  %v9722_v58 = vld [vmem:[%s15727_s1 + $0x2f4] sm:$0xf]  ;;  %v6434_v41 = vor.u32 %v9628_v25, %v6431_v11  ;;  %v6807_v17 = vld [vmem:[%s15727_s1 + $0x2f8] sm:$0xf0] }
 0x198   :  { %5645 = vmatpush.bf16.msra.mxu0 %v9518_v49  ;;  %v9674_v49 = vld [vmem:[%s15727_s1 + $0x174] sm:$0xf]  ;;  %v5430_v5 = vpop.f32.mrf.mxu3  ;;  %v9502_v56 = vor.u32 %v10397_v16, %v9501_v37  ;;  %v6498_v37 = vor.u32 %v9644_v47, %v6495_v55  ;;  %v6671_v25 = vld [vmem:[%s15727_s1 + $0x1e8] sm:$0xf0]  ;;  %v9704_v11 = vld [vmem:[%s15727_s1 + $0x264] sm:$0xf]  ;;  %v13290_v47 = vpack.c.bf16 %v109_v62, %v109_v62 }
 0x199   :  { %5658 = vmatpush.bf16.msra.mxu1 %v9582_v14  ;;  %v6615_v14 = vld [vmem:[%s15727_s1 + $0x178] sm:$0xf0]  ;;  %v9720_v55 = vld [vmem:[%s15727_s1 + $0x2e4] sm:$0xf] }
 0x19a   :  { %5671 = vmatpush.bf16.msra.mxu2 %v6450_v26  ;;  %v9690_v26 = vld [vmem:[%s15727_s1 + $0x1f4] sm:$0xf]  ;;  %v6618_v16 = vor.u32 %v9674_v49, %v6615_v14  ;;  %v6799_v49 = vld [vmem:[%s15727_s1 + $0x2e8] sm:$0xf0]  ;;  %v6610_v14 = vor.u32 %v9672_v63, %v6607_v61  ;;  %v9668_v62 = vld [vmem:[%s15727_s1 + $0x144] sm:$0xf] }
 0x19b   :  { %5684 = vmatpush.bf16.msra.mxu3 %v6514_v46  ;;  %v9706_v46 = vld [vmem:[%s15727_s1 + $0x274] sm:$0xf]  ;;  %v6682_v5 = vor.u32 %v9690_v26, %v6679_v4  ;;  %v6802_v63 = vor.u32 %v9720_v55, %v6799_v49 }
 0x19c   :  { %5646 = vmatpush.bf16.msra.mxu0 %v9510_v12  ;;  %v108_v12 = vld.sshfl [vmem:[#allocation1] sm:$0xff pattern:$0x73625140]  ;;  %v6746_v51 = vor.u32 %v9706_v46, %v6743_v53  ;;  %v6599_v46 = vld [vmem:[%s15727_s1 + $0x158] sm:$0xf0] }
 0x19d   :  { %5659 = vmatpush.bf16.msra.mxu1 %v9574_v23  ;;  %v9688_v23 = vld [vmem:[%s15727_s1 + $0x1e4] sm:$0xf]  ;;  %v13279_v54 = vpack.c.bf16 %v108_v12, %v108_v12  ;;  %v9686_v53 = vld [vmem:[%s15727_s1 + $0x1d4] sm:$0xf] }
 0x19e   :  { %5672 = vmatpush.bf16.msra.mxu2 %v6442_v50  ;;  %v6810_v50 = vor.u32 %v9722_v58, %v6807_v17  ;;  %v6674_v26 = vor.u32 %v9688_v23, %v6671_v25  ;;  %v9702_v58 = vld [vmem:[%s15727_s1 + $0x254] sm:$0xf]  ;;  %v6791_v17 = vld [vmem:[%s15727_s1 + $0x2d8] sm:$0xf0]  ;;  %v9700_v23 = vld [vmem:[%s15727_s1 + $0x244] sm:$0xf] }
 0x19f   :  { %5685 = vmatpush.bf16.msra.mxu3 %v6506_v48  ;;  %v6735_v48 = vld [vmem:[%s15727_s1 + $0x268] sm:$0xf0] }
 0x1a0   :  { %5647 = vmatpush.bf16.msra.mxu0 %v9502_v56  ;;  %v6738_v4 = vor.u32 %v9704_v11, %v6735_v48  ;;  %v9670_v56 = vld [vmem:[%s15727_s1 + $0x154] sm:$0xf]  ;;  %v5441_v25 = vpop.f32.mrf.mxu0  ;;  %v9716_v11 = vld [vmem:[%s15727_s1 + $0x2c4] sm:$0xf]  ;;  %v6783_v48 = vld [vmem:[%s15727_s1 + $0x2c8] sm:$0xf0] }
 0x1a1   :  { %5660 = vmatpush.bf16.msra.mxu1 %v9566_v1  ;;  %v6727_v1 = vld [vmem:[%s15727_s1 + $0x258] sm:$0xf0]  ;;  %v6602_v12 = vor.u32 %v9670_v56, %v6599_v46  ;;  %v5442_v55 = vadd.f32 %v5441_v25, %v13196_v57  ;;  %v9666_v56 = vld [vmem:[%s15727_s1 + $0x134] sm:$0xf]  ;;  %v6786_v57 = vor.u32 %v9716_v11, %v6783_v48  ;;  %v6703_v25 = vld [vmem:[%s15727_s1 + $0x228] sm:$0xf0] }
 0x1a2   :  { %5673 = vmatpush.bf16.msra.mxu2 %v6434_v41  ;;  %v9718_v41 = vld [vmem:[%s15727_s1 + $0x2d4] sm:$0xf]  ;;  %v6583_v46 = vld [vmem:[%s15727_s1 + $0x138] sm:$0xf0] }
 0x1a3   :  { %5686 = vmatpush.bf16.msra.mxu3 %v6498_v37  ;;  %5648 = vmatmul.bf16.vlgmr.msra.gmra.mxu0 %v13279_v54  ;;  %v6794_v61 = vor.u32 %v9718_v41, %v6791_v17  ;;  %v9714_v41 = vld [vmem:[%s15727_s1 + $0x2b4] sm:$0xf]  ;;  %v6775_v17 = vld [vmem:[%s15727_s1 + $0x2b8] sm:$0xf0] }
 0x1a4   :  { %5692 = vmatpush.bf16.msrb.mxu0 %v6618_v16  ;;  %5661 = vmatmul.bf16.vlgmr.msra.gmra.mxu1 %v13290_v47  ;;  %v6730_v16 = vor.u32 %v9702_v58, %v6727_v1  ;;  %v9698_v58 = vld [vmem:[%s15727_s1 + $0x234] sm:$0xf]  ;;  %v6711_v1 = vld [vmem:[%s15727_s1 + $0x238] sm:$0xf0] }
 0x1a5   :  { %5705 = vmatpush.bf16.msrb.mxu1 %v6682_v5  ;;  %5674 = vmatmul.bf16.vlgmr.msra.gmra.mxu2 %v10796_v36  ;;  %v6591_v5 = vld [vmem:[%s15727_s1 + $0x148] sm:$0xf0]  ;;  %v9684_v36 = vld [vmem:[%s15727_s1 + $0x1c4] sm:$0xf] }
 0x1a6   :  { %5718 = vmatpush.bf16.msrb.mxu2 %v6746_v51  ;;  %v6663_v51 = vld [vmem:[%s15727_s1 + $0x1d8] sm:$0xf0]  ;;  %5687 = vmatmul.bf16.vlgmr.msra.gmra.mxu3 %v10806_v43  ;;  %v6655_v43 = vld [vmem:[%s15727_s1 + $0x1c8] sm:$0xf0]  ;;  %v6594_v49 = vor.u32 %v9668_v62, %v6591_v5  ;;  %v9664_v62 = vld [vmem:[%s15727_s1 + $0x124] sm:$0xf] }
 0x1a7   :  { %5731 = vmatpush.bf16.msrb.mxu3 %v6810_v50  ;;  %v6666_v37 = vor.u32 %v9686_v53, %v6663_v51  ;;  %v6719_v50 = vld [vmem:[%s15727_s1 + $0x248] sm:$0xf0]  ;;  %v9682_v53 = vld [vmem:[%s15727_s1 + $0x1b4] sm:$0xf]  ;;  %v6647_v51 = vld [vmem:[%s15727_s1 + $0x1b8] sm:$0xf0] }
 0x1a8   :  { %5693 = vmatpush.bf16.msrb.mxu0 %v6610_v14  ;;  %v5454_v14 = vpop.f32.mrf.mxu1  ;;  %v6575_v5 = vld [vmem:[%s15727_s1 + $0x128] sm:$0xf0] }
 0x1a9   :  { %5706 = vmatpush.bf16.msrb.mxu1 %v6674_v26  ;;  %v6658_v26 = vor.u32 %v9684_v36, %v6655_v43  ;;  %v9680_v36 = vld [vmem:[%s15727_s1 + $0x1a4] sm:$0xf]  ;;  %v5467_v43 = vpop.f32.mrf.mxu2  ;;  %v5480_v48 = vpop.f32.mrf.mxu3 }
 0x1aa   :  { %5719 = vmatpush.bf16.msrb.mxu2 %v6738_v4  ;;  %v6722_v4 = vor.u32 %v9700_v23, %v6719_v50  ;;  %v6639_v23 = vld [vmem:[%s15727_s1 + $0x1a8] sm:$0xf0]  ;;  %v9696_v50 = vld [vmem:[%s15727_s1 + $0x224] sm:$0xf] }
 0x1ab   :  { %5732 = vmatpush.bf16.msrb.mxu3 %v6802_v63  ;;  %v5455_v63 = vadd.f32 %v5454_v14, %v5442_v55  ;;  %v9712_v55 = vld [vmem:[%s15727_s1 + $0x2a4] sm:$0xf]  ;;  %v5443_v14 = vpop.f32.mrf.mxu0 }
 0x1ac   :  { %5694 = vmatpush.bf16.msrb.mxu0 %v6602_v12  ;;  %v6586_v12 = vor.u32 %v9666_v56, %v6583_v46  ;;  %v6642_v46 = vor.u32 %v9680_v36, %v6639_v23  ;;  %v6623_v23 = vld [vmem:[%s15727_s1 + $0x188] sm:$0xf0]  ;;  %v9738_v14 = vld [vmem:[%s15727_s1 + $0x374] sm:$0xf] }
 0x1ad   :  { %5707 = vmatpush.bf16.msrb.mxu1 %v6666_v37  ;;  %v6650_v37 = vor.u32 %v9682_v53, %v6647_v51  ;;  %v5468_v11 = vadd.f32 %v5467_v43, %v5455_v63  ;;  %v6706_v53 = vor.u32 %v9696_v50, %v6703_v25  ;;  %v6567_v63 = vld [vmem:[%s15727_s1 + $0x118] sm:$0xf0]  ;;  %v9678_v51 = vld [vmem:[%s15727_s1 + $0x194] sm:$0xf]  ;;  %v9676_v43 = vld [vmem:[%s15727_s1 + $0x184] sm:$0xf] }
 0x1ae   :  { %5720 = vmatpush.bf16.msrb.mxu2 %v6730_v16  ;;  %v6714_v16 = vor.u32 %v9698_v58, %v6711_v1  ;;  %v6631_v1 = vld [vmem:[%s15727_s1 + $0x198] sm:$0xf0]  ;;  %v9692_v50 = vld [vmem:[%s15727_s1 + $0x204] sm:$0xf] }
 0x1af   :  { %5733 = vmatpush.bf16.msrb.mxu3 %v6794_v61  ;;  %v6778_v61 = vor.u32 %v9714_v41, %v6775_v17  ;;  %v13399_v56 = vadd.f32 %v5480_v48, %v5468_v11  ;;  %v9694_v41 = vld [vmem:[%s15727_s1 + $0x214] sm:$0xf]  ;;  %v6695_v17 = vld [vmem:[%s15727_s1 + $0x218] sm:$0xf0]  ;;  %v6634_v36 = vor.u32 %v9678_v51, %v6631_v1  ;;  %v6687_v11 = vld [vmem:[%s15727_s1 + $0x208] sm:$0xf0] }
 0x1b0   :  { %5695 = vmatpush.bf16.msrb.mxu0 %v6594_v49  ;;  %v6767_v49 = vld [vmem:[%s15727_s1 + $0x2a8] sm:$0xf0]  ;;  %v9708_v48 = vld [vmem:[%s15727_s1 + $0x284] sm:$0xf]  ;;  %v6999_v51 = vld [vmem:[%s15727_s1 + $0x478] sm:$0xf0]  ;;  %v6690_v1 = vor.u32 %v9692_v50, %v6687_v11 }
 0x1b1   :  { %5708 = vmatpush.bf16.msrb.mxu1 %v6658_v26  ;;  %v6578_v26 = vor.u32 %v9664_v62, %v6575_v5  ;;  %v6770_v58 = vor.u32 %v9712_v55, %v6767_v49  ;;  %v9660_v62 = vld [vmem:[%s15727_s1 + $0x104] sm:$0xf]  ;;  %v6559_v5 = vld [vmem:[%s15727_s1 + $0x108] sm:$0xf0]  ;;  %v5469_v49 = vpop.f32.mrf.mxu2 }
 0x1b2   :  { %5721 = vmatpush.bf16.msrb.mxu2 %v6722_v4  ;;  %v5456_v4 = vpop.f32.mrf.mxu1  ;;  %v6751_v55 = vld [vmem:[%s15727_s1 + $0x288] sm:$0xf0]  ;;  %v9768_v50 = vld [vmem:[%s15727_s1 + $0x464] sm:$0xf] }
 0x1b3   :  { %5734 = vmatpush.bf16.msrb.mxu3 %v6786_v57  ;;  %v9662_v57 = vld [vmem:[%s15727_s1 + $0x114] sm:$0xf]  ;;  %v9784_v11 = vld [vmem:[%s15727_s1 + $0x4e4] sm:$0xf] }
 0x1b4   :  { %5696 = vmatpush.bf16.msrb.mxu0 %v6586_v12  ;;  %v9710_v12 = vld [vmem:[%s15727_s1 + $0x294] sm:$0xf] }
 0x1b5   :  { %5709 = vmatpush.bf16.msrb.mxu1 %v6650_v37  ;;  %v6759_v37 = vld [vmem:[%s15727_s1 + $0x298] sm:$0xf0]  ;;  %v9754_v4 = vld [vmem:[%s15727_s1 + $0x3f4] sm:$0xf] }
 0x1b6   :  { %5722 = vmatpush.bf16.msrb.mxu2 %v6714_v16  ;;  %v6570_v16 = vor.u32 %v9662_v57, %v6567_v63  ;;  %v6762_v25 = vor.u32 %v9710_v12, %v6759_v37  ;;  %v6935_v57 = vld [vmem:[%s15727_s1 + $0x3f8] sm:$0xf0]  ;;  %v9770_v63 = vld [vmem:[%s15727_s1 + $0x474] sm:$0xf]  ;;  %v6754_v12 = vor.u32 %v9708_v48, %v6751_v55  ;;  %v7055_v48 = vld [vmem:[%s15727_s1 + $0x4e8] sm:$0xf0] }
 0x1b7   :  { %5735 = vmatpush.bf16.msrb.mxu3 %v6778_v61  ;;  %v6698_v61 = vor.u32 %v9694_v41, %v6695_v17  ;;  %v9786_v41 = vld [vmem:[%s15727_s1 + $0x4f4] sm:$0xf]  ;;  %v7063_v17 = vld [vmem:[%s15727_s1 + $0x4f8] sm:$0xf0] }
 0x1b8   :  { %5697 = vmatpush.bf16.msrb.mxu0 %v6578_v26  ;;  %v6871_v26 = vld [vmem:[%s15727_s1 + $0x378] sm:$0xf0] }
 0x1b9   :  { %5710 = vmatpush.bf16.msrb.mxu1 %v6642_v46  ;;  %v5482_v46 = vpop.f32.mrf.mxu3  ;;  %v6874_v37 = vor.u32 %v9738_v14, %v6871_v26  ;;  %v9734_v26 = vld [vmem:[%s15727_s1 + $0x354] sm:$0xf] }
 0x1ba   :  { %5723 = vmatpush.bf16.msrb.mxu2 %v6706_v53  ;;  %v6562_v53 = vor.u32 %v9660_v62, %v6559_v5  ;;  %v7002_v62 = vor.u32 %v9770_v63, %v6999_v51  ;;  %v9736_v5 = vld [vmem:[%s15727_s1 + $0x364] sm:$0xf]  ;;  %v9750_v46 = vld [vmem:[%s15727_s1 + $0x3d4] sm:$0xf]  ;;  %v6983_v51 = vld [vmem:[%s15727_s1 + $0x458] sm:$0xf0] }
 0x1bb   :  { %5736 = vmatpush.bf16.msrb.mxu3 %v6770_v58  ;;  %v6626_v58 = vor.u32 %v9676_v43, %v6623_v23  ;;  %v7066_v43 = vor.u32 %v9786_v41, %v7063_v17  ;;  %v6927_v23 = vld [vmem:[%s15727_s1 + $0x3e8] sm:$0xf0]  ;;  %v9766_v63 = vld [vmem:[%s15727_s1 + $0x454] sm:$0xf] }
 0x1bc   :  { %5698 = vmatpush.bf16.msrb.mxu0 %v6570_v16  ;;  %v6938_v16 = vor.u32 %v9754_v4, %v6935_v57  ;;  %v6855_v4 = vld [vmem:[%s15727_s1 + $0x358] sm:$0xf0]  ;;  %v6986_v17 = vor.u32 %v9766_v63, %v6983_v51 }
 0x1bd   :  { %5711 = vmatpush.bf16.msrb.mxu1 %v6634_v36  ;;  %v6863_v36 = vld [vmem:[%s15727_s1 + $0x368] sm:$0xf0]  ;;  %v6919_v57 = vld [vmem:[%s15727_s1 + $0x3d8] sm:$0xf0] }
 0x1be   :  { %5724 = vmatpush.bf16.msrb.mxu2 %v6698_v61  ;;  %v9752_v61 = vld [vmem:[%s15727_s1 + $0x3e4] sm:$0xf]  ;;  %v6866_v55 = vor.u32 %v9736_v5, %v6863_v36  ;;  %v6922_v41 = vor.u32 %v9750_v46, %v6919_v57  ;;  %v6967_v46 = vld [vmem:[%s15727_s1 + $0x438] sm:$0xf0] }
 0x1bf   :  { %5737 = vmatpush.bf16.msrb.mxu3 %v6762_v25  ;;  %v6991_v25 = vld [vmem:[%s15727_s1 + $0x468] sm:$0xf0]  ;;  %v6930_v49 = vor.u32 %v9752_v61, %v6927_v23  ;;  %v9780_v36 = vld [vmem:[%s15727_s1 + $0x4c4] sm:$0xf]  ;;  %v7031_v57 = vld [vmem:[%s15727_s1 + $0x4b8] sm:$0xf0] }
 0x1c0   :  { %5699 = vmatpush.bf16.msrb.mxu0 %v6562_v53  ;;  %v6994_v14 = vor.u32 %v9768_v50, %v6991_v25  ;;  %v7058_v53 = vor.u32 %v9784_v11, %v7055_v48  ;;  %v5493_v5 = vpop.f32.mrf.mxu0  ;;  %v7039_v61 = vld [vmem:[%s15727_s1 + $0x4c8] sm:$0xf0]  ;;  %v9730_v48 = vld [vmem:[%s15727_s1 + $0x334] sm:$0xf] }
 0x1c1   :  { %5712 = vmatpush.bf16.msrb.mxu1 %v6626_v58  ;;  %v9782_v58 = vld [vmem:[%s15727_s1 + $0x4d4] sm:$0xf]  ;;  %v5506_v50 = vpop.f32.mrf.mxu1 }
 0x1c2   :  { %5725 = vmatpush.bf16.msrb.mxu2 %v6690_v1  ;;  %v6858_v1 = vor.u32 %v9734_v26, %v6855_v4  ;;  %v6903_v26 = vld [vmem:[%s15727_s1 + $0x3b8] sm:$0xf0]  ;;  %v9762_v4 = vld [vmem:[%s15727_s1 + $0x434] sm:$0xf] }
 0x1c3   :  { %5738 = vmatpush.bf16.msrb.mxu3 %v6754_v12  ;;  %5700 = vmatmul.bf16.vlgmr.msrb.gmra.mxu0 %v10794_v35  ;;  %v9732_v12 = vld [vmem:[%s15727_s1 + $0x344] sm:$0xf] }
 0x1c4   :  { %5744 = vmatpush.bf16.msra.mxu0 %v6874_v37  ;;  %5713 = vmatmul.bf16.vlgmr.msrb.gmra.mxu1 %v10804_v42  ;;  %v6847_v37 = vld [vmem:[%s15727_s1 + $0x348] sm:$0xf0]  ;;  %v9748_v35 = vld [vmem:[%s15727_s1 + $0x3c4] sm:$0xf] }
 0x1c5   :  { %5757 = vmatpush.bf16.msra.mxu1 %v6938_v16  ;;  %5726 = vmatmul.bf16.vlgmr.msrb.gmra.mxu2 %v10922_v39  ;;  %v7047_v39 = vld [vmem:[%s15727_s1 + $0x4d8] sm:$0xf0]  ;;  %v6911_v42 = vld [vmem:[%s15727_s1 + $0x3c8] sm:$0xf0]  ;;  %v9764_v16 = vld [vmem:[%s15727_s1 + $0x444] sm:$0xf]  ;;  %v6850_v23 = vor.u32 %v9732_v12, %v6847_v37 }
 0x1c6   :  { %5770 = vmatpush.bf16.msra.mxu2 %v7002_v62  ;;  %5739 = vmatmul.bf16.vlgmr.msrb.gmra.mxu3 %v10926_v44  ;;  %v7050_v44 = vor.u32 %v9782_v58, %v7047_v39  ;;  %v6975_v62 = vld [vmem:[%s15727_s1 + $0x448] sm:$0xf0]  ;;  %v6914_v25 = vor.u32 %v9748_v35, %v6911_v42  ;;  %v6970_v58 = vor.u32 %v9762_v4, %v6967_v46  ;;  %v9728_v39 = vld [vmem:[%s15727_s1 + $0x324] sm:$0xf]  ;;  %v9774_v4 = vld [vmem:[%s15727_s1 + $0x494] sm:$0xf] }
 0x1c7   :  { %5783 = vmatpush.bf16.msra.mxu3 %v7066_v43  ;;  %v5494_v43 = vadd.f32 %v5493_v5, %v13399_v56  ;;  %v6978_v11 = vor.u32 %v9764_v16, %v6975_v62  ;;  %v7042_v56 = vor.u32 %v9780_v36, %v7039_v61  ;;  %v6895_v37 = vld [vmem:[%s15727_s1 + $0x3a8] sm:$0xf0]  ;;  %v9760_v35 = vld [vmem:[%s15727_s1 + $0x424] sm:$0xf]  ;;  %v7015_v46 = vld [vmem:[%s15727_s1 + $0x498] sm:$0xf0] }
 0x1c8   :  { %5745 = vmatpush.bf16.msra.mxu0 %v6866_v55  ;;  %v6839_v55 = vld [vmem:[%s15727_s1 + $0x338] sm:$0xf0]  ;;  %v5519_v12 = vpop.f32.mrf.mxu2  ;;  %v9776_v62 = vld [vmem:[%s15727_s1 + $0x4a4] sm:$0xf]  ;;  %v7023_v5 = vld [vmem:[%s15727_s1 + $0x4a8] sm:$0xf0]  ;;  %v5495_v36 = vpop.f32.mrf.mxu0 }
 0x1c9   :  { %5758 = vmatpush.bf16.msra.mxu1 %v6930_v49  ;;  %v9746_v49 = vld [vmem:[%s15727_s1 + $0x3b4] sm:$0xf]  ;;  %v6842_v63 = vor.u32 %v9730_v48, %v6839_v55  ;;  %v5532_v16 = vpop.f32.mrf.mxu3  ;;  %v6823_v48 = vld [vmem:[%s15727_s1 + $0x318] sm:$0xf0] }
 0x1ca   :  { %5771 = vmatpush.bf16.msra.mxu2 %v6994_v14  ;;  %v5507_v14 = vadd.f32 %v5506_v50, %v5494_v43  ;;  %v6906_v51 = vor.u32 %v9746_v49, %v6903_v26  ;;  %v5508_v43 = vpop.f32.mrf.mxu1  ;;  %v9742_v55 = vld [vmem:[%s15727_s1 + $0x394] sm:$0xf]  ;;  %v7026_v49 = vor.u32 %v9776_v62, %v7023_v5  ;;  %v6951_v26 = vld [vmem:[%s15727_s1 + $0x418] sm:$0xf0] }
 0x1cb   :  { %5784 = vmatpush.bf16.msra.mxu3 %v7058_v53  ;;  %v9778_v53 = vld [vmem:[%s15727_s1 + $0x4b4] sm:$0xf] }
 0x1cc   :  { %5746 = vmatpush.bf16.msra.mxu0 %v6858_v1  ;;  %v6831_v1 = vld [vmem:[%s15727_s1 + $0x328] sm:$0xf0]  ;;  %v5520_v42 = vadd.f32 %v5519_v12, %v5507_v14  ;;  %v9758_v14 = vld [vmem:[%s15727_s1 + $0x414] sm:$0xf] }
 0x1cd   :  { %5759 = vmatpush.bf16.msra.mxu1 %v6922_v41  ;;  %v9744_v41 = vld [vmem:[%s15727_s1 + $0x3a4] sm:$0xf]  ;;  %v6834_v61 = vor.u32 %v9728_v39, %v6831_v1  ;;  %v6879_v1 = vld [vmem:[%s15727_s1 + $0x388] sm:$0xf0]  ;;  %v9818_v62 = vld [vmem:[%s15727_s1 + $0x5f4] sm:$0xf] }
 0x1ce   :  { %5772 = vmatpush.bf16.msra.mxu2 %v6986_v17  ;;  %v7034_v17 = vor.u32 %v9778_v53, %v7031_v57  ;;  %v6898_v50 = vor.u32 %v9744_v41, %v6895_v37  ;;  %v9724_v57 = vld [vmem:[%s15727_s1 + $0x304] sm:$0xf]  ;;  %v6943_v12 = vld [vmem:[%s15727_s1 + $0x408] sm:$0xf0]  ;;  %v9834_v43 = vld [vmem:[%s15727_s1 + $0x674] sm:$0xf] }
 0x1cf   :  { %5785 = vmatpush.bf16.msra.mxu3 %v7050_v44  ;;  %v6959_v44 = vld [vmem:[%s15727_s1 + $0x428] sm:$0xf0]  ;;  %v9740_v39 = vld [vmem:[%s15727_s1 + $0x384] sm:$0xf] }
 0x1d0   :  { %5747 = vmatpush.bf16.msra.mxu0 %v6850_v23  ;;  %v13598_v23 = vadd.f32 %v5532_v16, %v5520_v42  ;;  %v9756_v41 = vld [vmem:[%s15727_s1 + $0x404] sm:$0xf]  ;;  %v9802_v42 = vld [vmem:[%s15727_s1 + $0x574] sm:$0xf]  ;;  %v7127_v16 = vld [vmem:[%s15727_s1 + $0x578] sm:$0xf0] }
 0x1d1   :  { %5760 = vmatpush.bf16.msra.mxu1 %v6914_v25  ;;  %v6962_v25 = vor.u32 %v9760_v35, %v6959_v44  ;;  %v9772_v37 = vld [vmem:[%s15727_s1 + $0x484] sm:$0xf]  ;;  %v7007_v35 = vld [vmem:[%s15727_s1 + $0x488] sm:$0xf0]  ;;  %v5521_v44 = vpop.f32.mrf.mxu2  ;;  %v5534_v5 = vpop.f32.mrf.mxu3 }
 0x1d2   :  { %5773 = vmatpush.bf16.msra.mxu2 %v6978_v11  ;;  %v9726_v11 = vld [vmem:[%s15727_s1 + $0x314] sm:$0xf]  ;;  %v7239_v5 = vld [vmem:[%s15727_s1 + $0x658] sm:$0xf0] }
 0x1d3   :  { %5786 = vmatpush.bf16.msra.mxu3 %v7042_v56  ;;  %v6887_v56 = vld [vmem:[%s15727_s1 + $0x398] sm:$0xf0]  ;;  %v6826_v53 = vor.u32 %v9726_v11, %v6823_v48  ;;  %v6946_v11 = vor.u32 %v9756_v41, %v6943_v12  ;;  %v9850_v48 = vld [vmem:[%s15727_s1 + $0x6f4] sm:$0xf] }
 0x1d4   :  { %5748 = vmatpush.bf16.msra.mxu0 %v6842_v63  ;;  %v6815_v63 = vld [vmem:[%s15727_s1 + $0x308] sm:$0xf0]  ;;  %v9814_v44 = vld [vmem:[%s15727_s1 + $0x5d4] sm:$0xf] }
 0x1d5   :  { %5761 = vmatpush.bf16.msra.mxu1 %v6906_v51  ;;  %v6890_v51 = vor.u32 %v9742_v55, %v6887_v56  ;;  %v6818_v36 = vor.u32 %v9724_v57, %v6815_v63  ;;  %v7319_v55 = vld [vmem:[%s15727_s1 + $0x6f8] sm:$0xf0]  ;;  %v7130_v56 = vor.u32 %v9802_v42, %v7127_v16  ;;  %v7183_v63 = vld [vmem:[%s15727_s1 + $0x5e8] sm:$0xf0] }
 0x1d6   :  { %5774 = vmatpush.bf16.msra.mxu2 %v6970_v58  ;;  %v6954_v58 = vor.u32 %v9758_v14, %v6951_v26  ;;  %v7322_v57 = vor.u32 %v9850_v48, %v7319_v55  ;;  %v7175_v16 = vld [vmem:[%s15727_s1 + $0x5d8] sm:$0xf0]  ;;  %v9828_v48 = vld [vmem:[%s15727_s1 + $0x644] sm:$0xf]  ;;  %v7231_v55 = vld [vmem:[%s15727_s1 + $0x648] sm:$0xf0] }
 0x1d7   :  { %5787 = vmatpush.bf16.msra.mxu3 %v7034_v17  ;;  %v7018_v17 = vor.u32 %v9774_v4, %v7015_v46  ;;  %v9800_v4 = vld [vmem:[%s15727_s1 + $0x564] sm:$0xf]  ;;  %v7119_v46 = vld [vmem:[%s15727_s1 + $0x568] sm:$0xf0] }
 0x1d8   :  { %5749 = vmatpush.bf16.msra.mxu0 %v6834_v61  ;;  %v7191_v61 = vld [vmem:[%s15727_s1 + $0x5f8] sm:$0xf0]  ;;  %v7122_v41 = vor.u32 %v9800_v4, %v7119_v46 }
 0x1d9   :  { %5762 = vmatpush.bf16.msra.mxu1 %v6898_v50  ;;  %v7255_v50 = vld [vmem:[%s15727_s1 + $0x678] sm:$0xf0]  ;;  %v7194_v14 = vor.u32 %v9818_v62, %v7191_v61  ;;  %v9830_v62 = vld [vmem:[%s15727_s1 + $0x654] sm:$0xf] }
 0x1da   :  { %5775 = vmatpush.bf16.msra.mxu2 %v6962_v25  ;;  %v6882_v25 = vor.u32 %v9740_v39, %v6879_v1  ;;  %v7258_v26 = vor.u32 %v9834_v43, %v7255_v50  ;;  %v9848_v39 = vld [vmem:[%s15727_s1 + $0x6e4] sm:$0xf]  ;;  %v7311_v1 = vld [vmem:[%s15727_s1 + $0x6e8] sm:$0xf0]  ;;  %v7178_v43 = vor.u32 %v9814_v44, %v7175_v16  ;;  %v7242_v50 = vor.u32 %v9830_v62, %v7239_v5 }
 0x1db   :  { %5788 = vmatpush.bf16.msra.mxu3 %v7026_v49  ;;  %v7010_v49 = vor.u32 %v9772_v37, %v7007_v35  ;;  %v9798_v37 = vld [vmem:[%s15727_s1 + $0x554] sm:$0xf]  ;;  %v7111_v35 = vld [vmem:[%s15727_s1 + $0x558] sm:$0xf0]  ;;  %v7314_v42 = vor.u32 %v9848_v39, %v7311_v1  ;;  %v9792_v16 = vld [vmem:[%s15727_s1 + $0x524] sm:$0xf] }
 0x1dc   :  { %5750 = vmatpush.bf16.msra.mxu0 %v6826_v53  ;;  %v9816_v53 = vld [vmem:[%s15727_s1 + $0x5e4] sm:$0xf]  ;;  %v7114_v61 = vor.u32 %v9798_v37, %v7111_v35  ;;  %v7159_v1 = vld [vmem:[%s15727_s1 + $0x5b8] sm:$0xf0]  ;;  %v7087_v62 = vld [vmem:[%s15727_s1 + $0x528] sm:$0xf0] }
 0x1dd   :  { %5763 = vmatpush.bf16.msra.mxu1 %v6890_v51  ;;  %v9832_v51 = vld [vmem:[%s15727_s1 + $0x664] sm:$0xf]  ;;  %v7287_v37 = vld [vmem:[%s15727_s1 + $0x6b8] sm:$0xf0] }
 0x1de   :  { %5776 = vmatpush.bf16.msra.mxu2 %v6954_v58  ;;  %v7247_v58 = vld [vmem:[%s15727_s1 + $0x668] sm:$0xf0]  ;;  %v9808_v5 = vld [vmem:[%s15727_s1 + $0x5a4] sm:$0xf] }
 0x1df   :  { %5789 = vmatpush.bf16.msra.mxu3 %v7018_v17  ;;  %v7186_v17 = vor.u32 %v9816_v53, %v7183_v63  ;;  %v7250_v12 = vor.u32 %v9832_v51, %v7247_v58  ;;  %v9794_v63 = vld [vmem:[%s15727_s1 + $0x534] sm:$0xf]  ;;  %v7095_v51 = vld [vmem:[%s15727_s1 + $0x538] sm:$0xf0] }
 0x1e0   :  { %5751 = vmatpush.bf16.msra.mxu0 %v6818_v36  ;;  %v7303_v36 = vld [vmem:[%s15727_s1 + $0x6d8] sm:$0xf0]  ;;  %v9810_v58 = vld [vmem:[%s15727_s1 + $0x5b4] sm:$0xf]  ;;  %v7098_v35 = vor.u32 %v9794_v63, %v7095_v51 }
 0x1e1   :  { %5764 = vmatpush.bf16.msra.mxu1 %v6882_v25  ;;  %v9812_v25 = vld [vmem:[%s15727_s1 + $0x5c4] sm:$0xf]  ;;  %v5558_v46 = vpop.f32.mrf.mxu1  ;;  %v7162_v44 = vor.u32 %v9810_v58, %v7159_v1  ;;  %v9822_v63 = vld [vmem:[%s15727_s1 + $0x614] sm:$0xf]  ;;  %v7207_v51 = vld [vmem:[%s15727_s1 + $0x618] sm:$0xf0] }
 0x1e2   :  { %5777 = vmatpush.bf16.msra.mxu2 %v6946_v11  ;;  %v7167_v11 = vld [vmem:[%s15727_s1 + $0x5c8] sm:$0xf0]  ;;  %v9838_v58 = vld [vmem:[%s15727_s1 + $0x694] sm:$0xf]  ;;  %v9788_v1 = vld [vmem:[%s15727_s1 + $0x504] sm:$0xf] }
 0x1e3   :  { %5790 = vmatpush.bf16.msra.mxu3 %v7010_v49  ;;  %5752 = vmatmul.bf16.vlgmr.msra.gmra.mxu0 %v10914_v32  ;;  %v9846_v32 = vld [vmem:[%s15727_s1 + $0x6d4] sm:$0xf]  ;;  %v5545_v49 = vpop.f32.mrf.mxu0  ;;  %v7170_v53 = vor.u32 %v9812_v25, %v7167_v11  ;;  %v9840_v25 = vld [vmem:[%s15727_s1 + $0x6a4] sm:$0xf] }
 0x1e4   :  { %5796 = vmatpush.bf16.msrb.mxu0 %v7130_v56  ;;  %5765 = vmatmul.bf16.vlgmr.msra.gmra.mxu1 %v10924_v40  ;;  %v9796_v40 = vld [vmem:[%s15727_s1 + $0x544] sm:$0xf] }
 0x1e5   :  { %5809 = vmatpush.bf16.msrb.mxu1 %v7194_v14  ;;  %5778 = vmatmul.bf16.vlgmr.msra.gmra.mxu2 %v11122_v21  ;;  %v7103_v21 = vld [vmem:[%s15727_s1 + $0x548] sm:$0xf0]  ;;  %v9844_v56 = vld [vmem:[%s15727_s1 + $0x6c4] sm:$0xf] }
 0x1e6   :  { %5822 = vmatpush.bf16.msrb.mxu2 %v7258_v26  ;;  %5791 = vmatmul.bf16.vlgmr.msra.gmra.mxu3 %v11139_v18  ;;  %v7306_v18 = vor.u32 %v9846_v32, %v7303_v36  ;;  %v7295_v14 = vld [vmem:[%s15727_s1 + $0x6c8] sm:$0xf0]  ;;  %v5546_v26 = vadd.f32 %v5545_v49, %v13598_v23  ;;  %v7106_v4 = vor.u32 %v9796_v40, %v7103_v21 }
 0x1e7   :  { %5835 = vmatpush.bf16.msrb.mxu3 %v7322_v57  ;;  %v7234_v57 = vor.u32 %v9828_v48, %v7231_v55  ;;  %v7298_v23 = vor.u32 %v9844_v56, %v7295_v14  ;;  %v7090_v48 = vor.u32 %v9792_v16, %v7087_v62  ;;  %v7199_v16 = vld [vmem:[%s15727_s1 + $0x608] sm:$0xf0]  ;;  %v9836_v62 = vld [vmem:[%s15727_s1 + $0x684] sm:$0xf] }
 0x1e8   :  { %5797 = vmatpush.bf16.msrb.mxu0 %v7122_v41  ;;  %v5559_v39 = vadd.f32 %v5558_v46, %v5546_v26  ;;  %v9826_v41 = vld [vmem:[%s15727_s1 + $0x634] sm:$0xf]  ;;  %v5571_v36 = vpop.f32.mrf.mxu2 }
 0x1e9   :  { %5810 = vmatpush.bf16.msrb.mxu1 %v7186_v17  ;;  %v7223_v17 = vld [vmem:[%s15727_s1 + $0x638] sm:$0xf0]  ;;  %v5584_v21 = vpop.f32.mrf.mxu3  ;;  %v5560_v55 = vpop.f32.mrf.mxu1  ;;  %v9790_v26 = vld [vmem:[%s15727_s1 + $0x514] sm:$0xf] }
 0x1ea   :  { %5823 = vmatpush.bf16.msrb.mxu2 %v7250_v12  ;;  %v9842_v12 = vld [vmem:[%s15727_s1 + $0x6b4] sm:$0xf]  ;;  %v5572_v40 = vadd.f32 %v5571_v36, %v5559_v39 }
 0x1eb   :  { %5836 = vmatpush.bf16.msrb.mxu3 %v7314_v42  ;;  %v7226_v42 = vor.u32 %v9826_v41, %v7223_v17  ;;  %v7290_v32 = vor.u32 %v9842_v12, %v7287_v37  ;;  %v5547_v11 = vpop.f32.mrf.mxu0  ;;  %v9806_v46 = vld [vmem:[%s15727_s1 + $0x594] sm:$0xf]  ;;  %v7071_v41 = vld [vmem:[%s15727_s1 + $0x508] sm:$0xf0]  ;;  %v7210_v12 = vor.u32 %v9822_v63, %v7207_v51  ;;  %v9804_v37 = vld [vmem:[%s15727_s1 + $0x584] sm:$0xf] }
 0x1ec   :  { %5798 = vmatpush.bf16.msrb.mxu0 %v7114_v61  ;;  %v7151_v61 = vld [vmem:[%s15727_s1 + $0x5a8] sm:$0xf0]  ;;  %v13797_v49 = vadd.f32 %v5584_v21, %v5572_v40  ;;  %v9866_v36 = vld [vmem:[%s15727_s1 + $0x774] sm:$0xf]  ;;  %v7074_v40 = vor.u32 %v9788_v1, %v7071_v41  ;;  %v7447_v21 = vld [vmem:[%s15727_s1 + $0x7f8] sm:$0xf0] }
 0x1ed   :  { %5811 = vmatpush.bf16.msrb.mxu1 %v7178_v43  ;;  %v9824_v43 = vld [vmem:[%s15727_s1 + $0x624] sm:$0xf]  ;;  %v7154_v56 = vor.u32 %v9808_v5, %v7151_v61  ;;  %v7263_v5 = vld [vmem:[%s15727_s1 + $0x688] sm:$0xf0]  ;;  %v7383_v61 = vld [vmem:[%s15727_s1 + $0x778] sm:$0xf0] }
 0x1ee   :  { %5824 = vmatpush.bf16.msrb.mxu2 %v7242_v50  ;;  %v7215_v50 = vld [vmem:[%s15727_s1 + $0x628] sm:$0xf0]  ;;  %v9914_v55 = vld [vmem:[%s15727_s1 + $0x8f4] sm:$0xf]  ;;  %v9880_v63 = vld [vmem:[%s15727_s1 + $0x7e4] sm:$0xf] }
 0x1ef   :  { %5837 = vmatpush.bf16.msrb.mxu3 %v7306_v18  ;;  %v7279_v18 = vld [vmem:[%s15727_s1 + $0x6a8] sm:$0xf0]  ;;  %v7218_v14 = vor.u32 %v9824_v43, %v7215_v50  ;;  %v9882_v43 = vld [vmem:[%s15727_s1 + $0x7f4] sm:$0xf]  ;;  %v9912_v1 = vld [vmem:[%s15727_s1 + $0x8e4] sm:$0xf] }
 0x1f0   :  { %5799 = vmatpush.bf16.msrb.mxu0 %v7106_v4  ;;  %v7079_v4 = vld [vmem:[%s15727_s1 + $0x518] sm:$0xf0]  ;;  %v7567_v41 = vld [vmem:[%s15727_s1 + $0x8e8] sm:$0xf0] }
 0x1f1   :  { %5812 = vmatpush.bf16.msrb.mxu1 %v7170_v53  ;;  %v7282_v53 = vor.u32 %v9840_v25, %v7279_v18  ;;  %v7082_v39 = vor.u32 %v9790_v26, %v7079_v4  ;;  %v5586_v50 = vpop.f32.mrf.mxu3  ;;  %v9898_v25 = vld [vmem:[%s15727_s1 + $0x874] sm:$0xf]  ;;  %v7511_v18 = vld [vmem:[%s15727_s1 + $0x878] sm:$0xf0]  ;;  %v7386_v26 = vor.u32 %v9866_v36, %v7383_v61  ;;  %v7450_v4 = vor.u32 %v9882_v43, %v7447_v21  ;;  %v7423_v21 = vld [vmem:[%s15727_s1 + $0x7c8] sm:$0xf0] }
 0x1f2   :  { %5825 = vmatpush.bf16.msrb.mxu2 %v7234_v57  ;;  %v7143_v57 = vld [vmem:[%s15727_s1 + $0x598] sm:$0xf0] }
 0x1f3   :  { %5838 = vmatpush.bf16.msrb.mxu3 %v7298_v23  ;;  %v7271_v23 = vld [vmem:[%s15727_s1 + $0x698] sm:$0xf0]  ;;  %v7146_v17 = vor.u32 %v9806_v46, %v7143_v57  ;;  %v7514_v46 = vor.u32 %v9898_v25, %v7511_v18  ;;  %v7375_v57 = vld [vmem:[%s15727_s1 + $0x768] sm:$0xf0]  ;;  %v9892_v25 = vld [vmem:[%s15727_s1 + $0x844] sm:$0xf] }
 0x1f4   :  { %5800 = vmatpush.bf16.msrb.mxu0 %v7098_v35  ;;  %v7135_v35 = vld [vmem:[%s15727_s1 + $0x588] sm:$0xf0]  ;;  %v7559_v36 = vld [vmem:[%s15727_s1 + $0x8d8] sm:$0xf0] }
 0x1f5   :  { %5813 = vmatpush.bf16.msrb.mxu1 %v7162_v44  ;;  %v9820_v44 = vld [vmem:[%s15727_s1 + $0x604] sm:$0xf]  ;;  %v7138_v11 = vor.u32 %v9804_v37, %v7135_v35  ;;  %v9862_v35 = vld [vmem:[%s15727_s1 + $0x754] sm:$0xf]  ;;  %v7487_v18 = vld [vmem:[%s15727_s1 + $0x848] sm:$0xf0] }
 0x1f6   :  { %5826 = vmatpush.bf16.msrb.mxu2 %v7226_v42  ;;  %v7274_v42 = vor.u32 %v9838_v58, %v7271_v23  ;;  %v7439_v58 = vld [vmem:[%s15727_s1 + $0x7e8] sm:$0xf0]  ;;  %v9896_v23 = vld [vmem:[%s15727_s1 + $0x864] sm:$0xf] }
 0x1f7   :  { %5839 = vmatpush.bf16.msrb.mxu3 %v7290_v32  ;;  %v5573_v32 = vpop.f32.mrf.mxu2 }
 0x1f8   :  { %5801 = vmatpush.bf16.msrb.mxu0 %v7090_v48  ;;  %v7202_v48 = vor.u32 %v9820_v44, %v7199_v16  ;;  %v7367_v44 = vld [vmem:[%s15727_s1 + $0x758] sm:$0xf0]  ;;  %v7570_v16 = vor.u32 %v9912_v1, %v7567_v41  ;;  %v9906_v1 = vld [vmem:[%s15727_s1 + $0x8b4] sm:$0xf] }
 0x1f9   :  { %5814 = vmatpush.bf16.msrb.mxu1 %v7154_v56  ;;  %v7575_v56 = vld [vmem:[%s15727_s1 + $0x8f8] sm:$0xf0]  ;;  %v7370_v61 = vor.u32 %v9862_v35, %v7367_v44  ;;  %v9856_v35 = vld [vmem:[%s15727_s1 + $0x724] sm:$0xf]  ;;  %v7343_v44 = vld [vmem:[%s15727_s1 + $0x728] sm:$0xf0] }
 0x1fa   :  { %5827 = vmatpush.bf16.msrb.mxu2 %v7218_v14  ;;  %v7266_v14 = vor.u32 %v9836_v62, %v7263_v5  ;;  %v7578_v51 = vor.u32 %v9914_v55, %v7575_v56  ;;  %v7431_v62 = vld [vmem:[%s15727_s1 + $0x7d8] sm:$0xf0]  ;;  %v9894_v5 = vld [vmem:[%s15727_s1 + $0x854] sm:$0xf]  ;;  %v7551_v55 = vld [vmem:[%s15727_s1 + $0x8c8] sm:$0xf0] }
 0x1fb   :  { %5840 = vmatpush.bf16.msrb.mxu3 %v7282_v53  ;;  %v9864_v53 = vld [vmem:[%s15727_s1 + $0x764] sm:$0xf]  ;;  %v7495_v32 = vld [vmem:[%s15727_s1 + $0x858] sm:$0xf0] }
 0x1fc   :  { %5802 = vmatpush.bf16.msrb.mxu0 %v7082_v39  ;;  %v7503_v39 = vld [vmem:[%s15727_s1 + $0x868] sm:$0xf0]  ;;  %v7498_v50 = vor.u32 %v9894_v5, %v7495_v32  ;;  %v7543_v41 = vld [vmem:[%s15727_s1 + $0x8b8] sm:$0xf0]  ;;  %v9888_v32 = vld [vmem:[%s15727_s1 + $0x824] sm:$0xf] }
 0x1fd   :  { %5815 = vmatpush.bf16.msrb.mxu1 %v7146_v17  ;;  %v7378_v17 = vor.u32 %v9864_v53, %v7375_v57  ;;  %v7506_v37 = vor.u32 %v9896_v23, %v7503_v39  ;;  %v9858_v53 = vld [vmem:[%s15727_s1 + $0x734] sm:$0xf]  ;;  %v7351_v57 = vld [vmem:[%s15727_s1 + $0x738] sm:$0xf0]  ;;  %v7407_v5 = vld [vmem:[%s15727_s1 + $0x7a8] sm:$0xf0] }
 0x1fe   :  { %5828 = vmatpush.bf16.msrb.mxu2 %v7210_v12  ;;  %v7442_v12 = vor.u32 %v9880_v63, %v7439_v58  ;;  %v9874_v63 = vld [vmem:[%s15727_s1 + $0x7b4] sm:$0xf]  ;;  %v7415_v58 = vld [vmem:[%s15727_s1 + $0x7b8] sm:$0xf0] }
 0x1ff   :  { %5841 = vmatpush.bf16.msrb.mxu3 %v7274_v42  ;;  %v9878_v42 = vld [vmem:[%s15727_s1 + $0x7d4] sm:$0xf]  ;;  %v7479_v39 = vld [vmem:[%s15727_s1 + $0x838] sm:$0xf0] }
 0x200   :  { %5803 = vmatpush.bf16.msrb.mxu0 %v7074_v40  ;;  %v7434_v43 = vor.u32 %v9878_v42, %v7431_v62  ;;  %v9876_v40 = vld [vmem:[%s15727_s1 + $0x7c4] sm:$0xf]  ;;  %v9890_v23 = vld [vmem:[%s15727_s1 + $0x834] sm:$0xf] }
 0x201   :  { %5816 = vmatpush.bf16.msrb.mxu1 %v7138_v11  ;;  %v5597_v11 = vpop.f32.mrf.mxu0  ;;  %v9872_v42 = vld [vmem:[%s15727_s1 + $0x7a4] sm:$0xf] }
 0x202   :  { %5829 = vmatpush.bf16.msrb.mxu2 %v7202_v48  ;;  %v9908_v48 = vld [vmem:[%s15727_s1 + $0x8c4] sm:$0xf]  ;;  %v5598_v56 = vadd.f32 %v5597_v11, %v13797_v49  ;;  %v7335_v11 = vld [vmem:[%s15727_s1 + $0x718] sm:$0xf0] }
 0x203   :  { %5842 = vmatpush.bf16.msrb.mxu3 %v7266_v14  ;;  %5804 = vmatmul.bf16.vlgmr.msrb.gmra.mxu0 %v11135_v28  ;;  %v9910_v28 = vld [vmem:[%s15727_s1 + $0x8d4] sm:$0xf]  ;;  %v7554_v49 = vor.u32 %v9908_v48, %v7551_v55 }
 0x204   :  { %5848 = vmatpush.bf16.msra.mxu0 %v7386_v26  ;;  %5817 = vmatmul.bf16.vlgmr.msrb.gmra.mxu1 %v11149_v31  ;;  %v9860_v31 = vld [vmem:[%s15727_s1 + $0x744] sm:$0xf]  ;;  %v5610_v26 = vpop.f32.mrf.mxu1  ;;  %v9870_v48 = vld [vmem:[%s15727_s1 + $0x794] sm:$0xf] }
 0x205   :  { %5861 = vmatpush.bf16.msra.mxu1 %v7450_v4  ;;  %5830 = vmatmul.bf16.vlgmr.msrb.gmra.mxu2 %v11345_v24  ;;  %v7359_v24 = vld [vmem:[%s15727_s1 + $0x748] sm:$0xf0]  ;;  %v7426_v4 = vor.u32 %v9876_v40, %v7423_v21  ;;  %v7410_v21 = vor.u32 %v9872_v42, %v7407_v5  ;;  %v9946_v42 = vld [vmem:[%s15727_s1 + $0x9f4] sm:$0xf]  ;;  %v7703_v5 = vld [vmem:[%s15727_s1 + $0x9f8] sm:$0xf0] }
 0x206   :  { %5874 = vmatpush.bf16.msra.mxu2 %v7514_v46  ;;  %5843 = vmatmul.bf16.vlgmr.msrb.gmra.mxu3 %v11362_v59  ;;  %v7562_v59 = vor.u32 %v9910_v28, %v7559_v36  ;;  %v7362_v14 = vor.u32 %v9860_v31, %v7359_v24  ;;  %v7490_v46 = vor.u32 %v9892_v25, %v7487_v18  ;;  %v7471_v28 = vld [vmem:[%s15727_s1 + $0x828] sm:$0xf0]  ;;  %v9854_v18 = vld [vmem:[%s15727_s1 + $0x714] sm:$0xf] }
 0x207   :  { %5887 = vmatpush.bf16.msra.mxu3 %v7578_v51  ;;  %v5611_v51 = vadd.f32 %v5610_v26, %v5598_v56  ;;  %v7346_v24 = vor.u32 %v9856_v35, %v7343_v44  ;;  %v7474_v25 = vor.u32 %v9888_v32, %v7471_v28  ;;  %v7399_v56 = vld [vmem:[%s15727_s1 + $0x798] sm:$0xf0]  ;;  %v9930_v35 = vld [vmem:[%s15727_s1 + $0x974] sm:$0xf] }
 0x208   :  { %5849 = vmatpush.bf16.msra.mxu0 %v7378_v17  ;;  %v7354_v17 = vor.u32 %v9858_v53, %v7351_v57  ;;  %v5623_v62 = vpop.f32.mrf.mxu2  ;;  %v7463_v26 = vld [vmem:[%s15727_s1 + $0x818] sm:$0xf0]  ;;  %v7338_v53 = vor.u32 %v9854_v18, %v7335_v11  ;;  %v9852_v57 = vld [vmem:[%s15727_s1 + $0x704] sm:$0xf]  ;;  %v9962_v32 = vld [vmem:[%s15727_s1 + $0xa74] sm:$0xf] }
 0x209   :  { %5862 = vmatpush.bf16.msra.mxu1 %v7442_v12  ;;  %v7418_v12 = vor.u32 %v9874_v63, %v7415_v58  ;;  %v5624_v36 = vadd.f32 %v5623_v62, %v5611_v51  ;;  %v5599_v31 = vpop.f32.mrf.mxu0  ;;  %v7327_v63 = vld [vmem:[%s15727_s1 + $0x708] sm:$0xf0]  ;;  %v9868_v58 = vld [vmem:[%s15727_s1 + $0x784] sm:$0xf]  ;;  %v7639_v44 = vld [vmem:[%s15727_s1 + $0x978] sm:$0xf0] }
 0x20a   :  { %5875 = vmatpush.bf16.msra.mxu2 %v7506_v37  ;;  %v7482_v37 = vor.u32 %v9890_v23, %v7479_v39  ;;  %v7391_v23 = vld [vmem:[%s15727_s1 + $0x788] sm:$0xf0]  ;;  %v9884_v39 = vld [vmem:[%s15727_s1 + $0x804] sm:$0xf]  ;;  %v7330_v62 = vor.u32 %v9852_v57, %v7327_v63  ;;  %v7767_v28 = vld [vmem:[%s15727_s1 + $0xa78] sm:$0xf0] }
 0x20b   :  { %5888 = vmatpush.bf16.msra.mxu3 %v7570_v16  ;;  %v7546_v16 = vor.u32 %v9906_v1, %v7543_v41  ;;  %v7455_v41 = vld [vmem:[%s15727_s1 + $0x808] sm:$0xf0]  ;;  %v9944_v11 = vld [vmem:[%s15727_s1 + $0x9e4] sm:$0xf]  ;;  %v9926_v63 = vld [vmem:[%s15727_s1 + $0x954] sm:$0xf] }
 0x20c   :  { %5850 = vmatpush.bf16.msra.mxu0 %v7370_v61  ;;  %v5636_v61 = vpop.f32.mrf.mxu3  ;;  %v5612_v40 = vpop.f32.mrf.mxu1  ;;  %v7631_v18 = vld [vmem:[%s15727_s1 + $0x968] sm:$0xf0] }
 0x20d   :  { %5863 = vmatpush.bf16.msra.mxu1 %v7434_v43  ;;  %v9904_v43 = vld [vmem:[%s15727_s1 + $0x8a4] sm:$0xf]  ;;  %v7706_v40 = vor.u32 %v9946_v42, %v7703_v5 }
 0x20e   :  { %5876 = vmatpush.bf16.msra.mxu2 %v7498_v50  ;;  %v7535_v50 = vld [vmem:[%s15727_s1 + $0x8a8] sm:$0xf0]  ;;  %v9956_v42 = vld [vmem:[%s15727_s1 + $0xa44] sm:$0xf] }
 0x20f   :  { %5889 = vmatpush.bf16.msra.mxu3 %v7562_v59  ;;  %v13996_v59 = vadd.f32 %v5636_v61, %v5624_v36  ;;  %v7538_v55 = vor.u32 %v9904_v43, %v7535_v50  ;;  %v7394_v36 = vor.u32 %v9868_v58, %v7391_v23  ;;  %v7458_v61 = vor.u32 %v9884_v39, %v7455_v41  ;;  %v9978_v43 = vld [vmem:[%s15727_s1 + $0xaf4] sm:$0xf]  ;;  %v7831_v50 = vld [vmem:[%s15727_s1 + $0xaf8] sm:$0xf0]  ;;  %v9972_v5 = vld [vmem:[%s15727_s1 + $0xac4] sm:$0xf] }
 0x210   :  { %5851 = vmatpush.bf16.msra.mxu0 %v7362_v14  ;;  %v9886_v14 = vld [vmem:[%s15727_s1 + $0x814] sm:$0xf]  ;;  %v7687_v23 = vld [vmem:[%s15727_s1 + $0x9d8] sm:$0xf0] }
 0x211   :  { %5864 = vmatpush.bf16.msra.mxu1 %v7426_v4  ;;  %v9902_v4 = vld [vmem:[%s15727_s1 + $0x894] sm:$0xf]  ;;  %v7466_v51 = vor.u32 %v9886_v14, %v7463_v26  ;;  %v7759_v14 = vld [vmem:[%s15727_s1 + $0xa68] sm:$0xf0]  ;;  %v9976_v26 = vld [vmem:[%s15727_s1 + $0xae4] sm:$0xf] }
 0x212   :  { %5877 = vmatpush.bf16.msra.mxu2 %v7490_v46  ;;  %v7527_v46 = vld [vmem:[%s15727_s1 + $0x898] sm:$0xf0]  ;;  %v9958_v39 = vld [vmem:[%s15727_s1 + $0xa54] sm:$0xf] }
 0x213   :  { %5890 = vmatpush.bf16.msra.mxu3 %v7554_v49  ;;  %v7402_v49 = vor.u32 %v9870_v48, %v7399_v56  ;;  %v7530_v1 = vor.u32 %v9902_v4, %v7527_v46  ;;  %v7834_v48 = vor.u32 %v9978_v43, %v7831_v50  ;;  %v9960_v56 = vld [vmem:[%s15727_s1 + $0xa64] sm:$0xf]  ;;  %v7823_v4 = vld [vmem:[%s15727_s1 + $0xae8] sm:$0xf0]  ;;  %v7815_v41 = vld [vmem:[%s15727_s1 + $0xad8] sm:$0xf0] }
 0x214   :  { %5852 = vmatpush.bf16.msra.mxu0 %v7354_v17  ;;  %v9900_v17 = vld [vmem:[%s15727_s1 + $0x884] sm:$0xf]  ;;  %v7762_v57 = vor.u32 %v9960_v56, %v7759_v14  ;;  %v7826_v58 = vor.u32 %v9976_v26, %v7823_v4  ;;  %v10433_v56 = vld [vmem:[%s15729_s2] sm:$0x3] }
 0x215   :  { %5865 = vmatpush.bf16.msra.mxu1 %v7418_v12  ;;  %v7519_v12 = vld [vmem:[%s15727_s1 + $0x888] sm:$0xf0]  ;;  %v1013_v14 = vperm.slane %v10433_v56, 1 }
 0x216   :  { %5878 = vmatpush.bf16.msra.mxu2 %v7482_v37  ;;  %v5625_v37 = vpop.f32.mrf.mxu2  ;;  %v7522_v31 = vor.u32 %v9900_v17, %v7519_v12  ;;  %v7775_v56 = vld [vmem:[%s15727_s1 + $0xa88] sm:$0xf0] }
 0x217   :  { %5891 = vmatpush.bf16.msra.mxu3 %v7546_v16  ;;  %v5638_v16 = vpop.f32.mrf.mxu3 }
 0x218   :  { %5853 = vmatpush.bf16.msra.mxu0 %v7346_v24  ;;  %v7642_v24 = vor.u32 %v9930_v35, %v7639_v44  ;;  %v9940_v35 = vld [vmem:[%s15727_s1 + $0x9c4] sm:$0xf]  ;;  %v7679_v44 = vld [vmem:[%s15727_s1 + $0x9c8] sm:$0xf0] }
 0x219   :  { %5866 = vmatpush.bf16.msra.mxu1 %v7410_v21  ;;  %v7770_v21 = vor.u32 %v9962_v32, %v7767_v28  ;;  %v7743_v16 = vld [vmem:[%s15727_s1 + $0xa48] sm:$0xf0]  ;;  %v7682_v43 = vor.u32 %v9940_v35, %v7679_v44  ;;  %v7591_v44 = vld [vmem:[%s15727_s1 + $0x918] sm:$0xf0] }
 0x21a   :  { %5879 = vmatpush.bf16.msra.mxu2 %v7474_v25  ;;  %v9928_v25 = vld [vmem:[%s15727_s1 + $0x964] sm:$0xf]  ;;  %v7807_v32 = vld [vmem:[%s15727_s1 + $0xac8] sm:$0xf0]  ;;  %v7746_v50 = vor.u32 %v9956_v42, %v7743_v16  ;;  %v9934_v42 = vld [vmem:[%s15727_s1 + $0x994] sm:$0xf] }
 0x21b   :  { %5892 = vmatpush.bf16.msra.mxu3 %v7538_v55  ;;  %v7695_v55 = vld [vmem:[%s15727_s1 + $0x9e8] sm:$0xf0]  ;;  %v7634_v46 = vor.u32 %v9928_v25, %v7631_v18  ;;  %v7671_v25 = vld [vmem:[%s15727_s1 + $0x9b8] sm:$0xf0]  ;;  %v9954_v18 = vld [vmem:[%s15727_s1 + $0xa34] sm:$0xf] }
 0x21c   :  { %5854 = vmatpush.bf16.msra.mxu0 %v7338_v53  ;;  %v7698_v53 = vor.u32 %v9944_v11, %v7695_v55  ;;  %v7735_v11 = vld [vmem:[%s15727_s1 + $0xa38] sm:$0xf0] }
 0x21d   :  { %5867 = vmatpush.bf16.msra.mxu1 %v7402_v49  ;;  %v7623_v49 = vld [vmem:[%s15727_s1 + $0x958] sm:$0xf0] }
 0x21e   :  { %5880 = vmatpush.bf16.msra.mxu2 %v7466_v51  ;;  %v9942_v51 = vld [vmem:[%s15727_s1 + $0x9d4] sm:$0xf]  ;;  %v7626_v17 = vor.u32 %v9926_v63, %v7623_v49  ;;  %v7799_v55 = vld [vmem:[%s15727_s1 + $0xab8] sm:$0xf0]  ;;  %v9936_v63 = vld [vmem:[%s15727_s1 + $0x9a4] sm:$0xf] }
 0x21f   :  { %5893 = vmatpush.bf16.msra.mxu3 %v7530_v1  ;;  %v7751_v1 = vld [vmem:[%s15727_s1 + $0xa58] sm:$0xf0]  ;;  %v7690_v12 = vor.u32 %v9942_v51, %v7687_v23  ;;  %v7663_v51 = vld [vmem:[%s15727_s1 + $0x9a8] sm:$0xf0] }
 0x220   :  { %5855 = vmatpush.bf16.msra.mxu0 %v7330_v62  ;;  %v7754_v37 = vor.u32 %v9958_v39, %v7751_v1  ;;  %v5649_v62 = vpop.f32.mrf.mxu0  ;;  %v7727_v23 = vld [vmem:[%s15727_s1 + $0xa28] sm:$0xf0]  ;;  %v9968_v1 = vld [vmem:[%s15727_s1 + $0xaa4] sm:$0xf] }
 0x221   :  { %5868 = vmatpush.bf16.msra.mxu1 %v7394_v36  ;;  %v5650_v28 = vadd.f32 %v5649_v62, %v13996_v59  ;;  %v7810_v59 = vor.u32 %v9972_v5, %v7807_v32  ;;  %v7655_v5 = vld [vmem:[%s15727_s1 + $0x998] sm:$0xf0]  ;;  %v9950_v32 = vld [vmem:[%s15727_s1 + $0xa14] sm:$0xf] }
 0x222   :  { %5881 = vmatpush.bf16.msra.mxu2 %v7458_v61  ;;  %v5662_v61 = vpop.f32.mrf.mxu1 }
 0x223   :  { %5894 = vmatpush.bf16.msra.mxu3 %v7522_v31  ;;  %5856 = vmatmul.bf16.vlgmr.msra.gmra.mxu0 %v11358_v22  ;;  %v9974_v22 = vld [vmem:[%s15727_s1 + $0xad4] sm:$0xf] }
 0x224   :  { %5900 = vmatpush.bf16.msrb.mxu0 %v7642_v24  ;;  %5869 = vmatmul.bf16.vlgmr.msra.gmra.mxu1 %v11372_v34  ;;  %v9924_v34 = vld [vmem:[%s15727_s1 + $0x944] sm:$0xf]  ;;  %v9922_v31 = vld [vmem:[%s15727_s1 + $0x934] sm:$0xf]  ;;  %v7607_v24 = vld [vmem:[%s15727_s1 + $0x938] sm:$0xf0] }
 0x225   :  { %5913 = vmatpush.bf16.msrb.mxu1 %v7706_v40  ;;  %5882 = vmatmul.bf16.vlgmr.msra.gmra.mxu2 %v11555_v33  ;;  %v7615_v33 = vld [vmem:[%s15727_s1 + $0x948] sm:$0xf0]  ;;  %v9938_v40 = vld [vmem:[%s15727_s1 + $0x9b4] sm:$0xf]  ;;  %v7610_v26 = vor.u32 %v9922_v31, %v7607_v24  ;;  %v7658_v24 = vor.u32 %v9934_v42, %v7655_v5 }
 0x226   :  { %5926 = vmatpush.bf16.msrb.mxu2 %v7770_v21  ;;  %5895 = vmatmul.bf16.vlgmr.msra.gmra.mxu3 %v11568_v27  ;;  %v7818_v27 = vor.u32 %v9974_v22, %v7815_v41  ;;  %v7618_v36 = vor.u32 %v9924_v34, %v7615_v33  ;;  %v14156_v21 = vadd.f32 %v5662_v61, %v5650_v28  ;;  %v7791_v22 = vld [vmem:[%s15727_s1 + $0xaa8] sm:$0xf0]  ;;  %v7719_v28 = vld [vmem:[%s15727_s1 + $0xa18] sm:$0xf0] }
 0x227   :  { %5939 = vmatpush.bf16.msrb.mxu3 %v7834_v48  ;;  %v9970_v48 = vld [vmem:[%s15727_s1 + $0xab4] sm:$0xf]  ;;  %v7674_v4 = vor.u32 %v9938_v40, %v7671_v25  ;;  %v7666_v33 = vor.u32 %v9936_v63, %v7663_v51  ;;  %v7794_v62 = vor.u32 %v9968_v1, %v7791_v22  ;;  %v7783_v61 = vld [vmem:[%s15727_s1 + $0xa98] sm:$0xf0]  ;;  %v7583_v31 = vld [vmem:[%s15727_s1 + $0x908] sm:$0xf0]  ;;  %v7722_v40 = vor.u32 %v9950_v32, %v7719_v28 }
 0x228   :  { %5901 = vmatpush.bf16.msrb.mxu0 %v7634_v46  ;;  %v7738_v46 = vor.u32 %v9954_v18, %v7735_v11  ;;  %v7802_v49 = vor.u32 %v9970_v48, %v7799_v55  ;;  %v5675_v39 = vpop.f32.mrf.mxu2  ;;  %v7647_v25 = vld [vmem:[%s15727_s1 + $0x988] sm:$0xf0]  ;;  %v9948_v18 = vld [vmem:[%s15727_s1 + $0xa04] sm:$0xf]  ;;  %v7959_v63 = vld [vmem:[%s15727_s1 + $0xbf8] sm:$0xf0] }
 0x229   :  { %5914 = vmatpush.bf16.msrb.mxu1 %v7698_v53  ;;  %v9920_v53 = vld [vmem:[%s15727_s1 + $0x924] sm:$0xf]  ;;  %v5676_v41 = vadd.f32 %v5675_v39, %v1013_v14  ;;  %v7711_v48 = vld [vmem:[%s15727_s1 + $0xa08] sm:$0xf0]  ;;  %v8023_v51 = vld [vmem:[%s15727_s1 + $0xc78] sm:$0xf0] }
 0x22a   :  { %5927 = vmatpush.bf16.msrb.mxu2 %v7762_v57  ;;  %v7599_v57 = vld [vmem:[%s15727_s1 + $0x928] sm:$0xf0]  ;;  %v5664_v34 = vpop.f32.mrf.mxu1  ;;  %v9964_v55 = vld [vmem:[%s15727_s1 + $0xa84] sm:$0xf]  ;;  %v10042_v39 = vld [vmem:[%s15727_s1 + $0xcf4] sm:$0xf] }
 0x22b   :  { %5940 = vmatpush.bf16.msrb.mxu3 %v7826_v58  ;;  %v9952_v58 = vld [vmem:[%s15727_s1 + $0xa24] sm:$0xf]  ;;  %v8087_v1 = vld [vmem:[%s15727_s1 + $0xcf8] sm:$0xf0]  ;;  %v7778_v22 = vor.u32 %v9964_v55, %v7775_v56  ;;  %v7887_v34 = vld [vmem:[%s15727_s1 + $0xb68] sm:$0xf0] }
 0x22c   :  { %5902 = vmatpush.bf16.msrb.mxu0 %v7626_v17  ;;  %v5688_v17 = vpop.f32.mrf.mxu3  ;;  %v7730_v35 = vor.u32 %v9952_v58, %v7727_v23  ;;  %v7714_v23 = vor.u32 %v9948_v18, %v7711_v48  ;;  %v8015_v42 = vld [vmem:[%s15727_s1 + $0xc68] sm:$0xf0]  ;;  %v10004_v55 = vld [vmem:[%s15727_s1 + $0xbc4] sm:$0xf] }
 0x22d   :  { %5915 = vmatpush.bf16.msrb.mxu1 %v7690_v12  ;;  %v5651_v12 = vpop.f32.mrf.mxu0  ;;  %v14209_v16 = vadd.f32 %v5688_v17, %v5676_v41  ;;  %v8079_v5 = vld [vmem:[%s15727_s1 + $0xce8] sm:$0xf0] }
 0x22e   :  { %5928 = vmatpush.bf16.msrb.mxu2 %v7754_v37  ;;  %v7602_v37 = vor.u32 %v9920_v53, %v7599_v57  ;;  %v7935_v56 = vld [vmem:[%s15727_s1 + $0xbc8] sm:$0xf0] }
 0x22f   :  { %5941 = vmatpush.bf16.msrb.mxu3 %v7818_v27  ;;  %v9918_v27 = vld [vmem:[%s15727_s1 + $0x914] sm:$0xf] }
 0x230   :  { %5903 = vmatpush.bf16.msrb.mxu0 %v7618_v36  ;;  %v9966_v36 = vld [vmem:[%s15727_s1 + $0xa94] sm:$0xf]  ;;  %v5677_v14 = vpop.f32.mrf.mxu2 }
 0x231   :  { %5916 = vmatpush.bf16.msrb.mxu1 %v7682_v43  ;;  %v7594_v43 = vor.u32 %v9918_v27, %v7591_v44  ;;  %v7786_v11 = vor.u32 %v9966_v36, %v7783_v61  ;;  %v7951_v27 = vld [vmem:[%s15727_s1 + $0xbe8] sm:$0xf0]  ;;  %v10024_v44 = vld [vmem:[%s15727_s1 + $0xc64] sm:$0xf]  ;;  %v9990_v61 = vld [vmem:[%s15727_s1 + $0xb54] sm:$0xf] }
 0x232   :  { %5929 = vmatpush.bf16.msrb.mxu2 %v7746_v50  ;;  %v9916_v50 = vld [vmem:[%s15727_s1 + $0x904] sm:$0xf]  ;;  %v8018_v36 = vor.u32 %v10024_v44, %v8015_v42  ;;  %v7855_v42 = vld [vmem:[%s15727_s1 + $0xb28] sm:$0xf0] }
 0x233   :  { %5942 = vmatpush.bf16.msrb.mxu3 %v7810_v59  ;;  %v9932_v59 = vld [vmem:[%s15727_s1 + $0x984] sm:$0xf]  ;;  %v7586_v57 = vor.u32 %v9916_v50, %v7583_v31  ;;  %v10006_v50 = vld [vmem:[%s15727_s1 + $0xbd4] sm:$0xf] }
 0x234   :  { %5904 = vmatpush.bf16.msrb.mxu0 %v7610_v26  ;;  %v9994_v26 = vld [vmem:[%s15727_s1 + $0xb74] sm:$0xf]  ;;  %v5690_v53 = vpop.f32.mrf.mxu3  ;;  %v7650_v58 = vor.u32 %v9932_v59, %v7647_v25  ;;  %v8007_v59 = vld [vmem:[%s15727_s1 + $0xc58] sm:$0xf0]  ;;  %v10020_v14 = vld [vmem:[%s15727_s1 + $0xc44] sm:$0xf] }
 0x235   :  { %5917 = vmatpush.bf16.msrb.mxu1 %v7674_v4  ;;  %v7895_v4 = vld [vmem:[%s15727_s1 + $0xb78] sm:$0xf0]  ;;  %v9984_v44 = vld [vmem:[%s15727_s1 + $0xb24] sm:$0xf] }
 0x236   :  { %5930 = vmatpush.bf16.msrb.mxu2 %v7738_v46  ;;  %v10010_v46 = vld [vmem:[%s15727_s1 + $0xbf4] sm:$0xf]  ;;  %v7898_v41 = vor.u32 %v9994_v26, %v7895_v4  ;;  %v8071_v25 = vld [vmem:[%s15727_s1 + $0xcd8] sm:$0xf0]  ;;  %v7999_v26 = vld [vmem:[%s15727_s1 + $0xc48] sm:$0xf0] }
 0x237   :  { %5943 = vmatpush.bf16.msrb.mxu3 %v7802_v49  ;;  %v10026_v49 = vld [vmem:[%s15727_s1 + $0xc74] sm:$0xf]  ;;  %v7962_v17 = vor.u32 %v10010_v46, %v7959_v63  ;;  %v10036_v4 = vld [vmem:[%s15727_s1 + $0xcc4] sm:$0xf]  ;;  %v8063_v46 = vld [vmem:[%s15727_s1 + $0xcc8] sm:$0xf0]  ;;  %v7938_v63 = vor.u32 %v10004_v55, %v7935_v56 }
 0x238   :  { %5905 = vmatpush.bf16.msrb.mxu0 %v7602_v37  ;;  %v8026_v12 = vor.u32 %v10026_v49, %v8023_v51  ;;  %v9992_v37 = vld [vmem:[%s15727_s1 + $0xb64] sm:$0xf]  ;;  %v8002_v49 = vor.u32 %v10020_v14, %v7999_v26  ;;  %v9986_v51 = vld [vmem:[%s15727_s1 + $0xb34] sm:$0xf]  ;;  %v7975_v14 = vld [vmem:[%s15727_s1 + $0xc18] sm:$0xf0] }
 0x239   :  { %5918 = vmatpush.bf16.msrb.mxu1 %v7666_v33  ;;  %v10008_v33 = vld [vmem:[%s15727_s1 + $0xbe4] sm:$0xf]  ;;  %v7890_v32 = vor.u32 %v9992_v37, %v7887_v34  ;;  %v10034_v37 = vld [vmem:[%s15727_s1 + $0xcb4] sm:$0xf] }
 0x23a   :  { %5931 = vmatpush.bf16.msrb.mxu2 %v7730_v35  ;;  %v8090_v35 = vor.u32 %v10042_v39, %v8087_v1  ;;  %v7954_v28 = vor.u32 %v10008_v33, %v7951_v27  ;;  %v10014_v56 = vld [vmem:[%s15727_s1 + $0xc14] sm:$0xf] }
 0x23b   :  { %5944 = vmatpush.bf16.msrb.mxu3 %v7794_v62  ;;  %v10040_v62 = vld [vmem:[%s15727_s1 + $0xce4] sm:$0xf]  ;;  %v10030_v26 = vld [vmem:[%s15727_s1 + $0xc94] sm:$0xf] }
 0x23c   :  { %5906 = vmatpush.bf16.msrb.mxu0 %v7594_v43  ;;  %v7879_v43 = vld [vmem:[%s15727_s1 + $0xb58] sm:$0xf0]  ;;  %v8082_v31 = vor.u32 %v10040_v62, %v8079_v5  ;;  %v10000_v62 = vld [vmem:[%s15727_s1 + $0xba4] sm:$0xf] }
 0x23d   :  { %5919 = vmatpush.bf16.msrb.mxu1 %v7658_v24  ;;  %v7943_v24 = vld [vmem:[%s15727_s1 + $0xbd8] sm:$0xf0]  ;;  %v7882_v18 = vor.u32 %v9990_v61, %v7879_v43  ;;  %v7983_v61 = vld [vmem:[%s15727_s1 + $0xc28] sm:$0xf0] }
 0x23e   :  { %5932 = vmatpush.bf16.msrb.mxu2 %v7722_v40  ;;  %v10022_v40 = vld [vmem:[%s15727_s1 + $0xc54] sm:$0xf] }
 0x23f   :  { %5945 = vmatpush.bf16.msrb.mxu3 %v7786_v11  ;;  %v7946_v11 = vor.u32 %v10006_v50, %v7943_v24  ;;  %v8010_v48 = vor.u32 %v10022_v40, %v8007_v59  ;;  %v8047_v24 = vld [vmem:[%s15727_s1 + $0xca8] sm:$0xf0]  ;;  %v7858_v40 = vor.u32 %v9984_v44, %v7855_v42  ;;  %v8279_v44 = vld [vmem:[%s15727_s1 + $0xe78] sm:$0xf0] }
 0x240   :  { %5907 = vmatpush.bf16.msrb.mxu0 %v7586_v57  ;;  %v5701_v57 = vpop.f32.mrf.mxu0 }
 0x241   :  { %5920 = vmatpush.bf16.msrb.mxu1 %v7650_v58  ;;  %v7863_v58 = vld [vmem:[%s15727_s1 + $0xb38] sm:$0xf0]  ;;  %v5702_v39 = vadd.f32 %v5701_v57, %v14209_v16  ;;  %v5714_v1 = vpop.f32.mrf.mxu1  ;;  %v7839_v57 = vld [vmem:[%s15727_s1 + $0xb08] sm:$0xf0] }
 0x242   :  { %5933 = vmatpush.bf16.msrb.mxu2 %v7714_v23  ;;  %v10002_v23 = vld [vmem:[%s15727_s1 + $0xbb4] sm:$0xf]  ;;  %v8055_v16 = vld [vmem:[%s15727_s1 + $0xcb8] sm:$0xf0]  ;;  %v7866_v33 = vor.u32 %v9986_v51, %v7863_v58  ;;  %v9996_v51 = vld [vmem:[%s15727_s1 + $0xb84] sm:$0xf] }
 0x243   :  { %5946 = vmatpush.bf16.msrb.mxu3 %v7778_v22  ;;  %5908 = vmatmul.bf16.vlgmr.msrb.gmra.mxu0 %v11566_v38  ;;  %v10038_v38 = vld [vmem:[%s15727_s1 + $0xcd4] sm:$0xf]  ;;  %v8066_v22 = vor.u32 %v10036_v4, %v8063_v46  ;;  %v5715_v34 = vadd.f32 %v5714_v1, %v5702_v39  ;;  %v8039_v4 = vld [vmem:[%s15727_s1 + $0xc98] sm:$0xf0]  ;;  %v7903_v58 = vld [vmem:[%s15727_s1 + $0xb88] sm:$0xf0] }
 0x244   :  { %5952 = vmatpush.bf16.msra.mxu0 %v7898_v41  ;;  %5921 = vmatmul.bf16.vlgmr.msrb.gmra.mxu1 %v11576_v45  ;;  %v9988_v45 = vld [vmem:[%s15727_s1 + $0xb44] sm:$0xf]  ;;  %v7927_v41 = vld [vmem:[%s15727_s1 + $0xbb8] sm:$0xf0]  ;;  %v8042_v1 = vor.u32 %v10030_v26, %v8039_v4  ;;  %v7906_v42 = vor.u32 %v9996_v51, %v7903_v58 }
 0x245   :  { %5965 = vmatpush.bf16.msra.mxu1 %v7962_v17  ;;  %5934 = vmatmul.bf16.vlgmr.msrb.gmra.mxu2 %v11765_v3  ;;  %v7871_v3 = vld [vmem:[%s15727_s1 + $0xb48] sm:$0xf0]  ;;  %v10018_v17 = vld [vmem:[%s15727_s1 + $0xc34] sm:$0xf]  ;;  %v8199_v4 = vld [vmem:[%s15727_s1 + $0xdd8] sm:$0xf0] }
 0x246   :  { %5978 = vmatpush.bf16.msra.mxu2 %v8026_v12  ;;  %5947 = vmatmul.bf16.vlgmr.msrb.gmra.mxu3 %v11778_v9  ;;  %v8074_v9 = vor.u32 %v10038_v38, %v8071_v25  ;;  %v7874_v53 = vor.u32 %v9988_v45, %v7871_v3  ;;  %v7991_v12 = vld [vmem:[%s15727_s1 + $0xc38] sm:$0xf0]  ;;  %v9998_v45 = vld [vmem:[%s15727_s1 + $0xb94] sm:$0xf]  ;;  %v10068_v58 = vld [vmem:[%s15727_s1 + $0xdc4] sm:$0xf] }
 0x247   :  { %5991 = vmatpush.bf16.msra.mxu3 %v8090_v35  ;;  %v7930_v35 = vor.u32 %v10002_v23, %v7927_v41  ;;  %v7994_v27 = vor.u32 %v10018_v17, %v7991_v12  ;;  %v10012_v23 = vld [vmem:[%s15727_s1 + $0xc04] sm:$0xf]  ;;  %v8031_v17 = vld [vmem:[%s15727_s1 + $0xc88] sm:$0xf0] }
 0x248   :  { %5953 = vmatpush.bf16.msra.mxu0 %v7890_v32  ;;  %v5727_v5 = vpop.f32.mrf.mxu2  ;;  %v8058_v32 = vor.u32 %v10034_v37, %v8055_v16  ;;  %v5703_v38 = vpop.f32.mrf.mxu0  ;;  %v10028_v41 = vld [vmem:[%s15727_s1 + $0xc84] sm:$0xf]  ;;  %v10058_v37 = vld [vmem:[%s15727_s1 + $0xd74] sm:$0xf]  ;;  %v8151_v16 = vld [vmem:[%s15727_s1 + $0xd78] sm:$0xf0] }
 0x249   :  { %5966 = vmatpush.bf16.msra.mxu1 %v7954_v28  ;;  %v7919_v28 = vld [vmem:[%s15727_s1 + $0xba8] sm:$0xf0]  ;;  %v5728_v43 = vadd.f32 %v5727_v5, %v5715_v34  ;;  %v5740_v50 = vpop.f32.mrf.mxu3  ;;  %v5716_v3 = vpop.f32.mrf.mxu1  ;;  %v10074_v34 = vld [vmem:[%s15727_s1 + $0xdf4] sm:$0xf] }
 0x24a   :  { %5979 = vmatpush.bf16.msra.mxu2 %v8018_v36  ;;  %v10016_v36 = vld [vmem:[%s15727_s1 + $0xc24] sm:$0xf]  ;;  %v7922_v25 = vor.u32 %v10000_v62, %v7919_v28  ;;  %v10106_v5 = vld [vmem:[%s15727_s1 + $0xef4] sm:$0xf]  ;;  %v8034_v28 = vor.u32 %v10028_v41, %v8031_v17  ;;  %v8207_v38 = vld [vmem:[%s15727_s1 + $0xde8] sm:$0xf0] }
 0x24b   :  { %5992 = vmatpush.bf16.msra.mxu3 %v8082_v31  ;;  %v10032_v31 = vld [vmem:[%s15727_s1 + $0xca4] sm:$0xf]  ;;  %v14399_v59 = vadd.f32 %v5740_v50, %v5728_v43  ;;  %v8319_v17 = vld [vmem:[%s15727_s1 + $0xec8] sm:$0xf0] }
 0x24c   :  { %5954 = vmatpush.bf16.msra.mxu0 %v7882_v18  ;;  %v7986_v18 = vor.u32 %v10016_v36, %v7983_v61  ;;  %v8050_v55 = vor.u32 %v10032_v31, %v8047_v24  ;;  %v8154_v36 = vor.u32 %v10058_v37, %v8151_v16  ;;  %v10056_v50 = vld [vmem:[%s15727_s1 + $0xd64] sm:$0xf]  ;;  %v8143_v31 = vld [vmem:[%s15727_s1 + $0xd68] sm:$0xf0] }
 0x24d   :  { %5967 = vmatpush.bf16.msra.mxu1 %v7946_v11  ;;  %v9982_v11 = vld [vmem:[%s15727_s1 + $0xb14] sm:$0xf]  ;;  %v10072_v24 = vld [vmem:[%s15727_s1 + $0xde4] sm:$0xf] }
 0x24e   :  { %5980 = vmatpush.bf16.msra.mxu2 %v8010_v48  ;;  %v7847_v48 = vld [vmem:[%s15727_s1 + $0xb18] sm:$0xf0]  ;;  %v8210_v3 = vor.u32 %v10072_v24, %v8207_v38  ;;  %v10100_v41 = vld [vmem:[%s15727_s1 + $0xec4] sm:$0xf]  ;;  %v8111_v24 = vld [vmem:[%s15727_s1 + $0xd28] sm:$0xf0] }
 0x24f   :  { %5993 = vmatpush.bf16.msra.mxu3 %v8074_v9  ;;  %v7911_v9 = vld [vmem:[%s15727_s1 + $0xb98] sm:$0xf0]  ;;  %v7850_v46 = vor.u32 %v9982_v11, %v7847_v48  ;;  %v10104_v11 = vld [vmem:[%s15727_s1 + $0xee4] sm:$0xf]  ;;  %v8335_v48 = vld [vmem:[%s15727_s1 + $0xee8] sm:$0xf0] }
 0x250   :  { %5955 = vmatpush.bf16.msra.mxu0 %v7874_v53  ;;  %v9980_v53 = vld [vmem:[%s15727_s1 + $0xb04] sm:$0xf]  ;;  %v5729_v39 = vpop.f32.mrf.mxu2  ;;  %v8338_v26 = vor.u32 %v10104_v11, %v8335_v48  ;;  %v8239_v48 = vld [vmem:[%s15727_s1 + $0xe28] sm:$0xf0] }
 0x251   :  { %5968 = vmatpush.bf16.msra.mxu1 %v7938_v63  ;;  %v7914_v63 = vor.u32 %v9998_v45, %v7911_v9  ;;  %v5742_v12 = vpop.f32.mrf.mxu3  ;;  %v8146_v45 = vor.u32 %v10056_v50, %v8143_v31  ;;  %v10054_v9 = vld [vmem:[%s15727_s1 + $0xd54] sm:$0xf]  ;;  %v10084_v39 = vld [vmem:[%s15727_s1 + $0xe44] sm:$0xf] }
 0x252   :  { %5981 = vmatpush.bf16.msra.mxu2 %v8002_v49  ;;  %v7978_v49 = vor.u32 %v10014_v56, %v7975_v14  ;;  %v8135_v56 = vld [vmem:[%s15727_s1 + $0xd58] sm:$0xf0]  ;;  %v10070_v14 = vld [vmem:[%s15727_s1 + $0xdd4] sm:$0xf]  ;;  %v10048_v31 = vld [vmem:[%s15727_s1 + $0xd24] sm:$0xf] }
 0x253   :  { %5994 = vmatpush.bf16.msra.mxu3 %v8066_v22  ;;  %v7967_v22 = vld [vmem:[%s15727_s1 + $0xc08] sm:$0xf0]  ;;  %v10080_v11 = vld [vmem:[%s15727_s1 + $0xe24] sm:$0xf] }
 0x254   :  { %5956 = vmatpush.bf16.msra.mxu0 %v7866_v33  ;;  %v7842_v33 = vor.u32 %v9980_v53, %v7839_v57  ;;  %v7970_v62 = vor.u32 %v10012_v23, %v7967_v22  ;;  %v8263_v53 = vld [vmem:[%s15727_s1 + $0xe58] sm:$0xf0]  ;;  %v8191_v23 = vld [vmem:[%s15727_s1 + $0xdc8] sm:$0xf0] }
 0x255   :  { %5969 = vmatpush.bf16.msra.mxu1 %v7930_v35  ;;  %v8215_v35 = vld [vmem:[%s15727_s1 + $0xdf8] sm:$0xf0] }
 0x256   :  { %5982 = vmatpush.bf16.msra.mxu2 %v7994_v27  ;;  %v10090_v27 = vld [vmem:[%s15727_s1 + $0xe74] sm:$0xf]  ;;  %v8218_v61 = vor.u32 %v10074_v34, %v8215_v35  ;;  %v8327_v57 = vld [vmem:[%s15727_s1 + $0xed8] sm:$0xf0]  ;;  %v8194_v34 = vor.u32 %v10068_v58, %v8191_v23 }
 0x257   :  { %5995 = vmatpush.bf16.msra.mxu3 %v8058_v32  ;;  %v8343_v32 = vld [vmem:[%s15727_s1 + $0xef8] sm:$0xf0]  ;;  %v8282_v43 = vor.u32 %v10090_v27, %v8279_v44  ;;  %v10050_v35 = vld [vmem:[%s15727_s1 + $0xd34] sm:$0xf] }
 0x258   :  { %5957 = vmatpush.bf16.msra.mxu0 %v7858_v40  ;;  %v8346_v40 = vor.u32 %v10106_v5, %v8343_v32  ;;  %v8119_v27 = vld [vmem:[%s15727_s1 + $0xd38] sm:$0xf0]  ;;  %v10066_v44 = vld [vmem:[%s15727_s1 + $0xdb4] sm:$0xf] }
 0x259   :  { %5970 = vmatpush.bf16.msra.mxu1 %v7922_v25  ;;  %v10088_v25 = vld [vmem:[%s15727_s1 + $0xe64] sm:$0xf]  ;;  %v10082_v5 = vld [vmem:[%s15727_s1 + $0xe34] sm:$0xf]  ;;  %v8247_v32 = vld [vmem:[%s15727_s1 + $0xe38] sm:$0xf0] }
 0x25a   :  { %5983 = vmatpush.bf16.msra.mxu2 %v7986_v18  ;;  %v8271_v18 = vld [vmem:[%s15727_s1 + $0xe68] sm:$0xf0]  ;;  %v8250_v50 = vor.u32 %v10082_v5, %v8247_v32  ;;  %v10094_v58 = vld [vmem:[%s15727_s1 + $0xe94] sm:$0xf]  ;;  %v8471_v32 = vld [vmem:[%s15727_s1 + $0xff8] sm:$0xf0] }
 0x25b   :  { %5996 = vmatpush.bf16.msra.mxu3 %v8050_v55  ;;  %v8274_v55 = vor.u32 %v10088_v25, %v8271_v18  ;;  %v8175_v18 = vld [vmem:[%s15727_s1 + $0xda8] sm:$0xf0] }
 0x25c   :  { %5958 = vmatpush.bf16.msra.mxu0 %v7850_v46  ;;  %v10086_v46 = vld [vmem:[%s15727_s1 + $0xe54] sm:$0xf] }
 0x25d   :  { %5971 = vmatpush.bf16.msra.mxu1 %v7914_v63  ;;  %v8138_v63 = vor.u32 %v10054_v9, %v8135_v56  ;;  %v8266_v51 = vor.u32 %v10086_v46, %v8263_v53  ;;  %v8303_v9 = vld [vmem:[%s15727_s1 + $0xea8] sm:$0xf0]  ;;  %v8242_v53 = vor.u32 %v10080_v11, %v8239_v48  ;;  %v10136_v48 = vld [vmem:[%s15727_s1 + $0xfe4] sm:$0xf] }
 0x25e   :  { %5984 = vmatpush.bf16.msra.mxu2 %v7978_v49  ;;  %v8202_v49 = vor.u32 %v10070_v14, %v8199_v4  ;;  %v8114_v14 = vor.u32 %v10048_v31, %v8111_v24  ;;  %v8599_v31 = vld [vmem:[%s15727_s1 + $0x10f8] sm:$0xf0]  ;;  %v8399_v11 = vld [vmem:[%s15727_s1 + $0xf68] sm:$0xf0] }
 0x25f   :  { %5997 = vmatpush.bf16.msra.mxu3 %v8042_v1  ;;  %v8255_v1 = vld [vmem:[%s15727_s1 + $0xe48] sm:$0xf0] }
 0x260   :  { %5959 = vmatpush.bf16.msra.mxu0 %v7842_v33  ;;  %v5753_v22 = vpop.f32.mrf.mxu0  ;;  %v8258_v33 = vor.u32 %v10084_v39, %v8255_v1  ;;  %v10044_v39 = vld [vmem:[%s15727_s1 + $0xd04] sm:$0xf]  ;;  %v8095_v1 = vld [vmem:[%s15727_s1 + $0xd08] sm:$0xf0] }
 0x261   :  { %5972 = vmatpush.bf16.msra.mxu1 %v7906_v42  ;;  %v5754_v12 = vadd.f32 %v5753_v22, %v14399_v59  ;;  %v5766_v16 = vpop.f32.mrf.mxu1  ;;  %v8322_v59 = vor.u32 %v10100_v41, %v8319_v17  ;;  %v10060_v17 = vld [vmem:[%s15727_s1 + $0xd84] sm:$0xf]  ;;  %v8098_v5 = vor.u32 %v10044_v39, %v8095_v1 }
 0x262   :  { %5985 = vmatpush.bf16.msra.mxu2 %v7970_v62  ;;  %v8183_v62 = vld [vmem:[%s15727_s1 + $0xdb8] sm:$0xf0]  ;;  %v10132_v1 = vld [vmem:[%s15727_s1 + $0xfc4] sm:$0xf] }
 0x263   :  { %5998 = vmatpush.bf16.msra.mxu3 %v8034_v28  ;;  %5960 = vmatmul.bf16.vlgmr.msra.gmra.mxu0 %v11776_v8  ;;  %v10102_v8 = vld [vmem:[%s15727_s1 + $0xed4] sm:$0xf]  ;;  %v5767_v42 = vadd.f32 %v5766_v16, %v5754_v12  ;;  %v8159_v12 = vld [vmem:[%s15727_s1 + $0xd88] sm:$0xf0] }
 0x264   :  { %6004 = vmatpush.bf16.msrb.mxu0 %v8154_v36  ;;  %5973 = vmatmul.bf16.vlgmr.msra.gmra.mxu1 %v11786_v13  ;;  %v10052_v13 = vld [vmem:[%s15727_s1 + $0xd44] sm:$0xf]  ;;  %v10098_v28 = vld [vmem:[%s15727_s1 + $0xeb4] sm:$0xf]  ;;  %v8311_v36 = vld [vmem:[%s15727_s1 + $0xeb8] sm:$0xf0] }
 0x265   :  { %6017 = vmatpush.bf16.msrb.mxu1 %v8218_v61  ;;  %5986 = vmatmul.bf16.vlgmr.msra.gmra.mxu2 %v11974_v2  ;;  %v8127_v2 = vld [vmem:[%s15727_s1 + $0xd48] sm:$0xf0]  ;;  %v8122_v61 = vor.u32 %v10050_v35, %v8119_v27  ;;  %v8314_v38 = vor.u32 %v10098_v28, %v8311_v36  ;;  %v10154_v28 = vld [vmem:[%s15727_s1 + $0x1074] sm:$0xf]  ;;  %v8535_v36 = vld [vmem:[%s15727_s1 + $0x1078] sm:$0xf0] }
 0x266   :  { %6030 = vmatpush.bf16.msrb.mxu2 %v8282_v43  ;;  %5999 = vmatmul.bf16.vlgmr.msra.gmra.mxu3 %v11987_v10  ;;  %v8330_v10 = vor.u32 %v10102_v8, %v8327_v57  ;;  %v8130_v37 = vor.u32 %v10052_v13, %v8127_v2  ;;  %v8186_v43 = vor.u32 %v10066_v44, %v8183_v62  ;;  %v10046_v8 = vld [vmem:[%s15727_s1 + $0xd14] sm:$0xf]  ;;  %v8103_v57 = vld [vmem:[%s15727_s1 + $0xd18] sm:$0xf0]  ;;  %v8287_v35 = vld [vmem:[%s15727_s1 + $0xe88] sm:$0xf0] }
 0x267   :  { %6043 = vmatpush.bf16.msrb.mxu3 %v8346_v40  ;;  %v10064_v40 = vld [vmem:[%s15727_s1 + $0xda4] sm:$0xf]  ;;  %v10078_v13 = vld [vmem:[%s15727_s1 + $0xe14] sm:$0xf]  ;;  %v8231_v2 = vld [vmem:[%s15727_s1 + $0xe18] sm:$0xf0]  ;;  %v8106_v23 = vor.u32 %v10046_v8, %v8103_v57 }
 0x268   :  { %6005 = vmatpush.bf16.msrb.mxu0 %v8146_v45  ;;  %v5779_v25 = vpop.f32.mrf.mxu2  ;;  %v5755_v56 = vpop.f32.mrf.mxu0  ;;  %v8178_v46 = vor.u32 %v10064_v40, %v8175_v18  ;;  %v8234_v41 = vor.u32 %v10078_v13, %v8231_v2  ;;  %v10122_v44 = vld [vmem:[%s15727_s1 + $0xf74] sm:$0xf]  ;;  %v10120_v18 = vld [vmem:[%s15727_s1 + $0xf64] sm:$0xf]  ;;  %v8391_v57 = vld [vmem:[%s15727_s1 + $0xf58] sm:$0xf0] }
 0x269   :  { %6018 = vmatpush.bf16.msrb.mxu1 %v8210_v3  ;;  %v5780_v45 = vadd.f32 %v5779_v25, %v5767_v42  ;;  %v5792_v3 = vpop.f32.mrf.mxu3  ;;  %v10138_v42 = vld [vmem:[%s15727_s1 + $0xff4] sm:$0xf]  ;;  %v8538_v25 = vor.u32 %v10154_v28, %v8535_v36  ;;  %v10168_v56 = vld [vmem:[%s15727_s1 + $0x10e4] sm:$0xf]  ;;  %v8519_v2 = vld [vmem:[%s15727_s1 + $0x1058] sm:$0xf0] }
 0x26a   :  { %6031 = vmatpush.bf16.msrb.mxu2 %v8274_v55  ;;  %v10096_v55 = vld [vmem:[%s15727_s1 + $0xea4] sm:$0xf]  ;;  %v10118_v8 = vld [vmem:[%s15727_s1 + $0xf54] sm:$0xf]  ;;  %v8503_v36 = vld [vmem:[%s15727_s1 + $0x1038] sm:$0xf0] }
 0x26b   :  { %6044 = vmatpush.bf16.msrb.mxu3 %v8338_v26  ;;  %v5768_v26 = vpop.f32.mrf.mxu1  ;;  %v14598_v4 = vadd.f32 %v5792_v3, %v5780_v45  ;;  %v8463_v3 = vld [vmem:[%s15727_s1 + $0xfe8] sm:$0xf0]  ;;  %v10150_v13 = vld [vmem:[%s15727_s1 + $0x1054] sm:$0xf] }
 0x26c   :  { %6006 = vmatpush.bf16.msrb.mxu0 %v8138_v63  ;;  %v10062_v63 = vld [vmem:[%s15727_s1 + $0xd94] sm:$0xf]  ;;  %v8402_v26 = vor.u32 %v10120_v18, %v8399_v11  ;;  %v8522_v39 = vor.u32 %v10150_v13, %v8519_v2 }
 0x26d   :  { %6019 = vmatpush.bf16.msrb.mxu1 %v8202_v49  ;;  %v8306_v49 = vor.u32 %v10096_v55, %v8303_v9  ;;  %v10152_v55 = vld [vmem:[%s15727_s1 + $0x1064] sm:$0xf]  ;;  %v8527_v9 = vld [vmem:[%s15727_s1 + $0x1068] sm:$0xf0]  ;;  %v10146_v28 = vld [vmem:[%s15727_s1 + $0x1034] sm:$0xf] }
 0x26e   :  { %6032 = vmatpush.bf16.msrb.mxu2 %v8266_v51  ;;  %v8167_v51 = vld [vmem:[%s15727_s1 + $0xd98] sm:$0xf0]  ;;  %v10126_v13 = vld [vmem:[%s15727_s1 + $0xf94] sm:$0xf] }
 0x26f   :  { %6045 = vmatpush.bf16.msrb.mxu3 %v8330_v10  ;;  %v8295_v10 = vld [vmem:[%s15727_s1 + $0xe98] sm:$0xf0]  ;;  %v8170_v22 = vor.u32 %v10062_v63, %v8167_v51  ;;  %v10134_v63 = vld [vmem:[%s15727_s1 + $0xfd4] sm:$0xf] }
 0x270   :  { %6007 = vmatpush.bf16.msrb.mxu0 %v8130_v37  ;;  %v10076_v37 = vld [vmem:[%s15727_s1 + $0xe04] sm:$0xf]  ;;  %v8298_v16 = vor.u32 %v10094_v58, %v8295_v10  ;;  %v5781_v27 = vpop.f32.mrf.mxu2  ;;  %v8455_v51 = vld [vmem:[%s15727_s1 + $0xfd8] sm:$0xf0]  ;;  %v8394_v10 = vor.u32 %v10118_v8, %v8391_v57 }
 0x271   :  { %6020 = vmatpush.bf16.msrb.mxu1 %v8194_v34  ;;  %v8223_v34 = vld [vmem:[%s15727_s1 + $0xe08] sm:$0xf0]  ;;  %v5794_v62 = vpop.f32.mrf.mxu3  ;;  %v8583_v58 = vld [vmem:[%s15727_s1 + $0x10d8] sm:$0xf0] }
 0x272   :  { %6033 = vmatpush.bf16.msrb.mxu2 %v8258_v33  ;;  %v10092_v33 = vld [vmem:[%s15727_s1 + $0xe84] sm:$0xf]  ;;  %v10130_v62 = vld [vmem:[%s15727_s1 + $0xfb4] sm:$0xf] }
 0x273   :  { %6046 = vmatpush.bf16.msrb.mxu3 %v8322_v59  ;;  %v8407_v59 = vld [vmem:[%s15727_s1 + $0xf78] sm:$0xf0]  ;;  %v8290_v24 = vor.u32 %v10092_v33, %v8287_v35 }
 0x274   :  { %6008 = vmatpush.bf16.msrb.mxu0 %v8122_v61  ;;  %v8162_v61 = vor.u32 %v10060_v17, %v8159_v12  ;;  %v8410_v40 = vor.u32 %v10122_v44, %v8407_v59  ;;  %v8511_v17 = vld [vmem:[%s15727_s1 + $0x1048] sm:$0xf0]  ;;  %v10114_v59 = vld [vmem:[%s15727_s1 + $0xf34] sm:$0xf] }
 0x275   :  { %6021 = vmatpush.bf16.msrb.mxu1 %v8186_v43  ;;  %v8226_v43 = vor.u32 %v10076_v37, %v8223_v34  ;;  %v10164_v37 = vld [vmem:[%s15727_s1 + $0x10c4] sm:$0xf] }
 0x276   :  { %6034 = vmatpush.bf16.msrb.mxu2 %v8250_v50  ;;  %v10170_v50 = vld [vmem:[%s15727_s1 + $0x10f4] sm:$0xf] }
 0x277   :  { %6047 = vmatpush.bf16.msrb.mxu3 %v8314_v38  ;;  %v8474_v38 = vor.u32 %v10138_v42, %v8471_v32  ;;  %v8602_v45 = vor.u32 %v10170_v50, %v8599_v31  ;;  %v8375_v42 = vld [vmem:[%s15727_s1 + $0xf38] sm:$0xf0] }
 0x278   :  { %6009 = vmatpush.bf16.msrb.mxu0 %v8114_v14  ;;  %v8591_v14 = vld [vmem:[%s15727_s1 + $0x10e8] sm:$0xf0]  ;;  %v8439_v32 = vld [vmem:[%s15727_s1 + $0xfb8] sm:$0xf0]  ;;  %v8378_v50 = vor.u32 %v10114_v59, %v8375_v42  ;;  %v10202_v59 = vld [vmem:[%s15727_s1 + $0x11f4] sm:$0xf] }
 0x279   :  { %6022 = vmatpush.bf16.msrb.mxu1 %v8178_v46  ;;  %v8466_v46 = vor.u32 %v10136_v48, %v8463_v3  ;;  %v8442_v31 = vor.u32 %v10130_v62, %v8439_v32  ;;  %v8431_v48 = vld [vmem:[%s15727_s1 + $0xfa8] sm:$0xf0]  ;;  %v8791_v32 = vld [vmem:[%s15727_s1 + $0x1278] sm:$0xf0] }
 0x27a   :  { %6035 = vmatpush.bf16.msrb.mxu2 %v8242_v53  ;;  %v8530_v53 = vor.u32 %v10152_v55, %v8527_v9  ;;  %v8495_v3 = vld [vmem:[%s15727_s1 + $0x1028] sm:$0xf0] }
 0x27b   :  { %6048 = vmatpush.bf16.msrb.mxu3 %v8306_v49  ;;  %v8594_v49 = vor.u32 %v10168_v56, %v8591_v14  ;;  %v10160_v56 = vld [vmem:[%s15727_s1 + $0x10a4] sm:$0xf]  ;;  %v8559_v14 = vld [vmem:[%s15727_s1 + $0x10a8] sm:$0xf0] }
 0x27c   :  { %6010 = vmatpush.bf16.msrb.mxu0 %v8106_v23  ;;  %v8458_v23 = vor.u32 %v10134_v63, %v8455_v51  ;;  %v8359_v51 = vld [vmem:[%s15727_s1 + $0xf18] sm:$0xf0]  ;;  %v8562_v2 = vor.u32 %v10160_v56, %v8559_v14 }
 0x27d   :  { %6023 = vmatpush.bf16.msrb.mxu1 %v8170_v22  ;;  %v8447_v22 = vld [vmem:[%s15727_s1 + $0xfc8] sm:$0xf0] }
 0x27e   :  { %6036 = vmatpush.bf16.msrb.mxu2 %v8234_v41  ;;  %v10148_v41 = vld [vmem:[%s15727_s1 + $0x1044] sm:$0xf]  ;;  %v8450_v27 = vor.u32 %v10132_v1, %v8447_v22  ;;  %v8351_v1 = vld [vmem:[%s15727_s1 + $0xf08] sm:$0xf0] }
 0x27f   :  { %6049 = vmatpush.bf16.msrb.mxu3 %v8298_v16  ;;  %v8575_v16 = vld [vmem:[%s15727_s1 + $0x10c8] sm:$0xf0]  ;;  %v8514_v44 = vor.u32 %v10148_v41, %v8511_v17  ;;  %v10124_v41 = vld [vmem:[%s15727_s1 + $0xf84] sm:$0xf] }
 0x280   :  { %6011 = vmatpush.bf16.msrb.mxu0 %v8098_v5  ;;  %v5805_v12 = vpop.f32.mrf.mxu0  ;;  %v8415_v17 = vld [vmem:[%s15727_s1 + $0xf88] sm:$0xf0] }
 0x281   :  { %6024 = vmatpush.bf16.msrb.mxu1 %v8162_v61  ;;  %v5806_v34 = vadd.f32 %v5805_v12, %v14598_v4  ;;  %v5818_v35 = vpop.f32.mrf.mxu1  ;;  %v8578_v4 = vor.u32 %v10164_v37, %v8575_v16  ;;  %v10162_v61 = vld [vmem:[%s15727_s1 + $0x10b4] sm:$0xf]  ;;  %v10140_v12 = vld [vmem:[%s15727_s1 + $0x1004] sm:$0xf]  ;;  %v8479_v16 = vld [vmem:[%s15727_s1 + $0x1008] sm:$0xf0] }
 0x282   :  { %6037 = vmatpush.bf16.msrb.mxu2 %v8226_v43  ;;  %v8567_v43 = vld [vmem:[%s15727_s1 + $0x10b8] sm:$0xf0] }
 0x283   :  { %6050 = vmatpush.bf16.msrb.mxu3 %v8290_v24  ;;  %6012 = vmatmul.bf16.vlgmr.msrb.gmra.mxu0 %v11985_v7  ;;  %v10166_v7 = vld [vmem:[%s15727_s1 + $0x10d4] sm:$0xf]  ;;  %v5819_v5 = vadd.f32 %v5818_v35, %v5806_v34  ;;  %v8506_v24 = vor.u32 %v10146_v28, %v8503_v36  ;;  %v8570_v18 = vor.u32 %v10162_v61, %v8567_v43  ;;  %v10156_v34 = vld [vmem:[%s15727_s1 + $0x1084] sm:$0xf]  ;;  %v8855_v43 = vld [vmem:[%s15727_s1 + $0x12f8] sm:$0xf0] }
 0x284   :  { %6056 = vmatpush.bf16.msra.mxu0 %v8410_v40  ;;  %6025 = vmatmul.bf16.vlgmr.msrb.gmra.mxu1 %v11995_v15  ;;  %v10116_v15 = vld [vmem:[%s15727_s1 + $0xf44] sm:$0xf]  ;;  %v8418_v28 = vor.u32 %v10124_v41, %v8415_v17  ;;  %v8482_v36 = vor.u32 %v10140_v12, %v8479_v16  ;;  %v10234_v61 = vld [vmem:[%s15727_s1 + $0x12f4] sm:$0xf] }
 0x285   :  { %6069 = vmatpush.bf16.msra.mxu1 %v8474_v38  ;;  %6038 = vmatmul.bf16.vlgmr.msrb.gmra.mxu2 %v12190_v19  ;;  %v8383_v19 = vld [vmem:[%s15727_s1 + $0xf48] sm:$0xf0]  ;;  %v10112_v40 = vld [vmem:[%s15727_s1 + $0xf24] sm:$0xf] }
 0x286   :  { %6082 = vmatpush.bf16.msra.mxu2 %v8538_v25  ;;  %6051 = vmatmul.bf16.vlgmr.msrb.gmra.mxu3 %v12203_v30  ;;  %v8586_v30 = vor.u32 %v10166_v7, %v8583_v58  ;;  %v8386_v33 = vor.u32 %v10116_v15, %v8383_v19  ;;  %v8367_v38 = vld [vmem:[%s15727_s1 + $0xf28] sm:$0xf0]  ;;  %v10128_v25 = vld [vmem:[%s15727_s1 + $0xfa4] sm:$0xf]  ;;  %v8423_v7 = vld [vmem:[%s15727_s1 + $0xf98] sm:$0xf0] }
 0x287   :  { %6095 = vmatpush.bf16.msra.mxu3 %v8602_v45  ;;  %v10144_v45 = vld [vmem:[%s15727_s1 + $0x1024] sm:$0xf]  ;;  %v8434_v57 = vor.u32 %v10128_v25, %v8431_v48  ;;  %v10142_v58 = vld [vmem:[%s15727_s1 + $0x1014] sm:$0xf]  ;;  %v8655_v25 = vld [vmem:[%s15727_s1 + $0x1168] sm:$0xf0] }
 0x288   :  { %6057 = vmatpush.bf16.msra.mxu0 %v8402_v26  ;;  %v5831_v11 = vpop.f32.mrf.mxu2  ;;  %v5807_v26 = vpop.f32.mrf.mxu0  ;;  %v8498_v63 = vor.u32 %v10144_v45, %v8495_v3  ;;  %v10108_v19 = vld [vmem:[%s15727_s1 + $0xf04] sm:$0xf]  ;;  %v8719_v48 = vld [vmem:[%s15727_s1 + $0x11e8] sm:$0xf0] }
 0x289   :  { %6070 = vmatpush.bf16.msra.mxu1 %v8466_v46  ;;  %v5832_v55 = vadd.f32 %v5831_v11, %v5819_v5  ;;  %v5844_v9 = vpop.f32.mrf.mxu3  ;;  %v8370_v46 = vor.u32 %v10112_v40, %v8367_v38  ;;  %v8354_v62 = vor.u32 %v10108_v19, %v8351_v1  ;;  %v10218_v5 = vld [vmem:[%s15727_s1 + $0x1274] sm:$0xf]  ;;  %v10184_v38 = vld [vmem:[%s15727_s1 + $0x1164] sm:$0xf]  ;;  %v8858_v11 = vor.u32 %v10234_v61, %v8855_v43  ;;  %v8783_v3 = vld [vmem:[%s15727_s1 + $0x1268] sm:$0xf0] }
 0x28a   :  { %6083 = vmatpush.bf16.msra.mxu2 %v8530_v53  ;;  %v5820_v53 = vpop.f32.mrf.mxu1  ;;  %v8794_v40 = vor.u32 %v10218_v5, %v8791_v32  ;;  %v10216_v45 = vld [vmem:[%s15727_s1 + $0x1264] sm:$0xf]  ;;  %v8658_v56 = vor.u32 %v10184_v38, %v8655_v25  ;;  %v8767_v19 = vld [vmem:[%s15727_s1 + $0x1248] sm:$0xf0] }
 0x28b   :  { %6096 = vmatpush.bf16.msra.mxu3 %v8594_v49  ;;  %v14797_v8 = vadd.f32 %v5844_v9, %v5832_v55  ;;  %v10110_v49 = vld [vmem:[%s15727_s1 + $0xf14] sm:$0xf]  ;;  %v10232_v55 = vld [vmem:[%s15727_s1 + $0x12e4] sm:$0xf]  ;;  %v8847_v9 = vld [vmem:[%s15727_s1 + $0x12e8] sm:$0xf0]  ;;  %v8786_v26 = vor.u32 %v10216_v45, %v8783_v3 }
 0x28c   :  { %6058 = vmatpush.bf16.msra.mxu0 %v8394_v10  ;;  %v8487_v10 = vld [vmem:[%s15727_s1 + $0x1018] sm:$0xf0]  ;;  %v8362_v15 = vor.u32 %v10110_v49, %v8359_v51  ;;  %v10214_v51 = vld [vmem:[%s15727_s1 + $0x1254] sm:$0xf]  ;;  %v8623_v61 = vld [vmem:[%s15727_s1 + $0x1128] sm:$0xf0] }
 0x28d   :  { %6071 = vmatpush.bf16.msra.mxu1 %v8458_v23  ;;  %v10158_v23 = vld [vmem:[%s15727_s1 + $0x1094] sm:$0xf]  ;;  %v8490_v22 = vor.u32 %v10142_v58, %v8487_v10  ;;  %v8647_v53 = vld [vmem:[%s15727_s1 + $0x1158] sm:$0xf0]  ;;  %v10192_v43 = vld [vmem:[%s15727_s1 + $0x11a4] sm:$0xf] }
 0x28e   :  { %6084 = vmatpush.bf16.msra.mxu2 %v8522_v39  ;;  %v8551_v39 = vld [vmem:[%s15727_s1 + $0x1098] sm:$0xf0]  ;;  %v8751_v38 = vld [vmem:[%s15727_s1 + $0x1228] sm:$0xf0] }
 0x28f   :  { %6097 = vmatpush.bf16.msra.mxu3 %v8586_v30  ;;  %v8426_v30 = vor.u32 %v10126_v13, %v8423_v7  ;;  %v8554_v37 = vor.u32 %v10158_v23, %v8551_v39  ;;  %v8711_v49 = vld [vmem:[%s15727_s1 + $0x11d8] sm:$0xf0]  ;;  %v10196_v23 = vld [vmem:[%s15727_s1 + $0x11c4] sm:$0xf]  ;;  %v8703_v39 = vld [vmem:[%s15727_s1 + $0x11c8] sm:$0xf0] }
 0x290   :  { %6059 = vmatpush.bf16.msra.mxu0 %v8386_v33  ;;  %v8543_v33 = vld [vmem:[%s15727_s1 + $0x1088] sm:$0xf0]  ;;  %v5833_v35 = vpop.f32.mrf.mxu2  ;;  %v8775_v13 = vld [vmem:[%s15727_s1 + $0x1258] sm:$0xf0] }
 0x291   :  { %6072 = vmatpush.bf16.msra.mxu1 %v8450_v27  ;;  %v10186_v27 = vld [vmem:[%s15727_s1 + $0x1174] sm:$0xf]  ;;  %v5846_v42 = vpop.f32.mrf.mxu3  ;;  %v8778_v10 = vor.u32 %v10214_v51, %v8775_v13  ;;  %v8743_v51 = vld [vmem:[%s15727_s1 + $0x1218] sm:$0xf0] }
 0x292   :  { %6085 = vmatpush.bf16.msra.mxu2 %v8514_v44  ;;  %v8663_v44 = vld [vmem:[%s15727_s1 + $0x1178] sm:$0xf0]  ;;  %v10194_v35 = vld [vmem:[%s15727_s1 + $0x11b4] sm:$0xf] }
 0x293   :  { %6098 = vmatpush.bf16.msra.mxu3 %v8578_v4  ;;  %v8727_v4 = vld [vmem:[%s15727_s1 + $0x11f8] sm:$0xf0]  ;;  %v10222_v13 = vld [vmem:[%s15727_s1 + $0x1294] sm:$0xf] }
 0x294   :  { %6060 = vmatpush.bf16.msra.mxu0 %v8378_v50  ;;  %v8546_v50 = vor.u32 %v10156_v34, %v8543_v33  ;;  %v10178_v34 = vld [vmem:[%s15727_s1 + $0x1134] sm:$0xf]  ;;  %v8631_v33 = vld [vmem:[%s15727_s1 + $0x1138] sm:$0xf0] }
 0x295   :  { %6073 = vmatpush.bf16.msra.mxu1 %v8442_v31  ;;  %v8666_v31 = vor.u32 %v10186_v27, %v8663_v44  ;;  %v8695_v44 = vld [vmem:[%s15727_s1 + $0x11b8] sm:$0xf0]  ;;  %v8634_v5 = vor.u32 %v10178_v34, %v8631_v33  ;;  %v10282_v34 = vld [vmem:[%s15727_s1 + $0x1474] sm:$0xf] }
 0x296   :  { %6086 = vmatpush.bf16.msra.mxu2 %v8506_v24  ;;  %v8730_v24 = vor.u32 %v10202_v59, %v8727_v4  ;;  %v10210_v59 = vld [vmem:[%s15727_s1 + $0x1234] sm:$0xf]  ;;  %v8759_v42 = vld [vmem:[%s15727_s1 + $0x1238] sm:$0xf0]  ;;  %v8698_v32 = vor.u32 %v10194_v35, %v8695_v44 }
 0x297   :  { %6099 = vmatpush.bf16.msra.mxu3 %v8570_v18  ;;  %v10200_v18 = vld [vmem:[%s15727_s1 + $0x11e4] sm:$0xf]  ;;  %v8823_v4 = vld [vmem:[%s15727_s1 + $0x12b8] sm:$0xf0] }
 0x298   :  { %6061 = vmatpush.bf16.msra.mxu0 %v8370_v46  ;;  %v8722_v14 = vor.u32 %v10200_v18, %v8719_v48  ;;  %v10182_v46 = vld [vmem:[%s15727_s1 + $0x1154] sm:$0xf]  ;;  %v8815_v48 = vld [vmem:[%s15727_s1 + $0x12a8] sm:$0xf0]  ;;  %v9047_v33 = vld [vmem:[%s15727_s1 + $0x1478] sm:$0xf0] }
 0x299   :  { %6074 = vmatpush.bf16.msra.mxu1 %v8434_v57  ;;  %v10198_v57 = vld [vmem:[%s15727_s1 + $0x11d4] sm:$0xf]  ;;  %v8650_v7 = vor.u32 %v10182_v46, %v8647_v53  ;;  %v8615_v46 = vld [vmem:[%s15727_s1 + $0x1118] sm:$0xf0] }
 0x29a   :  { %6087 = vmatpush.bf16.msra.mxu2 %v8498_v63  ;;  %v8850_v63 = vor.u32 %v10232_v55, %v8847_v9  ;;  %v8714_v58 = vor.u32 %v10198_v57, %v8711_v49  ;;  %v10190_v53 = vld [vmem:[%s15727_s1 + $0x1194] sm:$0xf]  ;;  %v9111_v44 = vld [vmem:[%s15727_s1 + $0x14f8] sm:$0xf0] }
 0x29b   :  { %6100 = vmatpush.bf16.msra.mxu3 %v8562_v2  ;;  %v8839_v2 = vld [vmem:[%s15727_s1 + $0x12d8] sm:$0xf0]  ;;  %v10206_v49 = vld [vmem:[%s15727_s1 + $0x1214] sm:$0xf] }
 0x29c   :  { %6062 = vmatpush.bf16.msra.mxu0 %v8362_v15  ;;  %v10212_v15 = vld [vmem:[%s15727_s1 + $0x1244] sm:$0xf] }
 0x29d   :  { %6075 = vmatpush.bf16.msra.mxu1 %v8426_v30  ;;  %v10228_v30 = vld [vmem:[%s15727_s1 + $0x12c4] sm:$0xf]  ;;  %v8770_v16 = vor.u32 %v10212_v15, %v8767_v19  ;;  %v8735_v15 = vld [vmem:[%s15727_s1 + $0x1208] sm:$0xf0] }
 0x29e   :  { %6088 = vmatpush.bf16.msra.mxu2 %v8490_v22  ;;  %v8831_v22 = vld [vmem:[%s15727_s1 + $0x12c8] sm:$0xf0]  ;;  %v10220_v19 = vld [vmem:[%s15727_s1 + $0x1284] sm:$0xf] }
 0x29f   :  { %6101 = vmatpush.bf16.msra.mxu3 %v8554_v37  ;;  %v8706_v37 = vor.u32 %v10196_v23, %v8703_v39  ;;  %v8671_v23 = vld [vmem:[%s15727_s1 + $0x1188] sm:$0xf0] }
 0x2a0   :  { %6063 = vmatpush.bf16.msra.mxu0 %v8354_v62  ;;  %v5857_v1 = vpop.f32.mrf.mxu0  ;;  %v10226_v62 = vld [vmem:[%s15727_s1 + $0x12b4] sm:$0xf] }
 0x2a1   :  { %6076 = vmatpush.bf16.msra.mxu1 %v8418_v28  ;;  %v5858_v41 = vadd.f32 %v5857_v1, %v14797_v8  ;;  %v5870_v12 = vpop.f32.mrf.mxu1  ;;  %v8834_v8 = vor.u32 %v10228_v30, %v8831_v22  ;;  %v8762_v28 = vor.u32 %v10210_v59, %v8759_v42  ;;  %v8799_v1 = vld [vmem:[%s15727_s1 + $0x1288] sm:$0xf0]  ;;  %v10250_v22 = vld [vmem:[%s15727_s1 + $0x1374] sm:$0xf] }
 0x2a2   :  { %6089 = vmatpush.bf16.msra.mxu2 %v8482_v36  ;;  %v10176_v36 = vld [vmem:[%s15727_s1 + $0x1124] sm:$0xf]  ;;  %v8802_v59 = vor.u32 %v10220_v19, %v8799_v1 }
 0x2a3   :  { %6102 = vmatpush.bf16.msra.mxu3 %v8546_v50  ;;  %6064 = vmatmul.bf16.vlgmr.msra.gmra.mxu0 %v12201_v29  ;;  %v10230_v29 = vld [vmem:[%s15727_s1 + $0x12d4] sm:$0xf]  ;;  %v5871_v27 = vadd.f32 %v5870_v12, %v5858_v41  ;;  %v8826_v50 = vor.u32 %v10226_v62, %v8823_v4  ;;  %v8626_v3 = vor.u32 %v10176_v36, %v8623_v61  ;;  %v8919_v41 = vld [vmem:[%s15727_s1 + $0x1378] sm:$0xf0]  ;;  %v8975_v61 = vld [vmem:[%s15727_s1 + $0x13e8] sm:$0xf0] }
 0x2a4   :  { %6108 = vmatpush.bf16.msrb.mxu0 %v8666_v31  ;;  %6077 = vmatmul.bf16.vlgmr.msra.gmra.mxu1 %v12214_v0  ;;  %v10180_v0 = vld [vmem:[%s15727_s1 + $0x1144] sm:$0xf]  ;;  %v8922_v42 = vor.u32 %v10250_v22, %v8919_v41  ;;  %v9050_v4 = vor.u32 %v10282_v34, %v9047_v33  ;;  %v10242_v41 = vld [vmem:[%s15727_s1 + $0x1334] sm:$0xf]  ;;  %v9015_v33 = vld [vmem:[%s15727_s1 + $0x1438] sm:$0xf0] }
 0x2a5   :  { %6121 = vmatpush.bf16.msrb.mxu1 %v8730_v24  ;;  %6090 = vmatmul.bf16.vlgmr.msra.gmra.mxu2 %v12413_v20  ;;  %v8639_v20 = vld [vmem:[%s15727_s1 + $0x1148] sm:$0xf0]  ;;  %v10274_v34 = vld [vmem:[%s15727_s1 + $0x1434] sm:$0xf] }
 0x2a6   :  { %6134 = vmatpush.bf16.msrb.mxu2 %v8794_v40  ;;  %6103 = vmatmul.bf16.vlgmr.msra.gmra.mxu3 %v12430_v52  ;;  %v8842_v52 = vor.u32 %v10230_v29, %v8839_v2  ;;  %v8642_v17 = vor.u32 %v10180_v0, %v8639_v20  ;;  %v8687_v24 = vld [vmem:[%s15727_s1 + $0x11a8] sm:$0xf0]  ;;  %v10208_v40 = vld [vmem:[%s15727_s1 + $0x1224] sm:$0xf]  ;;  %v8807_v29 = vld [vmem:[%s15727_s1 + $0x1298] sm:$0xf0]  ;;  %v8746_v0 = vor.u32 %v10206_v49, %v8743_v51 }
 0x2a7   :  { %6147 = vmatpush.bf16.msrb.mxu3 %v8858_v11  ;;  %v10224_v11 = vld [vmem:[%s15727_s1 + $0x12a4] sm:$0xf]  ;;  %v8810_v39 = vor.u32 %v10222_v13, %v8807_v29 }
 0x2a8   :  { %6109 = vmatpush.bf16.msrb.mxu0 %v8658_v56  ;;  %v5883_v31 = vpop.f32.mrf.mxu2  ;;  %v5859_v45 = vpop.f32.mrf.mxu0  ;;  %v8690_v56 = vor.u32 %v10192_v43, %v8687_v24  ;;  %v8818_v57 = vor.u32 %v10224_v11, %v8815_v48  ;;  %v10188_v20 = vld [vmem:[%s15727_s1 + $0x1184] sm:$0xf]  ;;  %v9103_v24 = vld [vmem:[%s15727_s1 + $0x14e8] sm:$0xf0]  ;;  %v8903_v11 = vld [vmem:[%s15727_s1 + $0x1358] sm:$0xf0] }
 0x2a9   :  { %6122 = vmatpush.bf16.msrb.mxu1 %v8722_v14  ;;  %v5884_v25 = vadd.f32 %v5883_v31, %v5871_v27  ;;  %v5896_v18 = vpop.f32.mrf.mxu3  ;;  %v5872_v55 = vpop.f32.mrf.mxu1  ;;  %v8754_v14 = vor.u32 %v10208_v40, %v8751_v38  ;;  %v8674_v35 = vor.u32 %v10188_v20, %v8671_v23  ;;  %v10298_v27 = vld [vmem:[%s15727_s1 + $0x14f4] sm:$0xf]  ;;  %v10280_v43 = vld [vmem:[%s15727_s1 + $0x1464] sm:$0xf]  ;;  %v15757_v45 = vld [vmem:[#allocation2_spill] sm:$0xff] }
 0x2aa   :  { %6135 = vmatpush.bf16.msrb.mxu2 %v8786_v26  ;;  %v10174_v26 = vld [vmem:[%s15727_s1 + $0x1114] sm:$0xf]  ;;  %v9114_v36 = vor.u32 %v10298_v27, %v9111_v44  ;;  %v10296_v31 = vld [vmem:[%s15727_s1 + $0x14e4] sm:$0xf]  ;;  %v8967_v55 = vld [vmem:[%s15727_s1 + $0x13d8] sm:$0xf0] }
 0x2ab   :  { %6148 = vmatpush.bf16.msrb.mxu3 %v8850_v63  ;;  %v14996_v9 = vadd.f32 %v5896_v18, %v5884_v25  ;;  %v8679_v63 = vld [vmem:[%s15727_s1 + $0x1198] sm:$0xf0]  ;;  %v8618_v2 = vor.u32 %v10174_v26, %v8615_v46  ;;  %v10246_v18 = vld [vmem:[%s15727_s1 + $0x1354] sm:$0xf]  ;;  %v10244_v29 = vld [vmem:[%s15727_s1 + $0x1344] sm:$0xf] }
 0x2ac   :  { %6110 = vmatpush.bf16.msrb.mxu0 %v8650_v7  ;;  %v10172_v7 = vld [vmem:[%s15727_s1 + $0x1104] sm:$0xf]  ;;  %v10262_v48 = vld [vmem:[%s15727_s1 + $0x13d4] sm:$0xf]  ;;  %v15758_v26 = vld [vmem:[#allocation4_spill] sm:$0xff]  ;;  %v8906_v49 = vor.u32 %v10246_v18, %v8903_v11 }
 0x2ad   :  { %6123 = vmatpush.bf16.msrb.mxu1 %v8714_v58  ;;  %v8607_v58 = vld [vmem:[%s15727_s1 + $0x1108] sm:$0xf0]  ;;  %v15759_v46 = vld [vmem:[#allocation3_spill] sm:$0xff]  ;;  %v8970_v51 = vor.u32 %v10262_v48, %v8967_v55 }
 0x2ae   :  { %6136 = vmatpush.bf16.msrb.mxu2 %v8778_v10  ;;  %v8682_v10 = vor.u32 %v10190_v53, %v8679_v63  ;;  %v10294_v53 = vld [vmem:[%s15727_s1 + $0x14d4] sm:$0xf]  ;;  %v15760_v63 = vld [vmem:[#allocation6_spill] sm:$0xff] }
 0x2af   :  { %6149 = vmatpush.bf16.msrb.mxu3 %v8842_v52  ;;  %v10204_v52 = vld [vmem:[%s15727_s1 + $0x1204] sm:$0xf]  ;;  %v9023_v20 = vld [vmem:[%s15727_s1 + $0x1448] sm:$0xf0]  ;;  %v10254_v55 = vld [vmem:[%s15727_s1 + $0x1394] sm:$0xf] }
 0x2b0   :  { %6111 = vmatpush.bf16.msrb.mxu0 %v8642_v17  ;;  %v5885_v30 = vpop.f32.mrf.mxu2  ;;  %v10266_v17 = vld [vmem:[%s15727_s1 + $0x13f4] sm:$0xf] }
 0x2b1   :  { %6124 = vmatpush.bf16.msrb.mxu1 %v8706_v37  ;;  %v5898_v12 = vpop.f32.mrf.mxu3  ;;  %v8610_v37 = vor.u32 %v10172_v7, %v8607_v58  ;;  %v10260_v7 = vld [vmem:[%s15727_s1 + $0x13c4] sm:$0xf] }
 0x2b2   :  { %6137 = vmatpush.bf16.msrb.mxu2 %v8770_v16  ;;  %v8983_v16 = vld [vmem:[%s15727_s1 + $0x13f8] sm:$0xf0]  ;;  %v10258_v12 = vld [vmem:[%s15727_s1 + $0x13b4] sm:$0xf] }
 0x2b3   :  { %6150 = vmatpush.bf16.msrb.mxu3 %v8834_v8  ;;  %v8738_v8 = vor.u32 %v10204_v52, %v8735_v15  ;;  %v8986_v62 = vor.u32 %v10266_v17, %v8983_v16  ;;  %v10292_v52 = vld [vmem:[%s15727_s1 + $0x14c4] sm:$0xf]  ;;  %v8887_v17 = vld [vmem:[%s15727_s1 + $0x1338] sm:$0xf0] }
 0x2b4   :  { %6112 = vmatpush.bf16.msrb.mxu0 %v8634_v5  ;;  %v10248_v5 = vld [vmem:[%s15727_s1 + $0x1364] sm:$0xf]  ;;  %v8951_v16 = vld [vmem:[%s15727_s1 + $0x13b8] sm:$0xf0]  ;;  %v8890_v27 = vor.u32 %v10242_v41, %v8887_v17  ;;  %v10346_v41 = vld [vmem:[%s15727_s1 + $0x1674] sm:$0xf] }
 0x2b5   :  { %6125 = vmatpush.bf16.msrb.mxu1 %v8698_v32  ;;  %v8911_v32 = vld [vmem:[%s15727_s1 + $0x1368] sm:$0xf0]  ;;  %v8954_v44 = vor.u32 %v10258_v12, %v8951_v16  ;;  %v9303_v17 = vld [vmem:[%s15727_s1 + $0x1678] sm:$0xf0] }
 0x2b6   :  { %6138 = vmatpush.bf16.msrb.mxu2 %v8762_v28  ;;  %v10264_v28 = vld [vmem:[%s15727_s1 + $0x13e4] sm:$0xf]  ;;  %v8914_v40 = vor.u32 %v10248_v5, %v8911_v32  ;;  %v9367_v16 = vld [vmem:[%s15727_s1 + $0x16f8] sm:$0xf0] }
 0x2b7   :  { %6151 = vmatpush.bf16.msrb.mxu3 %v8826_v50  ;;  %v9039_v50 = vld [vmem:[%s15727_s1 + $0x1468] sm:$0xf0]  ;;  %v8978_v38 = vor.u32 %v10264_v28, %v8975_v61 }
 0x2b8   :  { %6113 = vmatpush.bf16.msrb.mxu0 %v8626_v3  ;;  %v9042_v25 = vor.u32 %v10280_v43, %v9039_v50  ;;  %v9106_v3 = vor.u32 %v10296_v31, %v9103_v24  ;;  %v8943_v28 = vld [vmem:[%s15727_s1 + $0x13a8] sm:$0xf0]  ;;  %v10288_v31 = vld [vmem:[%s15727_s1 + $0x14a4] sm:$0xf] }
 0x2b9   :  { %6126 = vmatpush.bf16.msrb.mxu1 %v8690_v56  ;;  %v10278_v56 = vld [vmem:[%s15727_s1 + $0x1454] sm:$0xf]  ;;  %v9007_v61 = vld [vmem:[%s15727_s1 + $0x1428] sm:$0xf0] }
 0x2ba   :  { %6139 = vmatpush.bf16.msrb.mxu2 %v8754_v14  ;;  %v9031_v14 = vld [vmem:[%s15727_s1 + $0x1458] sm:$0xf0]  ;;  %v9071_v24 = vld [vmem:[%s15727_s1 + $0x14a8] sm:$0xf0] }
 0x2bb   :  { %6152 = vmatpush.bf16.msrb.mxu3 %v8818_v57  ;;  %v9095_v57 = vld [vmem:[%s15727_s1 + $0x14d8] sm:$0xf0]  ;;  %v9034_v13 = vor.u32 %v10278_v56, %v9031_v14  ;;  %v9074_v56 = vor.u32 %v10288_v31, %v9071_v24  ;;  %v10326_v24 = vld [vmem:[%s15727_s1 + $0x15d4] sm:$0xf] }
 0x2bc   :  { %6114 = vmatpush.bf16.msrb.mxu0 %v8618_v2  ;;  %v8895_v2 = vld [vmem:[%s15727_s1 + $0x1348] sm:$0xf0]  ;;  %v9098_v58 = vor.u32 %v10294_v53, %v9095_v57  ;;  %v8935_v14 = vld [vmem:[%s15727_s1 + $0x1398] sm:$0xf0]  ;;  %v10286_v53 = vld [vmem:[%s15727_s1 + $0x1494] sm:$0xf] }
 0x2bd   :  { %6127 = vmatpush.bf16.msrb.mxu1 %v8682_v10  ;;  %v8959_v10 = vld [vmem:[%s15727_s1 + $0x13c8] sm:$0xf0]  ;;  %v8898_v19 = vor.u32 %v10244_v29, %v8895_v2  ;;  %v9063_v57 = vld [vmem:[%s15727_s1 + $0x1498] sm:$0xf0]  ;;  %v10252_v2 = vld [vmem:[%s15727_s1 + $0x1384] sm:$0xf] }
 0x2be   :  { %6140 = vmatpush.bf16.msrb.mxu2 %v8746_v0  ;;  %v10276_v0 = vld [vmem:[%s15727_s1 + $0x1444] sm:$0xf]  ;;  %v8962_v30 = vor.u32 %v10260_v7, %v8959_v10  ;;  %v8927_v7 = vld [vmem:[%s15727_s1 + $0x1388] sm:$0xf0]  ;;  %v9066_v10 = vor.u32 %v10286_v53, %v9063_v57  ;;  %v9159_v31 = vld [vmem:[%s15727_s1 + $0x1558] sm:$0xf0] }
 0x2bf   :  { %6153 = vmatpush.bf16.msrb.mxu3 %v8810_v39  ;;  %v9087_v39 = vld [vmem:[%s15727_s1 + $0x14c8] sm:$0xf0]  ;;  %v9026_v22 = vor.u32 %v10276_v0, %v9023_v20  ;;  %v10284_v20 = vld [vmem:[%s15727_s1 + $0x1484] sm:$0xf]  ;;  %v8930_v12 = vor.u32 %v10252_v2, %v8927_v7 }
 0x2c0   :  { %6115 = vmatpush.bf16.msrb.mxu0 %v8610_v37  ;;  %v5909_v23 = vpop.f32.mrf.mxu0  ;;  %v8991_v0 = vld [vmem:[%s15727_s1 + $0x1408] sm:$0xf0]  ;;  %v10308_v57 = vld [vmem:[%s15727_s1 + $0x1544] sm:$0xf] }
 0x2c1   :  { %6128 = vmatpush.bf16.msrb.mxu1 %v8674_v35  ;;  %v5910_v15 = vadd.f32 %v5909_v23, %v14996_v9  ;;  %v5922_v1 = vpop.f32.mrf.mxu1  ;;  %v9090_v9 = vor.u32 %v10292_v52, %v9087_v39  ;;  %v10290_v35 = vld [vmem:[%s15727_s1 + $0x14b4] sm:$0xf]  ;;  %v9055_v23 = vld [vmem:[%s15727_s1 + $0x1488] sm:$0xf0] }
 0x2c2   :  { %6141 = vmatpush.bf16.msrb.mxu2 %v8738_v8  ;;  %v9079_v8 = vld [vmem:[%s15727_s1 + $0x14b8] sm:$0xf0]  ;;  %v10314_v39 = vld [vmem:[%s15727_s1 + $0x1574] sm:$0xf]  ;;  %v9279_v2 = vld [vmem:[%s15727_s1 + $0x1648] sm:$0xf0] }
 0x2c3   :  { %6154 = vmatpush.bf16.msrb.mxu3 %v8802_v59  ;;  %6116 = vmatmul.bf16.vlgmr.msrb.gmra.mxu0 %v15757_v45  ;;  %v5923_v37 = vadd.f32 %v5922_v1, %v5910_v15  ;;  %v9018_v59 = vor.u32 %v10274_v34, %v9015_v33  ;;  %v9082_v5 = vor.u32 %v10290_v35, %v9079_v8  ;;  %v10238_v45 = vld [vmem:[%s15727_s1 + $0x1314] sm:$0xf]  ;;  %v9175_v15 = vld [vmem:[%s15727_s1 + $0x1578] sm:$0xf0] }
 0x2c4   :  { %6160 = vmatpush.bf16.msra.mxu0 %v8922_v42  ;;  %6129 = vmatmul.bf16.vlgmr.msrb.gmra.mxu1 %v15759_v46  ;;  %v10240_v42 = vld [vmem:[%s15727_s1 + $0x1324] sm:$0xf]  ;;  %v8999_v46 = vld [vmem:[%s15727_s1 + $0x1418] sm:$0xf0]  ;;  %v9058_v34 = vor.u32 %v10284_v20, %v9055_v23  ;;  %v9178_v33 = vor.u32 %v10314_v39, %v9175_v15  ;;  %v9306_v8 = vor.u32 %v10346_v41, %v9303_v17  ;;  %v10306_v15 = vld [vmem:[%s15727_s1 + $0x1534] sm:$0xf] }
 0x2c5   :  { %6173 = vmatpush.bf16.msra.mxu1 %v8986_v62  ;;  %6142 = vmatmul.bf16.vlgmr.msrb.gmra.mxu2 %v15758_v26  ;;  %v8879_v62 = vld [vmem:[%s15727_s1 + $0x1328] sm:$0xf0]  ;;  %v10270_v26 = vld [vmem:[%s15727_s1 + $0x1414] sm:$0xf]  ;;  %v9271_v17 = vld [vmem:[%s15727_s1 + $0x1638] sm:$0xf0] }
 0x2c6   :  { %6186 = vmatpush.bf16.msra.mxu2 %v9050_v4  ;;  %6155 = vmatmul.bf16.vlgmr.msrb.gmra.mxu3 %v15760_v63  ;;  %v10256_v4 = vld [vmem:[%s15727_s1 + $0x13a4] sm:$0xf]  ;;  %v9002_v29 = vor.u32 %v10270_v26, %v8999_v46  ;;  %v10338_v41 = vld [vmem:[%s15727_s1 + $0x1634] sm:$0xf] }
 0x2c7   :  { %6199 = vmatpush.bf16.msra.mxu3 %v9114_v36  ;;  %v10272_v36 = vld [vmem:[%s15727_s1 + $0x1424] sm:$0xf]  ;;  %v8946_v11 = vor.u32 %v10256_v4, %v8943_v28  ;;  %v9359_v28 = vld [vmem:[%s15727_s1 + $0x16e8] sm:$0xf0] }
 0x2c8   :  { %6161 = vmatpush.bf16.msra.mxu0 %v8914_v40  ;;  %v5935_v32 = vpop.f32.mrf.mxu2  ;;  %v5911_v40 = vpop.f32.mrf.mxu0  ;;  %v9010_v48 = vor.u32 %v10272_v36, %v9007_v61  ;;  %v10344_v4 = vld [vmem:[%s15727_s1 + $0x1664] sm:$0xf] }
 0x2c9   :  { %6174 = vmatpush.bf16.msra.mxu1 %v8978_v38  ;;  %v5936_v43 = vadd.f32 %v5935_v32, %v5923_v37  ;;  %v5948_v50 = vpop.f32.mrf.mxu3  ;;  %v8882_v38 = vor.u32 %v10240_v42, %v8879_v62  ;;  %v10362_v37 = vld [vmem:[%s15727_s1 + $0x16f4] sm:$0xf]  ;;  %v9231_v62 = vld [vmem:[%s15727_s1 + $0x15e8] sm:$0xf0]  ;;  %v10360_v32 = vld [vmem:[%s15727_s1 + $0x16e4] sm:$0xf] }
 0x2ca   :  { %6187 = vmatpush.bf16.msra.mxu2 %v9042_v25  ;;  %v5924_v25 = vpop.f32.mrf.mxu1  ;;  %v9370_v42 = vor.u32 %v10362_v37, %v9367_v16  ;;  %v15761_v40 = vld [vmem:[#allocation5_spill] sm:$0xff] }
 0x2cb   :  { %6200 = vmatpush.bf16.msra.mxu3 %v9106_v3  ;;  %v15195_v18 = vadd.f32 %v5948_v50, %v5936_v43  ;;  %v8871_v3 = vld [vmem:[%s15727_s1 + $0x1318] sm:$0xf0]  ;;  %v10310_v50 = vld [vmem:[%s15727_s1 + $0x1554] sm:$0xf] }
 0x2cc   :  { %6162 = vmatpush.bf16.msra.mxu0 %v8906_v49  ;;  %v8874_v63 = vor.u32 %v10238_v45, %v8871_v3  ;;  %v10236_v49 = vld [vmem:[%s15727_s1 + $0x1304] sm:$0xf]  ;;  %v9223_v25 = vld [vmem:[%s15727_s1 + $0x15d8] sm:$0xf0]  ;;  %v15763_v3 = vld [vmem:[#allocation7_spill] sm:$0xff]  ;;  %v9162_v26 = vor.u32 %v10310_v50, %v9159_v31 }
 0x2cd   :  { %6175 = vmatpush.bf16.msra.mxu1 %v8970_v51  ;;  %v8863_v51 = vld [vmem:[%s15727_s1 + $0x1308] sm:$0xf0]  ;;  %v15762_v45 = vld [vmem:[#allocation8_spill] sm:$0xff]  ;;  %v9226_v46 = vor.u32 %v10326_v24, %v9223_v25  ;;  %v10318_v25 = vld [vmem:[%s15727_s1 + $0x1594] sm:$0xf] }
 0x2ce   :  { %6188 = vmatpush.bf16.msra.mxu2 %v9034_v13  ;;  %v8938_v13 = vor.u32 %v10254_v55, %v8935_v14  ;;  %v10358_v55 = vld [vmem:[%s15727_s1 + $0x16d4] sm:$0xf]  ;;  %v15764_v14 = vld [vmem:[#allocation10_spill] sm:$0xff] }
 0x2cf   :  { %6201 = vmatpush.bf16.msra.mxu3 %v9098_v58  ;;  %v10268_v58 = vld [vmem:[%s15727_s1 + $0x1404] sm:$0xf] }
 0x2d0   :  { %6163 = vmatpush.bf16.msra.mxu0 %v8898_v19  ;;  %v5937_v52 = vpop.f32.mrf.mxu2  ;;  %v10330_v19 = vld [vmem:[%s15727_s1 + $0x15f4] sm:$0xf] }
 0x2d1   :  { %6176 = vmatpush.bf16.msra.mxu1 %v8962_v30  ;;  %v5950_v1 = vpop.f32.mrf.mxu3  ;;  %v8866_v30 = vor.u32 %v10236_v49, %v8863_v51  ;;  %v10324_v49 = vld [vmem:[%s15727_s1 + $0x15c4] sm:$0xf] }
 0x2d2   :  { %6189 = vmatpush.bf16.msra.mxu2 %v9026_v22  ;;  %v9239_v22 = vld [vmem:[%s15727_s1 + $0x15f8] sm:$0xf0]  ;;  %v10322_v1 = vld [vmem:[%s15727_s1 + $0x15b4] sm:$0xf] }
 0x2d3   :  { %6202 = vmatpush.bf16.msra.mxu3 %v9090_v9  ;;  %v8994_v9 = vor.u32 %v10268_v58, %v8991_v0  ;;  %v9242_v35 = vor.u32 %v10330_v19, %v9239_v22  ;;  %v10356_v58 = vld [vmem:[%s15727_s1 + $0x16c4] sm:$0xf]  ;;  %v9143_v19 = vld [vmem:[%s15727_s1 + $0x1538] sm:$0xf0] }
 0x2d4   :  { %6164 = vmatpush.bf16.msra.mxu0 %v8890_v27  ;;  %v10312_v27 = vld [vmem:[%s15727_s1 + $0x1564] sm:$0xf]  ;;  %v9207_v22 = vld [vmem:[%s15727_s1 + $0x15b8] sm:$0xf0]  ;;  %v9146_v37 = vor.u32 %v10306_v15, %v9143_v19  ;;  %v10410_v15 = vld [vmem:[%s15727_s1 + $0x1874] sm:$0xf] }
 0x2d5   :  { %6177 = vmatpush.bf16.msra.mxu1 %v8954_v44  ;;  %v9167_v44 = vld [vmem:[%s15727_s1 + $0x1568] sm:$0xf0]  ;;  %v9210_v16 = vor.u32 %v10322_v1, %v9207_v22  ;;  %v9559_v19 = vld [vmem:[%s15727_s1 + $0x1878] sm:$0xf0] }
 0x2d6   :  { %6190 = vmatpush.bf16.msra.mxu2 %v9018_v59  ;;  %v10328_v59 = vld [vmem:[%s15727_s1 + $0x15e4] sm:$0xf]  ;;  %v9170_v36 = vor.u32 %v10312_v27, %v9167_v44  ;;  %v9623_v22 = vld [vmem:[%s15727_s1 + $0x18f8] sm:$0xf0] }
 0x2d7   :  { %6203 = vmatpush.bf16.msra.mxu3 %v9082_v5  ;;  %v9295_v5 = vld [vmem:[%s15727_s1 + $0x1668] sm:$0xf0]  ;;  %v9234_v61 = vor.u32 %v10328_v59, %v9231_v62 }
 0x2d8   :  { %6165 = vmatpush.bf16.msra.mxu0 %v8882_v38  ;;  %v9298_v43 = vor.u32 %v10344_v4, %v9295_v5  ;;  %v9362_v38 = vor.u32 %v10360_v32, %v9359_v28  ;;  %v9199_v59 = vld [vmem:[%s15727_s1 + $0x15a8] sm:$0xf0]  ;;  %v10352_v32 = vld [vmem:[%s15727_s1 + $0x16a4] sm:$0xf] }
 0x2d9   :  { %6178 = vmatpush.bf16.msra.mxu1 %v8946_v11  ;;  %v10342_v11 = vld [vmem:[%s15727_s1 + $0x1654] sm:$0xf]  ;;  %v9263_v62 = vld [vmem:[%s15727_s1 + $0x1628] sm:$0xf0] }
 0x2da   :  { %6191 = vmatpush.bf16.msra.mxu2 %v9010_v48  ;;  %v9287_v48 = vld [vmem:[%s15727_s1 + $0x1658] sm:$0xf0]  ;;  %v9327_v28 = vld [vmem:[%s15727_s1 + $0x16a8] sm:$0xf0] }
 0x2db   :  { %6204 = vmatpush.bf16.msra.mxu3 %v9074_v56  ;;  %v9351_v56 = vld [vmem:[%s15727_s1 + $0x16d8] sm:$0xf0]  ;;  %v9290_v53 = vor.u32 %v10342_v11, %v9287_v48  ;;  %v9330_v11 = vor.u32 %v10352_v32, %v9327_v28  ;;  %v10390_v28 = vld [vmem:[%s15727_s1 + $0x17d4] sm:$0xf] }
 0x2dc   :  { %6166 = vmatpush.bf16.msra.mxu0 %v8874_v63  ;;  %v9151_v63 = vld [vmem:[%s15727_s1 + $0x1548] sm:$0xf0]  ;;  %v9354_v51 = vor.u32 %v10358_v55, %v9351_v56  ;;  %v9191_v48 = vld [vmem:[%s15727_s1 + $0x1598] sm:$0xf0]  ;;  %v10350_v55 = vld [vmem:[%s15727_s1 + $0x1694] sm:$0xf] }
 0x2dd   :  { %6179 = vmatpush.bf16.msra.mxu1 %v8938_v13  ;;  %v9215_v13 = vld [vmem:[%s15727_s1 + $0x15c8] sm:$0xf0]  ;;  %v9154_v20 = vor.u32 %v10308_v57, %v9151_v63  ;;  %v9319_v56 = vld [vmem:[%s15727_s1 + $0x1698] sm:$0xf0]  ;;  %v10316_v63 = vld [vmem:[%s15727_s1 + $0x1584] sm:$0xf] }
 0x2de   :  { %6192 = vmatpush.bf16.msra.mxu2 %v9002_v29  ;;  %v10340_v29 = vld [vmem:[%s15727_s1 + $0x1644] sm:$0xf]  ;;  %v9218_v52 = vor.u32 %v10324_v49, %v9215_v13  ;;  %v9183_v49 = vld [vmem:[%s15727_s1 + $0x1588] sm:$0xf0]  ;;  %v9322_v13 = vor.u32 %v10350_v55, %v9319_v56  ;;  %v9415_v32 = vld [vmem:[%s15727_s1 + $0x1758] sm:$0xf0] }
 0x2df   :  { %6205 = vmatpush.bf16.msra.mxu3 %v9066_v10  ;;  %v9343_v10 = vld [vmem:[%s15727_s1 + $0x16c8] sm:$0xf0]  ;;  %v9282_v39 = vor.u32 %v10340_v29, %v9279_v2  ;;  %v10348_v2 = vld [vmem:[%s15727_s1 + $0x1684] sm:$0xf]  ;;  %v9186_v1 = vor.u32 %v10316_v63, %v9183_v49 }
 0x2e0   :  { %6167 = vmatpush.bf16.msra.mxu0 %v8866_v30  ;;  %v5961_v7 = vpop.f32.mrf.mxu0  ;;  %v9247_v29 = vld [vmem:[%s15727_s1 + $0x1608] sm:$0xf0]  ;;  %v10388_v55 = vld [vmem:[%s15727_s1 + $0x17c4] sm:$0xf] }
 0x2e1   :  { %6180 = vmatpush.bf16.msra.mxu1 %v8930_v12  ;;  %v5962_v0 = vadd.f32 %v5961_v7, %v15195_v18  ;;  %v5974_v23 = vpop.f32.mrf.mxu1  ;;  %v9346_v18 = vor.u32 %v10356_v58, %v9343_v10  ;;  %v10354_v12 = vld [vmem:[%s15727_s1 + $0x16b4] sm:$0xf]  ;;  %v9311_v7 = vld [vmem:[%s15727_s1 + $0x1688] sm:$0xf0] }
 0x2e2   :  { %6193 = vmatpush.bf16.msra.mxu2 %v8994_v9  ;;  %v9335_v9 = vld [vmem:[%s15727_s1 + $0x16b8] sm:$0xf0]  ;;  %v10378_v10 = vld [vmem:[%s15727_s1 + $0x1774] sm:$0xf]  ;;  %v9471_v56 = vld [vmem:[%s15727_s1 + $0x17c8] sm:$0xf0] }
 0x2e3   :  { %6206 = vmatpush.bf16.msra.mxu3 %v9058_v34  ;;  %6168 = vmatmul.bf16.vlgmr.msra.gmra.mxu0 %v15761_v40  ;;  %v5975_v30 = vadd.f32 %v5974_v23, %v5962_v0  ;;  %v9274_v34 = vor.u32 %v10338_v41, %v9271_v17  ;;  %v9338_v27 = vor.u32 %v10354_v12, %v9335_v9  ;;  %v10302_v40 = vld [vmem:[%s15727_s1 + $0x1514] sm:$0xf]  ;;  %v9431_v0 = vld [vmem:[%s15727_s1 + $0x1778] sm:$0xf0] }
 0x2e4   :  { %6212 = vmatpush.bf16.msrb.mxu0 %v9178_v33  ;;  %6181 = vmatmul.bf16.vlgmr.msra.gmra.mxu1 %v15763_v3  ;;  %v10304_v33 = vld [vmem:[%s15727_s1 + $0x1524] sm:$0xf]  ;;  %v9255_v3 = vld [vmem:[%s15727_s1 + $0x1618] sm:$0xf0]  ;;  %v9314_v41 = vor.u32 %v10348_v2, %v9311_v7  ;;  %v9434_v17 = vor.u32 %v10378_v10, %v9431_v0  ;;  %v9562_v9 = vor.u32 %v10410_v15, %v9559_v19  ;;  %v10370_v2 = vld [vmem:[%s15727_s1 + $0x1734] sm:$0xf] }
 0x2e5   :  { %6225 = vmatpush.bf16.msrb.mxu1 %v9242_v35  ;;  %6194 = vmatmul.bf16.vlgmr.msra.gmra.mxu2 %v15762_v45  ;;  %v9135_v35 = vld [vmem:[%s15727_s1 + $0x1528] sm:$0xf0]  ;;  %v10334_v45 = vld [vmem:[%s15727_s1 + $0x1614] sm:$0xf]  ;;  %v9399_v7 = vld [vmem:[%s15727_s1 + $0x1738] sm:$0xf0] }
 0x2e6   :  { %6238 = vmatpush.bf16.msrb.mxu2 %v9306_v8  ;;  %6207 = vmatmul.bf16.vlgmr.msra.gmra.mxu3 %v15764_v14  ;;  %v10320_v8 = vld [vmem:[%s15727_s1 + $0x15a4] sm:$0xf]  ;;  %v9258_v57 = vor.u32 %v10334_v45, %v9255_v3  ;;  %v9407_v3 = vld [vmem:[%s15727_s1 + $0x1748] sm:$0xf0]  ;;  %v9463_v0 = vld [vmem:[%s15727_s1 + $0x17b8] sm:$0xf0]  ;;  %v9402_v15 = vor.u32 %v10370_v2, %v9399_v7 }
 0x2e7   :  { %6251 = vmatpush.bf16.msrb.mxu3 %v9370_v42  ;;  %v10336_v42 = vld [vmem:[%s15727_s1 + $0x1624] sm:$0xf]  ;;  %v9202_v31 = vor.u32 %v10320_v8, %v9199_v59  ;;  %v9615_v59 = vld [vmem:[%s15727_s1 + $0x18e8] sm:$0xf0] }
 0x2e8   :  { %6213 = vmatpush.bf16.msrb.mxu0 %v9170_v36  ;;  %v5987_v44 = vpop.f32.mrf.mxu2  ;;  %v5963_v36 = vpop.f32.mrf.mxu0  ;;  %v9266_v24 = vor.u32 %v10336_v42, %v9263_v62  ;;  %v10408_v8 = vld [vmem:[%s15727_s1 + $0x1864] sm:$0xf]  ;;  %v6331_v7 = vld [vmem:[%s15730_s3 + $0x68] sm:$0xff] }
 0x2e9   :  { %6226 = vmatpush.bf16.msrb.mxu1 %v9234_v61  ;;  %v5988_v4 = vadd.f32 %v5987_v44, %v5975_v30  ;;  %v6000_v5 = vpop.f32.mrf.mxu3  ;;  %v9138_v61 = vor.u32 %v10304_v33, %v9135_v35  ;;  %v10426_v30 = vld [vmem:[%s15727_s1 + $0x18f4] sm:$0xf]  ;;  %v9487_v35 = vld [vmem:[%s15727_s1 + $0x17e8] sm:$0xf0]  ;;  %v10424_v44 = vld [vmem:[%s15727_s1 + $0x18e4] sm:$0xf] }
 0x2ea   :  { %6239 = vmatpush.bf16.msrb.mxu2 %v9298_v43  ;;  %v5976_v43 = vpop.f32.mrf.mxu1  ;;  %v9626_v33 = vor.u32 %v10426_v30, %v9623_v22  ;;  %v15765_v36 = vld [vmem:[#allocation9_spill] sm:$0xff]  ;;  %v9391_v30 = vld [vmem:[%s15727_s1 + $0x1728] sm:$0xf0] }
 0x2eb   :  { %6252 = vmatpush.bf16.msrb.mxu3 %v9362_v38  ;;  %v15394_v50 = vadd.f32 %v6000_v5, %v5988_v4  ;;  %v9127_v38 = vld [vmem:[%s15727_s1 + $0x1518] sm:$0xf0]  ;;  %v10374_v5 = vld [vmem:[%s15727_s1 + $0x1754] sm:$0xf]  ;;  %v10384_v22 = vld [vmem:[%s15727_s1 + $0x17a4] sm:$0xf] }
 0x2ec   :  { %6214 = vmatpush.bf16.msrb.mxu0 %v9162_v26  ;;  %v9130_v14 = vor.u32 %v10302_v40, %v9127_v38  ;;  %v10300_v26 = vld [vmem:[%s15727_s1 + $0x1504] sm:$0xf]  ;;  %v9479_v43 = vld [vmem:[%s15727_s1 + $0x17d8] sm:$0xf0]  ;;  %v15766_v40 = vld [vmem:[#allocation11_spill] sm:$0xff] }
 0x2ed   :  { %6227 = vmatpush.bf16.msrb.mxu1 %v9226_v46  ;;  %v9119_v46 = vld [vmem:[%s15727_s1 + $0x1508] sm:$0xf0]  ;;  %v10422_v38 = vld [vmem:[%s15727_s1 + $0x18d4] sm:$0xf]  ;;  %v15768_v2 = vld [vmem:[#allocation13_spill] sm:$0xff] }
 0x2ee   :  { %6240 = vmatpush.bf16.msrb.mxu2 %v9290_v53  ;;  %v9194_v53 = vor.u32 %v10318_v25, %v9191_v48  ;;  %v9607_v25 = vld [vmem:[%s15727_s1 + $0x18d8] sm:$0xf0]  ;;  %v9482_v48 = vor.u32 %v10390_v28, %v9479_v43 }
 0x2ef   :  { %6253 = vmatpush.bf16.msrb.mxu3 %v9354_v51  ;;  %v10332_v51 = vld [vmem:[%s15727_s1 + $0x1604] sm:$0xf]  ;;  %v9511_v43 = vld [vmem:[%s15727_s1 + $0x1818] sm:$0xf0] }
 0x2f0   :  { %6215 = vmatpush.bf16.msrb.mxu0 %v9154_v20  ;;  %v5989_v58 = vpop.f32.mrf.mxu2  ;;  %v10394_v20 = vld [vmem:[%s15727_s1 + $0x17f4] sm:$0xf] }
 0x2f1   :  { %6228 = vmatpush.bf16.msrb.mxu1 %v9218_v52  ;;  %v6002_v23 = vpop.f32.mrf.mxu3  ;;  %v9122_v52 = vor.u32 %v10300_v26, %v9119_v46  ;;  %v9535_v26 = vld [vmem:[%s15727_s1 + $0x1848] sm:$0xf0]  ;;  %v10386_v58 = vld [vmem:[%s15727_s1 + $0x17b4] sm:$0xf] }
 0x2f2   :  { %6241 = vmatpush.bf16.msrb.mxu2 %v9282_v39  ;;  %v9495_v39 = vld [vmem:[%s15727_s1 + $0x17f8] sm:$0xf0]  ;;  %v9466_v19 = vor.u32 %v10386_v58, %v9463_v0  ;;  %v6330_v58 = vld [vmem:[%s15730_s3 + $0x60] sm:$0xff] }
 0x2f3   :  { %6254 = vmatpush.bf16.msrb.mxu3 %v9346_v18  ;;  %v9250_v18 = vor.u32 %v10332_v51, %v9247_v29  ;;  %v9498_v12 = vor.u32 %v10394_v20, %v9495_v39  ;;  %v10402_v20 = vld [vmem:[%s15727_s1 + $0x1834] sm:$0xf]  ;;  %v9527_v23 = vld [vmem:[%s15727_s1 + $0x1838] sm:$0xf0] }
 0x2f4   :  { %6216 = vmatpush.bf16.msrb.mxu0 %v9146_v37  ;;  %v10376_v37 = vld [vmem:[%s15727_s1 + $0x1764] sm:$0xf]  ;;  %v9591_v39 = vld [vmem:[%s15727_s1 + $0x18b8] sm:$0xf0] }
 0x2f5   :  { %6229 = vmatpush.bf16.msrb.mxu1 %v9210_v16  ;;  %v9423_v16 = vld [vmem:[%s15727_s1 + $0x1768] sm:$0xf0] }
 0x2f6   :  { %6242 = vmatpush.bf16.msrb.mxu2 %v9274_v34  ;;  %v10392_v34 = vld [vmem:[%s15727_s1 + $0x17e4] sm:$0xf]  ;;  %v9426_v42 = vor.u32 %v10376_v37, %v9423_v16  ;;  %v9519_v37 = vld [vmem:[%s15727_s1 + $0x1828] sm:$0xf0] }
 0x2f7   :  { %6255 = vmatpush.bf16.msrb.mxu3 %v9338_v27  ;;  %v9551_v27 = vld [vmem:[%s15727_s1 + $0x1868] sm:$0xf0]  ;;  %v9490_v62 = vor.u32 %v10392_v34, %v9487_v35 }
 0x2f8   :  { %6217 = vmatpush.bf16.msrb.mxu0 %v9138_v61  ;;  %v9554_v4 = vor.u32 %v10408_v8, %v9551_v27  ;;  %v9618_v61 = vor.u32 %v10424_v44, %v9615_v59  ;;  %v9583_v35 = vld [vmem:[%s15727_s1 + $0x18a8] sm:$0xf0] }
 0x2f9   :  { %6230 = vmatpush.bf16.msrb.mxu1 %v9202_v31  ;;  %v10406_v31 = vld [vmem:[%s15727_s1 + $0x1854] sm:$0xf] }
 0x2fa   :  { %6243 = vmatpush.bf16.msrb.mxu2 %v9266_v24  ;;  %v9543_v24 = vld [vmem:[%s15727_s1 + $0x1858] sm:$0xf0] }
 0x2fb   :  { %6256 = vmatpush.bf16.msrb.mxu3 %v9330_v11  ;;  %v9418_v11 = vor.u32 %v10374_v5, %v9415_v32  ;;  %v9546_v45 = vor.u32 %v10406_v31, %v9543_v24  ;;  %v9383_v5 = vld [vmem:[%s15727_s1 + $0x1718] sm:$0xf0]  ;;  %v10382_v32 = vld [vmem:[%s15727_s1 + $0x1794] sm:$0xf] }
 0x2fc   :  { %6218 = vmatpush.bf16.msrb.mxu0 %v9130_v14  ;;  %v10404_v14 = vld [vmem:[%s15727_s1 + $0x1844] sm:$0xf]  ;;  %v10414_v31 = vld [vmem:[%s15727_s1 + $0x1894] sm:$0xf]  ;;  %v9575_v24 = vld [vmem:[%s15727_s1 + $0x1898] sm:$0xf0] }
 0x2fd   :  { %6231 = vmatpush.bf16.msrb.mxu1 %v9194_v53  ;;  %v10420_v53 = vld [vmem:[%s15727_s1 + $0x18c4] sm:$0xf]  ;;  %v9538_v29 = vor.u32 %v10404_v14, %v9535_v26  ;;  %v9567_v26 = vld [vmem:[%s15727_s1 + $0x1888] sm:$0xf0] }
 0x2fe   :  { %6244 = vmatpush.bf16.msrb.mxu2 %v9258_v57  ;;  %v9599_v57 = vld [vmem:[%s15727_s1 + $0x18c8] sm:$0xf0]  ;;  %v10412_v14 = vld [vmem:[%s15727_s1 + $0x1884] sm:$0xf] }
 0x2ff   :  { %6257 = vmatpush.bf16.msrb.mxu3 %v9322_v13  ;;  %v9474_v13 = vor.u32 %v10388_v55, %v9471_v56  ;;  %v10396_v55 = vld [vmem:[%s15727_s1 + $0x1804] sm:$0xf] }
 0x300   :  { %6219 = vmatpush.bf16.msrb.mxu0 %v9122_v52  ;;  %v6013_v46 = vpop.f32.mrf.mxu0  ;;  %v10418_v52 = vld [vmem:[%s15727_s1 + $0x18b4] sm:$0xf] }
 0x301   :  { %6232 = vmatpush.bf16.msrb.mxu1 %v9186_v1  ;;  %v6014_v63 = vadd.f32 %v6013_v46, %v15394_v50  ;;  %v6026_v51 = vpop.f32.mrf.mxu1  ;;  %v9602_v50 = vor.u32 %v10420_v53, %v9599_v57  ;;  %v9530_v1 = vor.u32 %v10402_v20, %v9527_v23 }
 0x302   :  { %6245 = vmatpush.bf16.msrb.mxu2 %v9250_v18  ;;  %v10368_v18 = vld [vmem:[%s15727_s1 + $0x1724] sm:$0xf] }
 0x303   :  { %6258 = vmatpush.bf16.msrb.mxu3 %v9314_v41  ;;  %6220 = vmatmul.bf16.vlgmr.msrb.gmra.mxu0 %v15765_v36  ;;  %v6027_v10 = vadd.f32 %v6026_v51, %v6014_v63  ;;  %v9594_v41 = vor.u32 %v10418_v52, %v9591_v39  ;;  %v9394_v27 = vor.u32 %v10368_v18, %v9391_v30  ;;  %v9447_v36 = vld [vmem:[%s15727_s1 + $0x1798] sm:$0xf0]  ;;  %v6326_v52 = vld [vmem:[%s15730_s3 + $0x40] sm:$0xff]  ;;  %v6324_v30 = vld [vmem:[%s15730_s3 + $0x30] sm:$0xff] }
 0x304   :  { %6264 = vmatpush.bf16.msra.mxu0 %v9434_v17  ;;  %6233 = vmatmul.bf16.vlgmr.msrb.gmra.mxu1 %v15766_v40  ;;  %v6333_v51 = vld [vmem:[%s15730_s3 + $0x78] sm:$0xff] }
 0x305   :  { %6277 = vmatpush.bf16.msra.mxu1 %v9498_v12  ;;  %6246 = vmatmul.bf16.vlgmr.msrb.gmra.mxu2 %v13072_v6  ;;  %v10372_v6 = vld [vmem:[%s15727_s1 + $0x1744] sm:$0xf]  ;;  %v9455_v12 = vld [vmem:[%s15727_s1 + $0x17a8] sm:$0xf0]  ;;  %v6325_v39 = vld [vmem:[%s15730_s3 + $0x38] sm:$0xff] }
 0x306   :  { %6290 = vmatpush.bf16.msra.mxu2 %v9562_v9  ;;  %6259 = vmatmul.bf16.vlgmr.msrb.gmra.mxu3 %v13085_v60  ;;  %v9610_v60 = vor.u32 %v10422_v38, %v9607_v25  ;;  %v9410_v49 = vor.u32 %v10372_v6, %v9407_v3  ;;  %v10400_v9 = vld [vmem:[%s15727_s1 + $0x1824] sm:$0xf]  ;;  %v9450_v38 = vor.u32 %v10382_v32, %v9447_v36  ;;  %v9439_v3 = vld [vmem:[%s15727_s1 + $0x1788] sm:$0xf0] }
 0x307   :  { %6303 = vmatpush.bf16.msra.mxu3 %v9626_v33  ;;  %v10416_v33 = vld [vmem:[%s15727_s1 + $0x18a4] sm:$0xf]  ;;  %v9578_v6 = vor.u32 %v10414_v31, %v9575_v24 }
 0x308   :  { %6265 = vmatpush.bf16.msra.mxu0 %v9426_v42  ;;  %v6039_v17 = vpop.f32.mrf.mxu2  ;;  %v6015_v8 = vpop.f32.mrf.mxu0  ;;  %v9458_v42 = vor.u32 %v10384_v22, %v9455_v12  ;;  %v9586_v28 = vor.u32 %v10416_v33, %v9583_v35  ;;  %v6322_v12 = vld [vmem:[%s15730_s3 + $0x20] sm:$0xff]  ;;  %v6319_v33 = vld [vmem:[%s15730_s3 + $0x8] sm:$0xff] }
 0x309   :  { %6278 = vmatpush.bf16.msra.mxu1 %v9490_v62  ;;  %v6040_v16 = vadd.f32 %v6039_v17, %v6027_v10  ;;  %v6052_v34 = vpop.f32.mrf.mxu3  ;;  %v6028_v44 = vpop.f32.mrf.mxu1  ;;  %v9522_v62 = vor.u32 %v10400_v9, %v9519_v37  ;;  %v6323_v17 = vld [vmem:[%s15730_s3 + $0x28] sm:$0xff]  ;;  %v6321_v9 = vld [vmem:[%s15730_s3 + $0x18] sm:$0xff]  ;;  %v6318_v35 = vld [vmem:[%s15730_s3] sm:$0xff]  ;;  %v6316_v8 = vmax.f32 %v14156_v21, 0.0 }
 0x30a   :  { %6291 = vmatpush.bf16.msra.mxu2 %v9554_v4  ;;  %v10366_v4 = vld [vmem:[%s15727_s1 + $0x1714] sm:$0xf] }
 0x30b   :  { %6304 = vmatpush.bf16.msra.mxu3 %v9618_v61  ;;  %v6053_v59 = vadd.f32 %v6052_v34, %v6040_v16  ;;  %v10398_v61 = vld [vmem:[%s15727_s1 + $0x1814] sm:$0xf]  ;;  %v9386_v40 = vor.u32 %v10366_v4, %v9383_v5 }
 0x30c   :  { %6266 = vmatpush.bf16.msra.mxu0 %v9418_v11  ;;  %v9514_v25 = vor.u32 %v10398_v61, %v9511_v43  ;;  %v10364_v11 = vld [vmem:[%s15727_s1 + $0x1704] sm:$0xf]  ;;  %v6320_v34 = vld [vmem:[%s15730_s3 + $0x10] sm:$0xff] }
 0x30d   :  { %6279 = vmatpush.bf16.msra.mxu1 %v9482_v48  ;;  %v9375_v48 = vld [vmem:[%s15727_s1 + $0x1708] sm:$0xf0] }
 0x30e   :  { %6292 = vmatpush.bf16.msra.mxu2 %v9546_v45  ;;  %v10380_v45 = vld [vmem:[%s15727_s1 + $0x1784] sm:$0xf]  ;;  %v9378_v53 = vor.u32 %v10364_v11, %v9375_v48  ;;  %v6341_v48 = vld [vmem:[%s15730_s3 + $0xb8] sm:$0xff] }
 0x30f   :  { %6305 = vmatpush.bf16.msra.mxu3 %v9610_v60  ;;  %v9503_v60 = vld [vmem:[%s15727_s1 + $0x1808] sm:$0xf0]  ;;  %v9442_v57 = vor.u32 %v10380_v45, %v9439_v3  ;;  %v6342_v11 = vld [vmem:[%s15730_s3 + $0xc0] sm:$0xff]  ;;  %v6340_v3 = vld [vmem:[%s15730_s3 + $0xb0] sm:$0xff] }
 0x310   :  { %6267 = vmatpush.bf16.msra.mxu0 %v9410_v49  ;;  %v6041_v56 = vpop.f32.mrf.mxu2  ;;  %v9506_v63 = vor.u32 %v10396_v55, %v9503_v60  ;;  %v9570_v49 = vor.u32 %v10412_v14, %v9567_v26  ;;  %v6339_v60 = vld [vmem:[%s15730_s3 + $0xa8] sm:$0xff]  ;;  %v6337_v26 = vld [vmem:[%s15730_s3 + $0x98] sm:$0xff] }
 0x311   :  { %6280 = vmatpush.bf16.msra.mxu1 %v9474_v13  ;;  %v6054_v46 = vpop.f32.mrf.mxu3  ;;  %v6332_v13 = vld [vmem:[%s15730_s3 + $0x70] sm:$0xff]  ;;  %v6338_v56 = vld [vmem:[%s15730_s3 + $0xa0] sm:$0xff] }
 0x312   :  { %6293 = vmatpush.bf16.msra.mxu2 %v9538_v29  ;;  %v15767_v29 = vld [vmem:[#allocation12_spill] sm:$0xff]  ;;  %v6336_v46 = vld [vmem:[%s15730_s3 + $0x90] sm:$0xff] }
 0x313   :  { %6306 = vmatpush.bf16.msra.mxu3 %v9602_v50  ;;  %v6329_v50 = vld [vmem:[%s15730_s3 + $0x58] sm:$0xff] }
 0x314   :  { %6268 = vmatpush.bf16.msra.mxu0 %v9402_v15 }
 0x315   :  { %6281 = vmatpush.bf16.msra.mxu1 %v9466_v19 }
 0x316   :  { %6294 = vmatpush.bf16.msra.mxu2 %v9530_v1 }
 0x317   :  { %6307 = vmatpush.bf16.msra.mxu3 %v9594_v41 }
 0x318   :  { %6269 = vmatpush.bf16.msra.mxu0 %v9394_v27 }
 0x319   :  { %6282 = vmatpush.bf16.msra.mxu1 %v9458_v42 }
 0x31a   :  { %6295 = vmatpush.bf16.msra.mxu2 %v9522_v62 }
 0x31b   :  { %6308 = vmatpush.bf16.msra.mxu3 %v9586_v28 }
 0x31c   :  { %6270 = vmatpush.bf16.msra.mxu0 %v9386_v40 }
 0x31d   :  { %6283 = vmatpush.bf16.msra.mxu1 %v9450_v38 }
 0x31e   :  { %6296 = vmatpush.bf16.msra.mxu2 %v9514_v25 }
 0x31f   :  { %6309 = vmatpush.bf16.msra.mxu3 %v9578_v6 }
 0x320   :  { %6271 = vmatpush.bf16.msra.mxu0 %v9378_v53  ;;  %v6065_v10 = vpop.f32.mrf.mxu0 }
 0x321   :  { %6284 = vmatpush.bf16.msra.mxu1 %v9442_v57  ;;  %v6066_v0 = vadd.f32 %v6065_v10, %v6053_v59  ;;  %v6078_v20 = vpop.f32.mrf.mxu1 }
 0x322   :  { %6297 = vmatpush.bf16.msra.mxu2 %v9506_v63 }
 0x323   :  { %6310 = vmatpush.bf16.msra.mxu3 %v9570_v49  ;;  %6272 = vmatmul.bf16.vlgmr.msra.gmra.mxu0 %v15767_v29  ;;  %v6079_v23 = vadd.f32 %v6078_v20, %v6066_v0  ;;  %v6334_v29 = vld [vmem:[%s15730_s3 + $0x80] sm:$0xff] }
 0x324   :  { %6351 = vmatpush.msrb.mxu0 %v6333_v51  ;;  %6285 = vmatmul.bf16.vlgmr.msra.gmra.mxu1 %v15768_v2  ;;  %v6335_v51 = vld [vmem:[%s15730_s3 + $0x88] sm:$0xff] }
 0x325   :  { %6298 = vmatmul.bf16.vlgmr.msra.gmra.mxu2 %v13279_v54  ;;  %v6328_v54 = vld [vmem:[%s15730_s3 + $0x50] sm:$0xff]  ;;  %6378 = vmatpush.msrb.mxu1 %v6342_v11 }
 0x326   :  { %6311 = vmatmul.bf16.vlgmr.msra.gmra.mxu3 %v13290_v47  ;;  %6352 = vmatpush.msrb.mxu0 %v6332_v13  ;;  %v6327_v47 = vld [vmem:[%s15730_s3 + $0x48] sm:$0xff] }
 0x327   :  { %6379 = vmatpush.msrb.mxu1 %v6341_v48 }
 0x328   :  { %6353 = vmatpush.msrb.mxu0 %v6331_v7  ;;  %v6091_v15 = vpop.f32.mrf.mxu2  ;;  %v6067_v18 = vpop.f32.mrf.mxu0 }
 0x329   :  { %v6092_v19 = vadd.f32 %v6091_v15, %v6079_v23  ;;  %v6104_v1 = vpop.f32.mrf.mxu3  ;;  %v6080_v22 = vpop.f32.mrf.mxu1  ;;  %6380 = vmatpush.msrb.mxu1 %v6340_v3 }
 0x32a   :  { %6354 = vmatpush.msrb.mxu0 %v6330_v58 }
 0x32b   :  { %v6105_v41 = vadd.f32 %v6104_v1, %v6092_v19  ;;  %6381 = vmatpush.msrb.mxu1 %v6339_v60 }
 0x32c   :  { %6355 = vmatpush.msrb.mxu0 %v6329_v50 }
 0x32d   :  { %6382 = vmatpush.msrb.mxu1 %v6338_v56 }
 0x32e   :  { %6356 = vmatpush.msrb.mxu0 %v6328_v54 }
 0x32f   :  { %6383 = vmatpush.msrb.mxu1 %v6337_v26 }
 0x330   :  { %6357 = vmatpush.msrb.mxu0 %v6327_v47  ;;  %v6093_v37 = vpop.f32.mrf.mxu2 }
 0x331   :  { %v6106_v16 = vpop.f32.mrf.mxu3  ;;  %6384 = vmatpush.msrb.mxu1 %v6336_v46  ;;  %v6391_v37 = vlaneseq }
 0x332   :  { %6358 = vmatpush.msrb.mxu0 %v6326_v52  ;;  %v10428_v16 = vld [vmem:[%s15731_s4] ss:$0 sm:$0xff] }
 0x333   :  { %6385 = vmatpush.msrb.mxu1 %v6335_v51 }
 0x334   :  { %6359 = vmatpush.msrb.mxu0 %v6325_v39 }
 0x335   :  { %6386 = vmatpush.msrb.mxu1 %v6334_v29 }
 0x336   :  { %6360 = vmatpush.msrb.mxu0 %v6324_v30 }
 0x338   :  { %6361 = vmatpush.msrb.mxu0 %v6323_v17 }
 0x33a   :  { %6362 = vmatpush.msrb.mxu0 %v6322_v12 }
 0x33c   :  { %6363 = vmatpush.msrb.mxu0 %v6321_v9 }
 0x33e   :  { %6364 = vmatpush.msrb.mxu0 %v6320_v34 }
 0x340   :  { %6365 = vmatpush.msrb.mxu0 %v6319_v33  ;;  %v6117_v27 = vpop.f32.mrf.mxu0  ;;  %v6392_v33 = vand.u32 127, %v6391_v37 }
 0x341   :  { %v6118_v44 = vadd.f32 %v6117_v27, %v6105_v41  ;;  %v6130_v59 = vpop.f32.mrf.mxu1 }
 0x342   :  { %6366 = vmatpush.msrb.mxu0 %v6318_v35  ;;  %vm6393_vm1 = vcmp.lt.s32.totalorder %v6392_v33, 6  ;;  %vm6420_vm7 = vcmp.eq.s32.totalorder %v6392_v33, 6 }
 0x343   :  { %6367 = vmatmul.f32.vlgmr.msrb.gmra.mxu0 %v6316_v8  ;;  %v6131_v42 = vadd.f32 %v6130_v59, %v6118_v44 }
 0x348   :  { %v6143_v62 = vpop.f32.mrf.mxu2  ;;  %v6119_v32 = vpop.f32.mrf.mxu0 }
 0x349   :  { %v6144_v4 = vadd.f32 %v6143_v62, %v6131_v42  ;;  %v6156_v5 = vpop.f32.mrf.mxu3  ;;  %v6132_v28 = vpop.f32.mrf.mxu1 }
 0x34b   :  { %v6157_v36 = vadd.f32 %v6156_v5, %v6144_v4 }
 0x350   :  { %v6145_v61 = vpop.f32.mrf.mxu2 }
 0x351   :  { %v6158_v43 = vpop.f32.mrf.mxu3 }
 0x360   :  { %v6169_v31 = vpop.f32.mrf.mxu0 }
 0x361   :  { %v6182_v24 = vpop.f32.mrf.mxu1  ;;  %v6170_v53 = vadd.f32 %v6169_v31, %v6157_v36 }
 0x363   :  { %v6183_v2 = vadd.f32 %v6182_v24, %v6170_v53 }
 0x368   :  { %v6195_v40 = vpop.f32.mrf.mxu2  ;;  %v6171_v25 = vpop.f32.mrf.mxu0 }
 0x369   :  { %v6208_v38 = vpop.f32.mrf.mxu3  ;;  %v6184_v21 = vpop.f32.mrf.mxu1  ;;  %v6196_v7 = vadd.f32 %v6195_v40, %v6183_v2 }
 0x36b   :  { %v6209_v10 = vadd.f32 %v6208_v38, %v6196_v7 }
 0x370   :  { %v6197_v45 = vpop.f32.mrf.mxu2 }
 0x371   :  { %v6210_v6 = vpop.f32.mrf.mxu3 }
 0x380   :  { %v6221_v55 = vpop.f32.mrf.mxu0 }
 0x381   :  { %v6234_v14 = vpop.f32.mrf.mxu1  ;;  %v6222_v54 = vadd.f32 %v6221_v55, %v6209_v10 }
 0x383   :  { %v6235_v0 = vadd.f32 %v6234_v14, %v6222_v54 }
 0x388   :  { %v6247_v57 = vpop.f32.mrf.mxu2  ;;  %v6223_v49 = vpop.f32.mrf.mxu0 }
 0x389   :  { %v6260_v63 = vpop.f32.mrf.mxu3  ;;  %v6236_v13 = vpop.f32.mrf.mxu1  ;;  %v6248_v20 = vadd.f32 %v6247_v57, %v6235_v0 }
 0x38b   :  { %v6261_v47 = vadd.f32 %v6260_v63, %v6248_v20 }
 0x390   :  { %v6249_v58 = vpop.f32.mrf.mxu2 }
 0x391   :  { %v6262_v50 = vpop.f32.mrf.mxu3 }
 0x3a0   :  { %v6273_v23 = vpop.f32.mrf.mxu0 }
 0x3a1   :  { %v6286_v52 = vpop.f32.mrf.mxu1  ;;  %v6274_v39 = vadd.f32 %v6273_v23, %v6261_v47 }
 0x3a3   :  { %v6287_v15 = vadd.f32 %v6286_v52, %v6274_v39 }
 0x3a8   :  { %v6299_v19 = vpop.f32.mrf.mxu2  ;;  %v6275_v30 = vpop.f32.mrf.mxu0 }
 0x3a9   :  { %v6300_v1 = vadd.f32 %v6299_v19, %v6287_v15  ;;  %v6312_v18 = vpop.f32.mrf.mxu3  ;;  %v6288_v22 = vpop.f32.mrf.mxu1 }
 0x3ab   :  { %v6313_v41 = vadd.f32 %v6312_v18, %v6300_v1 }
 0x3ad   :  { %v6317_v17 = vmax.f32 %v6313_v41, 0.0 }
 0x3af   :  { %9627 = vmatmul.msk.f32.vlgmr.msrb.gmra.mxu1 %vm6347_vm0, %v6317_v17 }
 0x3b0   :  { %v6301_v12 = vpop.f32.mrf.mxu2 }
 0x3b1   :  { %v6314_v9 = vpop.f32.mrf.mxu3 }
 0x3c0   :  { %v6368_v34 = vpop.f32.mrf.mxu0 }
 0x3c1   :  { %v6369_v35 = vadd.f32 %v10428_v16, %v6368_v34 }
 0x42c   :  { %v6388_v8 = vpop.f32.mrf.mxu1 }
 0x42d   :  { %v6389_v27 = vadd.f32 %v6388_v8, %v6369_v35 }
 0x42f   :  { %v6394_v44 = vsel %vm6393_vm1, %v6389_v27, -inf }
 0x430   :  { %v6396_v59 = vsel %vm6395_vm2, %v6394_v44, -inf }
 0x431   :  { %6397 = vmax.xlane.f32.xlu0 %v6396_v59 }
 0x4a4   :  { %v6398_v42 = vpop.xlane.xlu0 %6397 }
 0x4a5   :  { %v6399_v62 = vsub.f32 %v6394_v44, %v6398_v42 }
 0x4a7   :  { %v6400_v4 = vmul.f32 1.442695, %v6399_v62 }
 0x4a9   :  { %10429 = vpow2.f32 %v6400_v4 }
 0x4af   :  { %v10430_v5 = vpop.eup %10429 }
 0x4b0   :  { %v6402_v32 = vsel %vm6395_vm2, %v10430_v5, 0.0 }
 0x4b1   :  { %6403 = vadd.xlane.f32.xlu0 %v6402_v32 }
 0x524   :  { %v6404_v28 = vpop.xlane.xlu0 %6403 }
 0x525   :  { %10431 = vrcp.f32 %v6404_v28  ;;  %v6416_v31 = vand.u32 2147483648, %v6404_v28  ;;  %v6414_v40 = vand.u32 2147483647, %v6404_v28  ;;  %vm6410_vm4 = vweird.f32 %v6404_v28 }
 0x527   :  { %v6417_v25 = vor.u32 1.1754944e-38, %v6416_v31  ;;  %vm6415_vm6 = vcmp.eq.f32.partialorder %v6414_v40, 8.507059e+37 }
 0x52b   :  { %v10432_v36 = vpop.eup %10431 }
 0x52c   :  { %v6406_v61 = vmul.f32 %v10432_v36, %v6404_v28  ;;  %vm6411_vm3 = vweird.f32 %v10432_v36 }
 0x52d   :  { %vm6412_vm5 = vmor %vm6410_vm4, %vm6411_vm3 }
 0x52e   :  { %v6407_v43 = vsub.f32 1.0, %v6406_v61 }
 0x530   :  { %v6408_v24 = vmul.f32 %v10432_v36, %v6407_v43 }
 0x532   :  { %v6409_v38 = vadd.f32 %v10432_v36, %v6408_v24 }
 0x534   :  { %v6413_v21 = vsel %vm6412_vm5, %v10432_v36, %v6409_v38 }
 0x535   :  { %v6418_v11 = vsel %vm6415_vm6, %v6417_v25, %v6413_v21 }
 0x536   :  { %v6419_v48 = vmul.f32 %v10430_v5, %v6418_v11 }
 0x538   :  { %v6421_v45 = vsel %vm6420_vm7, %v6389_v27, %v6419_v48 }
 0x539   :  { %6422 = vst [vmem:[%s15732_s5] sm:$0x3] %v6421_v45 }

</bundles_post_ra>
